<compile_context>
chip_gen: v7x
topology: tpu7x:2x2x1
jax: 0.10.0
libtpu: 0.0.40
codegen_flags: <defaults>
</compile_context>

<pallas_src>
import math
from functools import partial

import jax
import jax.numpy as jnp
from jax.experimental import pallas as pl
from jax.experimental.pallas import tpu as pltpu


# ----------------------------- chip-dependent tuning ------------------------------

def _chip_tuning():
    """Pick linear-matmul tile targets + scoped VMEM budget from the chip's VMEM size."""
    vmem_bytes = 64 << 20
    try:
        info = pltpu.get_tpu_info()
        vmem_bytes = int(getattr(info, "vmem_capacity_bytes", vmem_bytes))
    except Exception:
        pass
    if vmem_bytes >= (128 << 20):        # v5e / v6e: 128 MiB VMEM -> bigger blocks
        return 512, 512, 1024, 64 << 20
    # v7x-style 64 MiB per TensorCore -> keep the per-step footprint bounded,
    # leave the scoped-VMEM default alone.
    return 256, 256, 512, None


TM_T, TN_T, TK_T, VMEM_LIMIT = _chip_tuning()


def _pick_tile(dim, target, align):
    """Largest tile <= target that exactly divides `dim` and respects alignment.
    Falls back to the full extent (always a legal block) when no aligned divisor exists."""
    if dim <= target:
        return dim
    t = (target // align) * align
    while t >= align:
        if dim % t == 0:
            return t
        t -= align
    return dim


# ----------------------------- Pallas kernels ------------------------------

def _linear_kernel(x_ref, w_ref, b_ref, o_ref, acc_ref, *, relu):
    # K-reduction accumulator: init on first k-step, finalize (bias + relu + store) on last.
    @pl.when(pl.program_id(2) == 0)
    def _():
        acc_ref[...] = jnp.zeros_like(acc_ref)

    x = x_ref[...]
    if x.dtype != jnp.bfloat16:
        x = x.astype(jnp.bfloat16)          # in-VMEM cast (no HBM round trip)
    acc_ref[...] += jnp.dot(x, w_ref[...], preferred_element_type=jnp.float32)

    @pl.when(pl.program_id(2) == pl.num_programs(2) - 1)
    def _():
        y = acc_ref[...] + b_ref[...]
        if relu:
            y = jnp.maximum(y, 0.0)
        o_ref[...] = y.astype(o_ref.dtype)


def _attn_kernel(q_ref, k_ref, v_ref, m_ref, o_ref, *, n_head, scale, causal):
    # One batch element per grid step. Heads are handled with a static (unrolled) loop,
    # reading/writing lane slices of the D-wide activations -> no in-kernel transpose.
    Sq = q_ref.shape[1]
    Sk = k_ref.shape[1]
    D = q_ref.shape[2]
    dk = D // n_head

    mask_add = m_ref[0]                       # (1, Sk) f32 additive key-pad mask (0 / -1e9)
    if causal:
        qi = jax.lax.broadcasted_iota(jnp.int32, (Sq, Sk), 0)
        ki = jax.lax.broadcasted_iota(jnp.int32, (Sq, Sk), 1)
        mask_add = mask_add + jnp.where(ki > qi, jnp.float32(-1e9), jnp.float32(0.0))

    for h in range(n_head):                   # static unroll
        lo = h * dk
        qh = q_ref[0, :, lo:lo + dk]          # (Sq, dk) bf16
        kh = k_ref[0, :, lo:lo + dk]          # (Sk, dk) bf16
        vh = v_ref[0, :, lo:lo + dk]          # (Sk, dk) bf16

        s = jax.lax.dot_general(qh, kh, (((1,), (1,)), ((), ())),
                                preferred_element_type=jnp.float32) * scale
        s = s + mask_add                       # masked_fill(mask, -1e9) equivalent
        s = s - jnp.max(s, axis=-1, keepdims=True)
        p = jnp.exp(s)
        inv = pl.reciprocal(jnp.sum(p, axis=-1, keepdims=True), approx=True)
        p = (p * inv).astype(vh.dtype)
        oh = jnp.dot(p, vh, preferred_element_type=jnp.float32)   # (Sq, dk) f32
        o_ref[0, :, lo:lo + dk] = oh.astype(o_ref.dtype)


def _ln_residual_kernel(x_ref, r_ref, g_ref, b_ref, of_ref, ob_ref, *, eps):
    # Fused residual add + LayerNorm, f32 math; emits f32 residual stream + bf16 matmul copy.
    x = x_ref[...] + r_ref[...].astype(jnp.float32)
    mean = jnp.mean(x, axis=-1, keepdims=True)
    var = jnp.mean((x - mean) ** 2, axis=-1, keepdims=True)
    y = (x - mean) * jax.lax.rsqrt(var + eps) * g_ref[...] + b_ref[...]
    of_ref[...] = y
    ob_ref[...] = y.astype(jnp.bfloat16)


# ----------------------------- Pallas wrappers ------------------------------

def pallas_linear(x, w, b=None, *, relu=False, out_dtype=jnp.float32):
    """x: (M, K) @ w: (K, N) bf16 + b: (1, N) f32 -> (M, N) out_dtype. f32 MXU accumulation."""
    M, K = x.shape
    N = w.shape[1]
    tm = _pick_tile(M, TM_T, 16)      # 16-row alignment for packed bf16 sublanes
    tn = _pick_tile(N, TN_T, 128)
    tk = _pick_tile(K, TK_T, 128)
    b2 = jnp.zeros((1, N), jnp.float32) if b is None else b
    return pl.pallas_call(
        partial(_linear_kernel, relu=relu),
        out_shape=jax.ShapeDtypeStruct((M, N), out_dtype),
        grid=(M // tm, N // tn, K // tk),
        in_specs=[pl.BlockSpec((tm, tk), lambda i, j, k: (i, k)),
                  pl.BlockSpec((tk, tn), lambda i, j, k: (k, j)),
                  pl.BlockSpec((1, tn), lambda i, j, k: (0, j))],
        out_specs=pl.BlockSpec((tm, tn), lambda i, j, k: (i, j)),
        scratch_shapes=[pltpu.VMEM((tm, tn), jnp.float32)],
        compiler_params=pltpu.CompilerParams(
            dimension_semantics=("parallel", "parallel", "arbitrary"),
            vmem_limit_bytes=VMEM_LIMIT),
    )(x, w, b2)


def pallas_attention(q_src, kv_src, kpad_add, *, n_head, causal, q_col, k_col, v_col, d_model):
    """q_src : (B, Sq, Cq*D) bf16 containing Q at D-wide column-block `q_col`.
       kv_src: (B, Sk, Ck*D) bf16 containing K at block `k_col`, V at block `v_col`.
       kpad_add: (B, 1, Sk) f32 additive key-pad mask (0 / -1e9).
       Returns lane-dense (B, Sq, D) bf16 (heads concatenated along D)."""
    B, Sq = q_src.shape[0], q_src.shape[1]
    Sk = kv_src.shape[1]
    D = d_model
    dk = D // n_head
    scale = 1.0 / math.sqrt(dk)
    return pl.pallas_call(
        partial(_attn_kernel, n_head=n_head, scale=scale, causal=causal),
        out_shape=jax.ShapeDtypeStruct((B, Sq, D), jnp.bfloat16),
        grid=(B,),
        in_specs=[pl.BlockSpec((1, Sq, D), lambda b: (b, 0, q_col)),
                  pl.BlockSpec((1, Sk, D), lambda b: (b, 0, k_col)),
                  pl.BlockSpec((1, Sk, D), lambda b: (b, 0, v_col)),
                  pl.BlockSpec((1, 1, Sk), lambda b: (b, 0, 0))],
        out_specs=pl.BlockSpec((1, Sq, D), lambda b: (b, 0, 0)),
        compiler_params=pltpu.CompilerParams(
            dimension_semantics=("parallel",), vmem_limit_bytes=VMEM_LIMIT),
    )(q_src, kv_src, kv_src, kpad_add)


def pallas_layernorm_residual(x_f32, r, gamma, beta, eps=1e-5, *, tm_target=512):
    """LayerNorm(x + r).  x_f32: (M, D) f32 residual stream; r: (M, D) bf16/f32 sub-layer out.
    Returns (f32 residual output, bf16 copy for the next matmul)."""
    M, D = x_f32.shape
    tm = _pick_tile(M, tm_target, 8)
    return pl.pallas_call(
        partial(_ln_residual_kernel, eps=eps),
        out_shape=(jax.ShapeDtypeStruct((M, D), jnp.float32),
                   jax.ShapeDtypeStruct((M, D), jnp.bfloat16)),
        grid=(M // tm,),
        in_specs=[pl.BlockSpec((tm, D), lambda i: (i, 0)),
                  pl.BlockSpec((tm, D), lambda i: (i, 0)),
                  pl.BlockSpec((1, D), lambda i: (0, 0)),
                  pl.BlockSpec((1, D), lambda i: (0, 0))],
        out_specs=(pl.BlockSpec((tm, D), lambda i: (i, 0)),
                   pl.BlockSpec((tm, D), lambda i: (i, 0))),
        compiler_params=pltpu.CompilerParams(
            dimension_semantics=("parallel",), vmem_limit_bytes=VMEM_LIMIT),
    )(x_f32, r, gamma, beta)


# ----------------------------- model pieces ------------------------------

def mha_self(x_bf16, kpad_add, p, n_head, B, S, D, *, causal):
    """Self-attention: fused QKV projection -> attention -> output projection. All bf16 I/O."""
    qkv = pallas_linear(x_bf16, p["wqkv"], p["bqkv"], out_dtype=jnp.bfloat16)     # (B*S, 3D)
    o = pallas_attention(qkv.reshape(B, S, 3 * D), qkv.reshape(B, S, 3 * D), kpad_add,
                         n_head=n_head, causal=causal, q_col=0, k_col=1, v_col=2,
                         d_model=D)                                               # (B, S, D)
    return pallas_linear(o.reshape(B * S, D), p["wo"], p["bo"], out_dtype=jnp.bfloat16)


def mha_cross(xq_bf16, enc_bf16, kpad_add, p, n_head, B, Sq, Sk, D):
    """Cross-attention: Q from decoder stream, fused KV from encoder output."""
    q = pallas_linear(xq_bf16, p["wq"], p["bq"], out_dtype=jnp.bfloat16)          # (B*Sq, D)
    kv = pallas_linear(enc_bf16, p["wkv"], p["bkv"], out_dtype=jnp.bfloat16)      # (B*Sk, 2D)
    o = pallas_attention(q.reshape(B, Sq, D), kv.reshape(B, Sk, 2 * D), kpad_add,
                         n_head=n_head, causal=False, q_col=0, k_col=0, v_col=1,
                         d_model=D)                                               # (B, Sq, D)
    return pallas_linear(o.reshape(B * Sq, D), p["wo"], p["bo"], out_dtype=jnp.bfloat16)


def encoder_layer(x_f32, x_bf16, kpad_add, p, n_head, B, S, D):
    a = mha_self(x_bf16, kpad_add, p["attn"], n_head, B, S, D, causal=False)
    x2_f32, x2_bf16 = pallas_layernorm_residual(x_f32, a, p["ln1_g"], p["ln1_b"])
    h = pallas_linear(x2_bf16, p["w1"], p["b1"], relu=True, out_dtype=jnp.bfloat16)
    f = pallas_linear(h, p["w2"], p["b2"], out_dtype=jnp.bfloat16)
    return pallas_layernorm_residual(x2_f32, f, p["ln2_g"], p["ln2_b"])


def decoder_layer(x_f32, x_bf16, enc_bf16, self_kpad, cross_kpad, p, n_head, B, St, Ss, D):
    a = mha_self(x_bf16, self_kpad, p["self_attn"], n_head, B, St, D, causal=True)
    x2_f32, x2_bf16 = pallas_layernorm_residual(x_f32, a, p["ln1_g"], p["ln1_b"])
    a = mha_cross(x2_bf16, enc_bf16, cross_kpad, p["cross_attn"], n_head, B, St, Ss, D)
    x3_f32, x3_bf16 = pallas_layernorm_residual(x2_f32, a, p["ln2_g"], p["ln2_b"])
    h = pallas_linear(x3_bf16, p["w1"], p["b1"], relu=True, out_dtype=jnp.bfloat16)
    f = pallas_linear(h, p["w2"], p["b2"], out_dtype=jnp.bfloat16)
    return pallas_layernorm_residual(x3_f32, f, p["ln3_g"], p["ln3_b"])


def sinusoidal_pos_encoding(max_len, d_model):
    pos = jnp.arange(max_len, dtype=jnp.float32)[:, None]
    i = jnp.arange(d_model)[None, :]
    angle = pos / jnp.power(10000.0, (2 * (i // 2)).astype(jnp.float32) / d_model)
    return jnp.where(i % 2 == 0, jnp.sin(angle), jnp.cos(angle)).astype(jnp.float32)


def _key_pad_additive(tokens, pad_idx):
    # (B, 1, Sk) additive mask: -1e9 where the key position is a pad token.
    B, Sk = tokens.shape
    return jnp.where(tokens == pad_idx, jnp.float32(-1e9), jnp.float32(0.0)).reshape(B, 1, Sk)


def transformer_forward(params, src_input, tgt_input, *, pad_idx, n_head):
    B, Ss = src_input.shape
    _, St = tgt_input.shape
    D = params["src_emb"].shape[1]

    src_kpad = _key_pad_additive(src_input, pad_idx)       # (B, 1, Ss)
    tgt_kpad = _key_pad_additive(tgt_input, pad_idx)       # (B, 1, St)

    # --- encoder ---
    enc = jnp.take(params["src_emb"], src_input, axis=0) + params["pos_enc"][:Ss][None]
    x_f32 = enc.reshape(B * Ss, D)
    x_bf16 = x_f32.astype(jnp.bfloat16)
    for p in params["enc_layers"]:
        x_f32, x_bf16 = encoder_layer(x_f32, x_bf16, src_kpad, p, n_head, B, Ss, D)
    enc_bf16 = x_bf16                                      # (B*Ss, D) reused by every decoder layer

    # --- decoder ---
    dec = jnp.take(params["tgt_emb"], tgt_input, axis=0) + params["pos_enc"][:St][None]
    y_f32 = dec.reshape(B * St, D)
    y_bf16 = y_f32.astype(jnp.bfloat16)
    for p in params["dec_layers"]:
        y_f32, y_bf16 = decoder_layer(y_f32, y_bf16, enc_bf16, tgt_kpad, src_kpad,
                                      p, n_head, B, St, Ss, D)

    # --- output projection (nn.Linear(d_model, tgt_vocab, bias=False)) ---
    logits = pallas_linear(y_bf16, params["w_out"], out_dtype=jnp.float32)   # (B*St, tgt_vocab)
    return logits  # == logits.view(-1, logits.size(-1))


# ----------------------------- parameter init ------------------------------

def init_params(key, src_vocab, tgt_vocab, d_model, n_head, d_fnn,
                n_enc_layers, n_dec_layers, max_len):
    keys = iter(jax.random.split(key, 1024))

    def nrm_f32(shape):
        return jax.random.normal(next(keys), shape, jnp.float32) * 0.02

    def w_bf16(shape):
        # matmul weights stored in bf16 once at init (no per-forward convert)
        return nrm_f32(shape).astype(jnp.bfloat16)

    def bias(n):
        return jnp.zeros((1, n), jnp.float32)

    def attn_self_block():
        return {"wqkv": w_bf16((d_model, 3 * d_model)), "bqkv": bias(3 * d_model),
                "wo": w_bf16((d_model, d_model)), "bo": bias(d_model)}

    def attn_cross_block():
        return {"wq": w_bf16((d_model, d_model)), "bq": bias(d_model),
                "wkv": w_bf16((d_model, 2 * d_model)), "bkv": bias(2 * d_model),
                "wo": w_bf16((d_model, d_model)), "bo": bias(d_model)}

    def ffn_block():
        return {"w1": w_bf16((d_model, d_fnn)), "b1": bias(d_fnn),
                "w2": w_bf16((d_fnn, d_model)), "b2": bias(d_model)}

    def ln():
        return jnp.ones((1, d_model), jnp.float32), jnp.zeros((1, d_model), jnp.float32)

    enc_layers = []
    for _ in range(n_enc_layers):
        g1, b1 = ln(); g2, b2 = ln()
        enc_layers.append({"attn": attn_self_block(), **ffn_block(),
                           "ln1_g": g1, "ln1_b": b1, "ln2_g": g2, "ln2_b": b2})

    dec_layers = []
    for _ in range(n_dec_layers):
        g1, b1 = ln(); g2, b2 = ln(); g3, b3 = ln()
        dec_layers.append({"self_attn": attn_self_block(), "cross_attn": attn_cross_block(),
                           **ffn_block(),
                           "ln1_g": g1, "ln1_b": b1, "ln2_g": g2, "ln2_b": b2,
                           "ln3_g": g3, "ln3_b": b3})

    return {"src_emb": nrm_f32((src_vocab, d_model)),
            "tgt_emb": nrm_f32((tgt_vocab, d_model)),
            "pos_enc": sinusoidal_pos_encoding(max_len, d_model),
            "enc_layers": enc_layers,
            "dec_layers": dec_layers,
            "w_out": w_bf16((d_model, tgt_vocab))}


# ----------------------------- main ------------------------------

if __name__ == "__main__":
    # small but lane-friendly config (d_model multiple of 128, vocabs multiples of 128)
    src_vocab_size, tgt_vocab_size = 256, 384
    d_model, n_head, d_fnn = 128, 4, 256
    n_enc_layers, n_dec_layers = 2, 2
    pad_idx, max_len = 0, 16
    batch, src_len, tgt_len = 2, 8, 8

    key = jax.random.PRNGKey(0)
    kp, ks, kt = jax.random.split(key, 3)
    params = init_params(kp, src_vocab_size, tgt_vocab_size, d_model, n_head,
                         d_fnn, n_enc_layers, n_dec_layers, max_len)
    src_input = jax.random.randint(ks, (batch, src_len), 0, src_vocab_size, jnp.int32)
    tgt_input = jax.random.randint(kt, (batch, tgt_len), 0, tgt_vocab_size, jnp.int32)

    fwd = jax.jit(partial(transformer_forward, pad_idx=pad_idx, n_head=n_head))
    logits = fwd(params, src_input, tgt_input)
    jax.block_until_ready(logits)

    assert logits.shape == (batch * tgt_len, tgt_vocab_size)
    assert bool(jnp.all(jnp.isfinite(logits)))
    print("KERNEL_OK")
</pallas_src>

<mosaic_0001>
module attributes {stable_mosaic.version = 11 : i64} {
  func.func @_linear_kernel(%arg0: i32, %arg1: i32, %arg2: i32, %arg3: memref<16x128xbf16, #tpu.memory_space<vmem>>, %arg4: memref<128x128xbf16, #tpu.memory_space<vmem>>, %arg5: memref<1x128xf32, #tpu.memory_space<vmem>>, %arg6: memref<16x128xbf16, #tpu.memory_space<vmem>>, %arg7: memref<16x128xf32, #tpu.memory_space<vmem>>) attributes {dimension_semantics = [#tpu.dimension_semantics<parallel>, #tpu.dimension_semantics<parallel>, #tpu.dimension_semantics<arbitrary>], iteration_bounds = array<i64: 1, 3, 1>, scalar_prefetch = 0 : i64, scratch_operands = 1 : i64, tpu.core_type = #tpu.core_type<tc>, window_params = [{transform_indices = @transform_0, window_bounds = array<i64: 16, 128>}, {transform_indices = @transform_1, window_bounds = array<i64: 128, 128>}, {transform_indices = @transform_2, window_bounds = array<i64: 1, 128>}, {transform_indices = @transform_3, window_bounds = array<i64: 16, 128>}]} {
    %c0_i32 = arith.constant 0 : i32
    %0 = arith.cmpi eq, %arg2, %c0_i32 : i32
    %1 = arith.extui %0 : i1 to i32
    %c0_i32_0 = arith.constant 0 : i32
    %2 = arith.cmpi ne, %1, %c0_i32_0 : i32
    scf.if %2 {
      %cst_10 = arith.constant 0.000000e+00 : f32
      %12 = vector.broadcast %cst_10 : f32 to vector<16x128xf32>
      %c0_11 = arith.constant 0 : index
      %c0_12 = arith.constant 0 : index
      %13 = vector.load %arg7[%c0_11, %c0_12] : memref<16x128xf32, #tpu.memory_space<vmem>>, vector<16x128xf32>
      tpu.vector_store %arg7[%c0_11, %c0_12], %12 {strides = array<i32>} : memref<16x128xf32, #tpu.memory_space<vmem>>, vector<16x128xf32>,
    } else {
    }
    %c0 = arith.constant 0 : index
    %c0_1 = arith.constant 0 : index
    %3 = vector.load %arg3[%c0, %c0_1] : memref<16x128xbf16, #tpu.memory_space<vmem>>, vector<16x128xbf16>
    %c0_2 = arith.constant 0 : index
    %c0_3 = arith.constant 0 : index
    %4 = vector.load %arg7[%c0_2, %c0_3] : memref<16x128xf32, #tpu.memory_space<vmem>>, vector<16x128xf32>
    %c0_4 = arith.constant 0 : index
    %c0_5 = arith.constant 0 : index
    %5 = vector.load %arg4[%c0_4, %c0_5] : memref<128x128xbf16, #tpu.memory_space<vmem>>, vector<128x128xbf16>
    %cst = arith.constant dense<0.000000e+00> : vector<16x128xf32>
    %6 = tpu.matmul %3, %5, %cst {dimension_numbers = #tpu.dot_dimension_numbers<[1], [0], [0], [1], [0, 0, 1, 1], [], []>} : vector<16x128xbf16>, vector<128x128xbf16>, vector<16x128xf32> -> vector<16x128xf32>
    %7 = arith.addf %4, %6 : vector<16x128xf32>
    %c0_6 = arith.constant 0 : index
    %c0_7 = arith.constant 0 : index
    %8 = vector.load %arg7[%c0_6, %c0_7] : memref<16x128xf32, #tpu.memory_space<vmem>>, vector<16x128xf32>
    tpu.vector_store %arg7[%c0_6, %c0_7], %7 {strides = array<i32>} : memref<16x128xf32, #tpu.memory_space<vmem>>, vector<16x128xf32>,
    %c0_i32_8 = arith.constant 0 : i32
    %9 = arith.cmpi eq, %arg2, %c0_i32_8 : i32
    %10 = arith.extui %9 : i1 to i32
    %c0_i32_9 = arith.constant 0 : i32
    %11 = arith.cmpi ne, %10, %c0_i32_9 : i32
    scf.if %11 {
      %c0_10 = arith.constant 0 : index
      %c0_11 = arith.constant 0 : index
      %12 = vector.load %arg7[%c0_10, %c0_11] : memref<16x128xf32, #tpu.memory_space<vmem>>, vector<16x128xf32>
      %c0_12 = arith.constant 0 : index
      %c0_13 = arith.constant 0 : index
      %13 = vector.load %arg5[%c0_12, %c0_13] : memref<1x128xf32, #tpu.memory_space<vmem>>, vector<1x128xf32>
      %14 = vector.broadcast %13 : vector<1x128xf32> to vector<16x128xf32>
      %15 = arith.addf %12, %14 : vector<16x128xf32>
      %16 = arith.truncf %15 : vector<16x128xf32> to vector<16x128xbf16>
      %c0_14 = arith.constant 0 : index
      %c0_15 = arith.constant 0 : index
      %17 = vector.load %arg6[%c0_14, %c0_15] : memref<16x128xbf16, #tpu.memory_space<vmem>>, vector<16x128xbf16>
      tpu.vector_store %arg6[%c0_14, %c0_15], %16 {strides = array<i32>} : memref<16x128xbf16, #tpu.memory_space<vmem>>, vector<16x128xbf16>,
    } else {
    }
    return
  }
  func.func @transform_0(%arg0: i32, %arg1: i32, %arg2: i32) -> (i32, i32) {
    %c0_i32 = arith.constant 0 : i32
    return %arg0, %arg2 : i32, i32
  }
  func.func @transform_1(%arg0: i32, %arg1: i32, %arg2: i32) -> (i32, i32) {
    %c0_i32 = arith.constant 0 : i32
    return %arg2, %arg1 : i32, i32
  }
  func.func @transform_2(%arg0: i32, %arg1: i32, %arg2: i32) -> (i32, i32) {
    %c0_i32 = arith.constant 0 : i32
    %c0_i32_0 = arith.constant 0 : i32
    return %c0_i32, %arg1 : i32, i32
  }
  func.func @transform_3(%arg0: i32, %arg1: i32, %arg2: i32) -> (i32, i32) {
    %c0_i32 = arith.constant 0 : i32
    return %arg0, %arg1 : i32, i32
  }
}

module attributes {stable_mosaic.version = 11 : i64} {
  func.func @_linear_kernel(%arg0: i32, %arg1: i32, %arg2: i32, %arg3: memref<16x128xbf16, #tpu.memory_space<vmem>>, %arg4: memref<128x128xbf16, #tpu.memory_space<vmem>>, %arg5: memref<1x128xf32, #tpu.memory_space<vmem>>, %arg6: memref<16x128xbf16, #tpu.memory_space<vmem>>, %arg7: memref<16x128xf32, #tpu.memory_space<vmem>>) attributes {dimension_semantics = [#tpu.dimension_semantics<parallel>, #tpu.dimension_semantics<parallel>, #tpu.dimension_semantics<arbitrary>], iteration_bounds = array<i64: 1, 1, 1>, scalar_prefetch = 0 : i64, scratch_operands = 1 : i64, tpu.core_type = #tpu.core_type<tc>, window_params = [{transform_indices = @transform_0, window_bounds = array<i64: 16, 128>}, {transform_indices = @transform_1, window_bounds = array<i64: 128, 128>}, {transform_indices = @transform_2, window_bounds = array<i64: 1, 128>}, {transform_indices = @transform_3, window_bounds = array<i64: 16, 128>}]} {
    %c0_i32 = arith.constant 0 : i32
    %0 = arith.cmpi eq, %arg2, %c0_i32 : i32
    %1 = arith.extui %0 : i1 to i32
    %c0_i32_0 = arith.constant 0 : i32
    %2 = arith.cmpi ne, %1, %c0_i32_0 : i32
    scf.if %2 {
      %cst_10 = arith.constant 0.000000e+00 : f32
      %12 = vector.broadcast %cst_10 : f32 to vector<16x128xf32>
      %c0_11 = arith.constant 0 : index
      %c0_12 = arith.constant 0 : index
      %13 = vector.load %arg7[%c0_11, %c0_12] : memref<16x128xf32, #tpu.memory_space<vmem>>, vector<16x128xf32>
      tpu.vector_store %arg7[%c0_11, %c0_12], %12 {strides = array<i32>} : memref<16x128xf32, #tpu.memory_space<vmem>>, vector<16x128xf32>,
    } else {
    }
    %c0 = arith.constant 0 : index
    %c0_1 = arith.constant 0 : index
    %3 = vector.load %arg3[%c0, %c0_1] : memref<16x128xbf16, #tpu.memory_space<vmem>>, vector<16x128xbf16>
    %c0_2 = arith.constant 0 : index
    %c0_3 = arith.constant 0 : index
    %4 = vector.load %arg7[%c0_2, %c0_3] : memref<16x128xf32, #tpu.memory_space<vmem>>, vector<16x128xf32>
    %c0_4 = arith.constant 0 : index
    %c0_5 = arith.constant 0 : index
    %5 = vector.load %arg4[%c0_4, %c0_5] : memref<128x128xbf16, #tpu.memory_space<vmem>>, vector<128x128xbf16>
    %cst = arith.constant dense<0.000000e+00> : vector<16x128xf32>
    %6 = tpu.matmul %3, %5, %cst {dimension_numbers = #tpu.dot_dimension_numbers<[1], [0], [0], [1], [0, 0, 1, 1], [], []>} : vector<16x128xbf16>, vector<128x128xbf16>, vector<16x128xf32> -> vector<16x128xf32>
    %7 = arith.addf %4, %6 : vector<16x128xf32>
    %c0_6 = arith.constant 0 : index
    %c0_7 = arith.constant 0 : index
    %8 = vector.load %arg7[%c0_6, %c0_7] : memref<16x128xf32, #tpu.memory_space<vmem>>, vector<16x128xf32>
    tpu.vector_store %arg7[%c0_6, %c0_7], %7 {strides = array<i32>} : memref<16x128xf32, #tpu.memory_space<vmem>>, vector<16x128xf32>,
    %c0_i32_8 = arith.constant 0 : i32
    %9 = arith.cmpi eq, %arg2, %c0_i32_8 : i32
    %10 = arith.extui %9 : i1 to i32
    %c0_i32_9 = arith.constant 0 : i32
    %11 = arith.cmpi ne, %10, %c0_i32_9 : i32
    scf.if %11 {
      %c0_10 = arith.constant 0 : index
      %c0_11 = arith.constant 0 : index
      %12 = vector.load %arg7[%c0_10, %c0_11] : memref<16x128xf32, #tpu.memory_space<vmem>>, vector<16x128xf32>
      %c0_12 = arith.constant 0 : index
      %c0_13 = arith.constant 0 : index
      %13 = vector.load %arg5[%c0_12, %c0_13] : memref<1x128xf32, #tpu.memory_space<vmem>>, vector<1x128xf32>
      %14 = vector.broadcast %13 : vector<1x128xf32> to vector<16x128xf32>
      %15 = arith.addf %12, %14 : vector<16x128xf32>
      %16 = arith.truncf %15 : vector<16x128xf32> to vector<16x128xbf16>
      %c0_14 = arith.constant 0 : index
      %c0_15 = arith.constant 0 : index
      %17 = vector.load %arg6[%c0_14, %c0_15] : memref<16x128xbf16, #tpu.memory_space<vmem>>, vector<16x128xbf16>
      tpu.vector_store %arg6[%c0_14, %c0_15], %16 {strides = array<i32>} : memref<16x128xbf16, #tpu.memory_space<vmem>>, vector<16x128xbf16>,
    } else {
    }
    return
  }
  func.func @transform_0(%arg0: i32, %arg1: i32, %arg2: i32) -> (i32, i32) {
    %c0_i32 = arith.constant 0 : i32
    return %arg0, %arg2 : i32, i32
  }
  func.func @transform_1(%arg0: i32, %arg1: i32, %arg2: i32) -> (i32, i32) {
    %c0_i32 = arith.constant 0 : i32
    return %arg2, %arg1 : i32, i32
  }
  func.func @transform_2(%arg0: i32, %arg1: i32, %arg2: i32) -> (i32, i32) {
    %c0_i32 = arith.constant 0 : i32
    %c0_i32_0 = arith.constant 0 : i32
    return %c0_i32, %arg1 : i32, i32
  }
  func.func @transform_3(%arg0: i32, %arg1: i32, %arg2: i32) -> (i32, i32) {
    %c0_i32 = arith.constant 0 : i32
    return %arg0, %arg1 : i32, i32
  }
}

module attributes {stable_mosaic.version = 11 : i64} {
  func.func @_attn_kernel(%arg0: i32, %arg1: memref<1x8x128xbf16, #tpu.memory_space<vmem>>, %arg2: memref<1x8x128xbf16, #tpu.memory_space<vmem>>, %arg3: memref<1x8x128xbf16, #tpu.memory_space<vmem>>, %arg4: memref<1x1x8xf32, #tpu.memory_space<vmem>>, %arg5: memref<1x8x128xbf16, #tpu.memory_space<vmem>>) attributes {dimension_semantics = [#tpu.dimension_semantics<parallel>], iteration_bounds = array<i64: 2>, scalar_prefetch = 0 : i64, scratch_operands = 0 : i64, tpu.core_type = #tpu.core_type<tc>, window_params = [{transform_indices = @transform_0, window_bounds = array<i64: 1, 8, 128>}, {transform_indices = @transform_1, window_bounds = array<i64: 1, 8, 128>}, {transform_indices = @transform_2, window_bounds = array<i64: 1, 8, 128>}, {transform_indices = @transform_3, window_bounds = array<i64: 1, 1, 8>}, {transform_indices = @transform_4, window_bounds = array<i64: 1, 8, 128>}]} {
    %c0 = arith.constant 0 : index
    %c0_0 = arith.constant 0 : index
    %c0_1 = arith.constant 0 : index
    %0 = vector.load %arg4[%c0, %c0_0, %c0_1] : memref<1x1x8xf32, #tpu.memory_space<vmem>>, vector<1x1x8xf32>
    %1 = vector.shape_cast %0 : vector<1x1x8xf32> to vector<1x8xf32>
    %c0_2 = arith.constant 0 : index
    %c0_3 = arith.constant 0 : index
    %c0_4 = arith.constant 0 : index
    %2 = vector.load %arg1[%c0_2, %c0_3, %c0_4] : memref<1x8x128xbf16, #tpu.memory_space<vmem>>, vector<1x8x32xbf16>
    %3 = vector.shape_cast %2 : vector<1x8x32xbf16> to vector<8x32xbf16>
    %c0_5 = arith.constant 0 : index
    %c0_6 = arith.constant 0 : index
    %c0_7 = arith.constant 0 : index
    %4 = vector.load %arg2[%c0_5, %c0_6, %c0_7] : memref<1x8x128xbf16, #tpu.memory_space<vmem>>, vector<1x8x32xbf16>
    %5 = vector.shape_cast %4 : vector<1x8x32xbf16> to vector<8x32xbf16>
    %c0_8 = arith.constant 0 : index
    %c0_9 = arith.constant 0 : index
    %c0_10 = arith.constant 0 : index
    %6 = vector.load %arg3[%c0_8, %c0_9, %c0_10] : memref<1x8x128xbf16, #tpu.memory_space<vmem>>, vector<1x8x32xbf16>
    %7 = vector.shape_cast %6 : vector<1x8x32xbf16> to vector<8x32xbf16>
    %cst = arith.constant dense<0.000000e+00> : vector<8x8xf32>
    %8 = tpu.matmul %3, %5, %cst {dimension_numbers = #tpu.dot_dimension_numbers<[1], [1], [0], [0], [0, 0, 1, 0], [], []>} : vector<8x32xbf16>, vector<8x32xbf16>, vector<8x8xf32> -> vector<8x8xf32>
    %cst_11 = arith.constant 0.176776692 : f32
    %9 = vector.broadcast %cst_11 : f32 to vector<8x8xf32>
    %10 = arith.mulf %8, %9 : vector<8x8xf32>
    %11 = vector.broadcast %1 : vector<1x8xf32> to vector<8x8xf32>
    %12 = arith.addf %10, %11 : vector<8x8xf32>
    %cst_12 = arith.constant dense<0xFF800000> : vector<8xf32>
    %13 = vector.multi_reduction <maximumf>, %12, %cst_12 [1] : vector<8x8xf32> to vector<8xf32>
    %14 = vector.shape_cast %13 : vector<8xf32> to vector<8x1xf32>
    %15 = vector.broadcast %14 : vector<8x1xf32> to vector<8x8xf32>
    %16 = arith.subf %12, %15 : vector<8x8xf32>
    %17 = math.exp %16 : vector<8x8xf32>
    %cst_13 = arith.constant dense<0.000000e+00> : vector<8xf32>
    %18 = vector.multi_reduction <add>, %17, %cst_13 [1] : vector<8x8xf32> to vector<8xf32>
    %19 = vector.shape_cast %18 : vector<8xf32> to vector<8x1xf32>
    %20 = tpu.reciprocal %19 {approx = true} : vector<8x1xf32> -> vector<8x1xf32>
    %21 = vector.broadcast %20 : vector<8x1xf32> to vector<8x8xf32>
    %22 = arith.mulf %17, %21 : vector<8x8xf32>
    %23 = arith.truncf %22 : vector<8x8xf32> to vector<8x8xbf16>
    %cst_14 = arith.constant dense<0.000000e+00> : vector<8x32xf32>
    %24 = tpu.matmul %23, %7, %cst_14 {dimension_numbers = #tpu.dot_dimension_numbers<[1], [0], [0], [1], [0, 0, 1, 1], [], []>} : vector<8x8xbf16>, vector<8x32xbf16>, vector<8x32xf32> -> vector<8x32xf32>
    %25 = arith.truncf %24 : vector<8x32xf32> to vector<8x32xbf16>
    %c0_15 = arith.constant 0 : index
    %c0_16 = arith.constant 0 : index
    %c0_17 = arith.constant 0 : index
    %26 = vector.load %arg5[%c0_15, %c0_16, %c0_17] : memref<1x8x128xbf16, #tpu.memory_space<vmem>>, vector<1x8x32xbf16>
    %27 = vector.shape_cast %26 : vector<1x8x32xbf16> to vector<8x32xbf16>
    %28 = vector.shape_cast %25 : vector<8x32xbf16> to vector<1x8x32xbf16>
    tpu.vector_store %arg5[%c0_15, %c0_16, %c0_17], %28 {strides = array<i32>} : memref<1x8x128xbf16, #tpu.memory_space<vmem>>, vector<1x8x32xbf16>,
    %c0_18 = arith.constant 0 : index
    %c0_19 = arith.constant 0 : index
    %c32 = arith.constant 32 : index
    %29 = vector.load %arg1[%c0_18, %c0_19, %c32] : memref<1x8x128xbf16, #tpu.memory_space<vmem>>, vector<1x8x32xbf16>
    %30 = vector.shape_cast %29 : vector<1x8x32xbf16> to vector<8x32xbf16>
    %c0_20 = arith.constant 0 : index
    %c0_21 = arith.constant 0 : index
    %c32_22 = arith.constant 32 : index
    %31 = vector.load %arg2[%c0_20, %c0_21, %c32_22] : memref<1x8x128xbf16, #tpu.memory_space<vmem>>, vector<1x8x32xbf16>
    %32 = vector.shape_cast %31 : vector<1x8x32xbf16> to vector<8x32xbf16>
    %c0_23 = arith.constant 0 : index
    %c0_24 = arith.constant 0 : index
    %c32_25 = arith.constant 32 : index
    %33 = vector.load %arg3[%c0_23, %c0_24, %c32_25] : memref<1x8x128xbf16, #tpu.memory_space<vmem>>, vector<1x8x32xbf16>
    %34 = vector.shape_cast %33 : vector<1x8x32xbf16> to vector<8x32xbf16>
    %cst_26 = arith.constant dense<0.000000e+00> : vector<8x8xf32>
    %35 = tpu.matmul %30, %32, %cst_26 {dimension_numbers = #tpu.dot_dimension_numbers<[1], [1], [0], [0], [0, 0, 1, 0], [], []>} : vector<8x32xbf16>, vector<8x32xbf16>, vector<8x8xf32> -> vector<8x8xf32>
    %cst_27 = arith.constant 0.176776692 : f32
    %36 = vector.broadcast %cst_27 : f32 to vector<8x8xf32>
    %37 = arith.mulf %35, %36 : vector<8x8xf32>
    %38 = vector.broadcast %1 : vector<1x8xf32> to vector<8x8xf32>
    %39 = arith.addf %37, %38 : vector<8x8xf32>
    %cst_28 = arith.constant dense<0xFF800000> : vector<8xf32>
    %40 = vector.multi_reduction <maximumf>, %39, %cst_28 [1] : vector<8x8xf32> to vector<8xf32>
    %41 = vector.shape_cast %40 : vector<8xf32> to vector<8x1xf32>
    %42 = vector.broadcast %41 : vector<8x1xf32> to vector<8x8xf32>
    %43 = arith.subf %39, %42 : vector<8x8xf32>
    %44 = math.exp %43 : vector<8x8xf32>
    %cst_29 = arith.constant dense<0.000000e+00> : vector<8xf32>
    %45 = vector.multi_reduction <add>, %44, %cst_29 [1] : vector<8x8xf32> to vector<8xf32>
    %46 = vector.shape_cast %45 : vector<8xf32> to vector<8x1xf32>
    %47 = tpu.reciprocal %46 {approx = true} : vector<8x1xf32> -> vector<8x1xf32>
    %48 = vector.broadcast %47 : vector<8x1xf32> to vector<8x8xf32>
    %49 = arith.mulf %44, %48 : vector<8x8xf32>
    %50 = arith.truncf %49 : vector<8x8xf32> to vector<8x8xbf16>
    %cst_30 = arith.constant dense<0.000000e+00> : vector<8x32xf32>
    %51 = tpu.matmul %50, %34, %cst_30 {dimension_numbers = #tpu.dot_dimension_numbers<[1], [0], [0], [1], [0, 0, 1, 1], [], []>} : vector<8x8xbf16>, vector<8x32xbf16>, vector<8x32xf32> -> vector<8x32xf32>
    %52 = arith.truncf %51 : vector<8x32xf32> to vector<8x32xbf16>
    %c0_31 = arith.constant 0 : index
    %c0_32 = arith.constant 0 : index
    %c32_33 = arith.constant 32 : index
    %53 = vector.load %arg5[%c0_31, %c0_32, %c32_33] : memref<1x8x128xbf16, #tpu.memory_space<vmem>>, vector<1x8x32xbf16>
    %54 = vector.shape_cast %53 : vector<1x8x32xbf16> to vector<8x32xbf16>
    %55 = vector.shape_cast %52 : vector<8x32xbf16> to vector<1x8x32xbf16>
    tpu.vector_store %arg5[%c0_31, %c0_32, %c32_33], %55 {strides = array<i32>} : memref<1x8x128xbf16, #tpu.memory_space<vmem>>, vector<1x8x32xbf16>,
    %c0_34 = arith.constant 0 : index
    %c0_35 = arith.constant 0 : index
    %c64 = arith.constant 64 : index
    %56 = vector.load %arg1[%c0_34, %c0_35, %c64] : memref<1x8x128xbf16, #tpu.memory_space<vmem>>, vector<1x8x32xbf16>
    %57 = vector.shape_cast %56 : vector<1x8x32xbf16> to vector<8x32xbf16>
    %c0_36 = arith.constant 0 : index
    %c0_37 = arith.constant 0 : index
    %c64_38 = arith.constant 64 : index
    %58 = vector.load %arg2[%c0_36, %c0_37, %c64_38] : memref<1x8x128xbf16, #tpu.memory_space<vmem>>, vector<1x8x32xbf16>
    %59 = vector.shape_cast %58 : vector<1x8x32xbf16> to vector<8x32xbf16>
    %c0_39 = arith.constant 0 : index
    %c0_40 = arith.constant 0 : index
    %c64_41 = arith.constant 64 : index
    %60 = vector.load %arg3[%c0_39, %c0_40, %c64_41] : memref<1x8x128xbf16, #tpu.memory_space<vmem>>, vector<1x8x32xbf16>
    %61 = vector.shape_cast %60 : vector<1x8x32xbf16> to vector<8x32xbf16>
    %cst_42 = arith.constant dense<0.000000e+00> : vector<8x8xf32>
    %62 = tpu.matmul %57, %59, %cst_42 {dimension_numbers = #tpu.dot_dimension_numbers<[1], [1], [0], [0], [0, 0, 1, 0], [], []>} : vector<8x32xbf16>, vector<8x32xbf16>, vector<8x8xf32> -> vector<8x8xf32>
    %cst_43 = arith.constant 0.176776692 : f32
    %63 = vector.broadcast %cst_43 : f32 to vector<8x8xf32>
    %64 = arith.mulf %62, %63 : vector<8x8xf32>
    %65 = vector.broadcast %1 : vector<1x8xf32> to vector<8x8xf32>
    %66 = arith.addf %64, %65 : vector<8x8xf32>
    %cst_44 = arith.constant dense<0xFF800000> : vector<8xf32>
    %67 = vector.multi_reduction <maximumf>, %66, %cst_44 [1] : vector<8x8xf32> to vector<8xf32>
    %68 = vector.shape_cast %67 : vector<8xf32> to vector<8x1xf32>
    %69 = vector.broadcast %68 : vector<8x1xf32> to vector<8x8xf32>
    %70 = arith.subf %66, %69 : vector<8x8xf32>
    %71 = math.exp %70 : vector<8x8xf32>
    %cst_45 = arith.constant dense<0.000000e+00> : vector<8xf32>
    %72 = vector.multi_reduction <add>, %71, %cst_45 [1] : vector<8x8xf32> to vector<8xf32>
    %73 = vector.shape_cast %72 : vector<8xf32> to vector<8x1xf32>
    %74 = tpu.reciprocal %73 {approx = true} : vector<8x1xf32> -> vector<8x1xf32>
    %75 = vector.broadcast %74 : vector<8x1xf32> to vector<8x8xf32>
    %76 = arith.mulf %71, %75 : vector<8x8xf32>
    %77 = arith.truncf %76 : vector<8x8xf32> to vector<8x8xbf16>
    %cst_46 = arith.constant dense<0.000000e+00> : vector<8x32xf32>
    %78 = tpu.matmul %77, %61, %cst_46 {dimension_numbers = #tpu.dot_dimension_numbers<[1], [0], [0], [1], [0, 0, 1, 1], [], []>} : vector<8x8xbf16>, vector<8x32xbf16>, vector<8x32xf32> -> vector<8x32xf32>
    %79 = arith.truncf %78 : vector<8x32xf32> to vector<8x32xbf16>
    %c0_47 = arith.constant 0 : index
    %c0_48 = arith.constant 0 : index
    %c64_49 = arith.constant 64 : index
    %80 = vector.load %arg5[%c0_47, %c0_48, %c64_49] : memref<1x8x128xbf16, #tpu.memory_space<vmem>>, vector<1x8x32xbf16>
    %81 = vector.shape_cast %80 : vector<1x8x32xbf16> to vector<8x32xbf16>
    %82 = vector.shape_cast %79 : vector<8x32xbf16> to vector<1x8x32xbf16>
    tpu.vector_store %arg5[%c0_47, %c0_48, %c64_49], %82 {strides = array<i32>} : memref<1x8x128xbf16, #tpu.memory_space<vmem>>, vector<1x8x32xbf16>,
    %c0_50 = arith.constant 0 : index
    %c0_51 = arith.constant 0 : index
    %c96 = arith.constant 96 : index
    %83 = vector.load %arg1[%c0_50, %c0_51, %c96] : memref<1x8x128xbf16, #tpu.memory_space<vmem>>, vector<1x8x32xbf16>
    %84 = vector.shape_cast %83 : vector<1x8x32xbf16> to vector<8x32xbf16>
    %c0_52 = arith.constant 0 : index
    %c0_53 = arith.constant 0 : index
    %c96_54 = arith.constant 96 : index
    %85 = vector.load %arg2[%c0_52, %c0_53, %c96_54] : memref<1x8x128xbf16, #tpu.memory_space<vmem>>, vector<1x8x32xbf16>
    %86 = vector.shape_cast %85 : vector<1x8x32xbf16> to vector<8x32xbf16>
    %c0_55 = arith.constant 0 : index
    %c0_56 = arith.constant 0 : index
    %c96_57 = arith.constant 96 : index
    %87 = vector.load %arg3[%c0_55, %c0_56, %c96_57] : memref<1x8x128xbf16, #tpu.memory_space<vmem>>, vector<1x8x32xbf16>
    %88 = vector.shape_cast %87 : vector<1x8x32xbf16> to vector<8x32xbf16>
    %cst_58 = arith.constant dense<0.000000e+00> : vector<8x8xf32>
    %89 = tpu.matmul %84, %86, %cst_58 {dimension_numbers = #tpu.dot_dimension_numbers<[1], [1], [0], [0], [0, 0, 1, 0], [], []>} : vector<8x32xbf16>, vector<8x32xbf16>, vector<8x8xf32> -> vector<8x8xf32>
    %cst_59 = arith.constant 0.176776692 : f32
    %90 = vector.broadcast %cst_59 : f32 to vector<8x8xf32>
    %91 = arith.mulf %89, %90 : vector<8x8xf32>
    %92 = vector.broadcast %1 : vector<1x8xf32> to vector<8x8xf32>
    %93 = arith.addf %91, %92 : vector<8x8xf32>
    %cst_60 = arith.constant dense<0xFF800000> : vector<8xf32>
    %94 = vector.multi_reduction <maximumf>, %93, %cst_60 [1] : vector<8x8xf32> to vector<8xf32>
    %95 = vector.shape_cast %94 : vector<8xf32> to vector<8x1xf32>
    %96 = vector.broadcast %95 : vector<8x1xf32> to vector<8x8xf32>
    %97 = arith.subf %93, %96 : vector<8x8xf32>
    %98 = math.exp %97 : vector<8x8xf32>
    %cst_61 = arith.constant dense<0.000000e+00> : vector<8xf32>
    %99 = vector.multi_reduction <add>, %98, %cst_61 [1] : vector<8x8xf32> to vector<8xf32>
    %100 = vector.shape_cast %99 : vector<8xf32> to vector<8x1xf32>
    %101 = tpu.reciprocal %100 {approx = true} : vector<8x1xf32> -> vector<8x1xf32>
    %102 = vector.broadcast %101 : vector<8x1xf32> to vector<8x8xf32>
    %103 = arith.mulf %98, %102 : vector<8x8xf32>
    %104 = arith.truncf %103 : vector<8x8xf32> to vector<8x8xbf16>
    %cst_62 = arith.constant dense<0.000000e+00> : vector<8x32xf32>
    %105 = tpu.matmul %104, %88, %cst_62 {dimension_numbers = #tpu.dot_dimension_numbers<[1], [0], [0], [1], [0, 0, 1, 1], [], []>} : vector<8x8xbf16>, vector<8x32xbf16>, vector<8x32xf32> -> vector<8x32xf32>
    %106 = arith.truncf %105 : vector<8x32xf32> to vector<8x32xbf16>
    %c0_63 = arith.constant 0 : index
    %c0_64 = arith.constant 0 : index
    %c96_65 = arith.constant 96 : index
    %107 = vector.load %arg5[%c0_63, %c0_64, %c96_65] : memref<1x8x128xbf16, #tpu.memory_space<vmem>>, vector<1x8x32xbf16>
    %108 = vector.shape_cast %107 : vector<1x8x32xbf16> to vector<8x32xbf16>
    %109 = vector.shape_cast %106 : vector<8x32xbf16> to vector<1x8x32xbf16>
    tpu.vector_store %arg5[%c0_63, %c0_64, %c96_65], %109 {strides = array<i32>} : memref<1x8x128xbf16, #tpu.memory_space<vmem>>, vector<1x8x32xbf16>,
    return
  }
  func.func @transform_0(%arg0: i32) -> (i32, i32, i32) {
    %c0_i32 = arith.constant 0 : i32
    %c0_i32_0 = arith.constant 0 : i32
    %c0_i32_1 = arith.constant 0 : i32
    return %arg0, %c0_i32, %c0_i32_0 : i32, i32, i32
  }
  func.func @transform_1(%arg0: i32) -> (i32, i32, i32) {
    %c0_i32 = arith.constant 0 : i32
    %c1_i32 = arith.constant 1 : i32
    %c0_i32_0 = arith.constant 0 : i32
    return %arg0, %c0_i32, %c1_i32 : i32, i32, i32
  }
  func.func @transform_2(%arg0: i32) -> (i32, i32, i32) {
    %c0_i32 = arith.constant 0 : i32
    %c2_i32 = arith.constant 2 : i32
    %c0_i32_0 = arith.constant 0 : i32
    return %arg0, %c0_i32, %c2_i32 : i32, i32, i32
  }
  func.func @transform_3(%arg0: i32) -> (i32, i32, i32) {
    %c0_i32 = arith.constant 0 : i32
    %c0_i32_0 = arith.constant 0 : i32
    %c0_i32_1 = arith.constant 0 : i32
    return %arg0, %c0_i32, %c0_i32_0 : i32, i32, i32
  }
  func.func @transform_4(%arg0: i32) -> (i32, i32, i32) {
    %c0_i32 = arith.constant 0 : i32
    %c0_i32_0 = arith.constant 0 : i32
    %c0_i32_1 = arith.constant 0 : i32
    return %arg0, %c0_i32, %c0_i32_0 : i32, i32, i32
  }
}

module attributes {stable_mosaic.version = 11 : i64} {
  func.func @_ln_residual_kernel(%arg0: i32, %arg1: memref<16x128xf32, #tpu.memory_space<vmem>>, %arg2: memref<16x128xbf16, #tpu.memory_space<vmem>>, %arg3: memref<1x128xf32, #tpu.memory_space<vmem>>, %arg4: memref<1x128xf32, #tpu.memory_space<vmem>>, %arg5: memref<16x128xf32, #tpu.memory_space<vmem>>, %arg6: memref<16x128xbf16, #tpu.memory_space<vmem>>) attributes {dimension_semantics = [#tpu.dimension_semantics<parallel>], iteration_bounds = array<i64: 1>, scalar_prefetch = 0 : i64, scratch_operands = 0 : i64, tpu.core_type = #tpu.core_type<tc>, window_params = [{transform_indices = @transform_0, window_bounds = array<i64: 16, 128>}, {transform_indices = @transform_1, window_bounds = array<i64: 16, 128>}, {pipeline_mode = #tpu.pipeline_mode<synchronous>, transform_indices = @transform_2, window_bounds = array<i64: 1, 128>}, {pipeline_mode = #tpu.pipeline_mode<synchronous>, transform_indices = @transform_3, window_bounds = array<i64: 1, 128>}, {transform_indices = @transform_4, window_bounds = array<i64: 16, 128>}, {transform_indices = @transform_5, window_bounds = array<i64: 16, 128>}]} {
    %c0 = arith.constant 0 : index
    %c0_0 = arith.constant 0 : index
    %0 = vector.load %arg1[%c0, %c0_0] : memref<16x128xf32, #tpu.memory_space<vmem>>, vector<16x128xf32>
    %c0_1 = arith.constant 0 : index
    %c0_2 = arith.constant 0 : index
    %1 = vector.load %arg2[%c0_1, %c0_2] : memref<16x128xbf16, #tpu.memory_space<vmem>>, vector<16x128xbf16>
    %2 = arith.extf %1 : vector<16x128xbf16> to vector<16x128xf32>
    %3 = arith.addf %0, %2 : vector<16x128xf32>
    %cst = arith.constant dense<0.000000e+00> : vector<16xf32>
    %4 = vector.multi_reduction <add>, %3, %cst [1] : vector<16x128xf32> to vector<16xf32>
    %5 = vector.shape_cast %4 : vector<16xf32> to vector<16x1xf32>
    %cst_3 = arith.constant 1.280000e+02 : f32
    %6 = vector.broadcast %cst_3 : f32 to vector<16x1xf32>
    %7 = arith.divf %5, %6 : vector<16x1xf32>
    %8 = vector.broadcast %7 : vector<16x1xf32> to vector<16x128xf32>
    %9 = arith.subf %3, %8 : vector<16x128xf32>
    %10 = arith.mulf %9, %9 : vector<16x128xf32>
    %cst_4 = arith.constant dense<0.000000e+00> : vector<16xf32>
    %11 = vector.multi_reduction <add>, %10, %cst_4 [1] : vector<16x128xf32> to vector<16xf32>
    %12 = vector.shape_cast %11 : vector<16xf32> to vector<16x1xf32>
    %cst_5 = arith.constant 1.280000e+02 : f32
    %13 = vector.broadcast %cst_5 : f32 to vector<16x1xf32>
    %14 = arith.divf %12, %13 : vector<16x1xf32>
    %15 = vector.broadcast %7 : vector<16x1xf32> to vector<16x128xf32>
    %16 = arith.subf %3, %15 : vector<16x128xf32>
    %cst_6 = arith.constant 9.99999974E-6 : f32
    %17 = vector.broadcast %cst_6 : f32 to vector<16x1xf32>
    %18 = arith.addf %14, %17 : vector<16x1xf32>
    %19 = math.rsqrt %18 : vector<16x1xf32>
    %20 = vector.broadcast %19 : vector<16x1xf32> to vector<16x128xf32>
    %21 = arith.mulf %16, %20 : vector<16x128xf32>
    %c0_7 = arith.constant 0 : index
    %c0_8 = arith.constant 0 : index
    %22 = vector.load %arg3[%c0_7, %c0_8] : memref<1x128xf32, #tpu.memory_space<vmem>>, vector<1x128xf32>
    %23 = vector.broadcast %22 : vector<1x128xf32> to vector<16x128xf32>
    %24 = arith.mulf %21, %23 : vector<16x128xf32>
    %c0_9 = arith.constant 0 : index
    %c0_10 = arith.constant 0 : index
    %25 = vector.load %arg4[%c0_9, %c0_10] : memref<1x128xf32, #tpu.memory_space<vmem>>, vector<1x128xf32>
    %26 = vector.broadcast %25 : vector<1x128xf32> to vector<16x128xf32>
    %27 = arith.addf %24, %26 : vector<16x128xf32>
    %c0_11 = arith.constant 0 : index
    %c0_12 = arith.constant 0 : index
    %28 = vector.load %arg5[%c0_11, %c0_12] : memref<16x128xf32, #tpu.memory_space<vmem>>, vector<16x128xf32>
    tpu.vector_store %arg5[%c0_11, %c0_12], %27 {strides = array<i32>} : memref<16x128xf32, #tpu.memory_space<vmem>>, vector<16x128xf32>,
    %29 = arith.truncf %27 : vector<16x128xf32> to vector<16x128xbf16>
    %c0_13 = arith.constant 0 : index
    %c0_14 = arith.constant 0 : index
    %30 = vector.load %arg6[%c0_13, %c0_14] : memref<16x128xbf16, #tpu.memory_space<vmem>>, vector<16x128xbf16>
    tpu.vector_store %arg6[%c0_13, %c0_14], %29 {strides = array<i32>} : memref<16x128xbf16, #tpu.memory_space<vmem>>, vector<16x128xbf16>,
    return
  }
  func.func @transform_0(%arg0: i32) -> (i32, i32) {
    %c0_i32 = arith.constant 0 : i32
    %c0_i32_0 = arith.constant 0 : i32
    return %arg0, %c0_i32 : i32, i32
  }
  func.func @transform_1(%arg0: i32) -> (i32, i32) {
    %c0_i32 = arith.constant 0 : i32
    %c0_i32_0 = arith.constant 0 : i32
    return %arg0, %c0_i32 : i32, i32
  }
  func.func @transform_2(%arg0: i32) -> (i32, i32) {
    %c0_i32 = arith.constant 0 : i32
    %c0_i32_0 = arith.constant 0 : i32
    %c0_i32_1 = arith.constant 0 : i32
    return %c0_i32, %c0_i32_0 : i32, i32
  }
  func.func @transform_3(%arg0: i32) -> (i32, i32) {
    %c0_i32 = arith.constant 0 : i32
    %c0_i32_0 = arith.constant 0 : i32
    %c0_i32_1 = arith.constant 0 : i32
    return %c0_i32, %c0_i32_0 : i32, i32
  }
  func.func @transform_4(%arg0: i32) -> (i32, i32) {
    %c0_i32 = arith.constant 0 : i32
    %c0_i32_0 = arith.constant 0 : i32
    return %arg0, %c0_i32 : i32, i32
  }
  func.func @transform_5(%arg0: i32) -> (i32, i32) {
    %c0_i32 = arith.constant 0 : i32
    %c0_i32_0 = arith.constant 0 : i32
    return %arg0, %c0_i32 : i32, i32
  }
}

module attributes {stable_mosaic.version = 11 : i64} {
  func.func @_linear_kernel(%arg0: i32, %arg1: i32, %arg2: i32, %arg3: memref<16x256xbf16, #tpu.memory_space<vmem>>, %arg4: memref<256x128xbf16, #tpu.memory_space<vmem>>, %arg5: memref<1x128xf32, #tpu.memory_space<vmem>>, %arg6: memref<16x128xbf16, #tpu.memory_space<vmem>>, %arg7: memref<16x128xf32, #tpu.memory_space<vmem>>) attributes {dimension_semantics = [#tpu.dimension_semantics<parallel>, #tpu.dimension_semantics<parallel>, #tpu.dimension_semantics<arbitrary>], iteration_bounds = array<i64: 1, 1, 1>, scalar_prefetch = 0 : i64, scratch_operands = 1 : i64, tpu.core_type = #tpu.core_type<tc>, window_params = [{transform_indices = @transform_0, window_bounds = array<i64: 16, 256>}, {transform_indices = @transform_1, window_bounds = array<i64: 256, 128>}, {transform_indices = @transform_2, window_bounds = array<i64: 1, 128>}, {transform_indices = @transform_3, window_bounds = array<i64: 16, 128>}]} {
    %c0_i32 = arith.constant 0 : i32
    %0 = arith.cmpi eq, %arg2, %c0_i32 : i32
    %1 = arith.extui %0 : i1 to i32
    %c0_i32_0 = arith.constant 0 : i32
    %2 = arith.cmpi ne, %1, %c0_i32_0 : i32
    scf.if %2 {
      %cst_10 = arith.constant 0.000000e+00 : f32
      %12 = vector.broadcast %cst_10 : f32 to vector<16x128xf32>
      %c0_11 = arith.constant 0 : index
      %c0_12 = arith.constant 0 : index
      %13 = vector.load %arg7[%c0_11, %c0_12] : memref<16x128xf32, #tpu.memory_space<vmem>>, vector<16x128xf32>
      tpu.vector_store %arg7[%c0_11, %c0_12], %12 {strides = array<i32>} : memref<16x128xf32, #tpu.memory_space<vmem>>, vector<16x128xf32>,
    } else {
    }
    %c0 = arith.constant 0 : index
    %c0_1 = arith.constant 0 : index
    %3 = vector.load %arg3[%c0, %c0_1] : memref<16x256xbf16, #tpu.memory_space<vmem>>, vector<16x256xbf16>
    %c0_2 = arith.constant 0 : index
    %c0_3 = arith.constant 0 : index
    %4 = vector.load %arg7[%c0_2, %c0_3] : memref<16x128xf32, #tpu.memory_space<vmem>>, vector<16x128xf32>
    %c0_4 = arith.constant 0 : index
    %c0_5 = arith.constant 0 : index
    %5 = vector.load %arg4[%c0_4, %c0_5] : memref<256x128xbf16, #tpu.memory_space<vmem>>, vector<256x128xbf16>
    %cst = arith.constant dense<0.000000e+00> : vector<16x128xf32>
    %6 = tpu.matmul %3, %5, %cst {dimension_numbers = #tpu.dot_dimension_numbers<[1], [0], [0], [1], [0, 0, 1, 1], [], []>} : vector<16x256xbf16>, vector<256x128xbf16>, vector<16x128xf32> -> vector<16x128xf32>
    %7 = arith.addf %4, %6 : vector<16x128xf32>
    %c0_6 = arith.constant 0 : index
    %c0_7 = arith.constant 0 : index
    %8 = vector.load %arg7[%c0_6, %c0_7] : memref<16x128xf32, #tpu.memory_space<vmem>>, vector<16x128xf32>
    tpu.vector_store %arg7[%c0_6, %c0_7], %7 {strides = array<i32>} : memref<16x128xf32, #tpu.memory_space<vmem>>, vector<16x128xf32>,
    %c0_i32_8 = arith.constant 0 : i32
    %9 = arith.cmpi eq, %arg2, %c0_i32_8 : i32
    %10 = arith.extui %9 : i1 to i32
    %c0_i32_9 = arith.constant 0 : i32
    %11 = arith.cmpi ne, %10, %c0_i32_9 : i32
    scf.if %11 {
      %c0_10 = arith.constant 0 : index
      %c0_11 = arith.constant 0 : index
      %12 = vector.load %arg7[%c0_10, %c0_11] : memref<16x128xf32, #tpu.memory_space<vmem>>, vector<16x128xf32>
      %c0_12 = arith.constant 0 : index
      %c0_13 = arith.constant 0 : index
      %13 = vector.load %arg5[%c0_12, %c0_13] : memref<1x128xf32, #tpu.memory_space<vmem>>, vector<1x128xf32>
      %14 = vector.broadcast %13 : vector<1x128xf32> to vector<16x128xf32>
      %15 = arith.addf %12, %14 : vector<16x128xf32>
      %16 = arith.truncf %15 : vector<16x128xf32> to vector<16x128xbf16>
      %c0_14 = arith.constant 0 : index
      %c0_15 = arith.constant 0 : index
      %17 = vector.load %arg6[%c0_14, %c0_15] : memref<16x128xbf16, #tpu.memory_space<vmem>>, vector<16x128xbf16>
      tpu.vector_store %arg6[%c0_14, %c0_15], %16 {strides = array<i32>} : memref<16x128xbf16, #tpu.memory_space<vmem>>, vector<16x128xbf16>,
    } else {
    }
    return
  }
  func.func @transform_0(%arg0: i32, %arg1: i32, %arg2: i32) -> (i32, i32) {
    %c0_i32 = arith.constant 0 : i32
    return %arg0, %arg2 : i32, i32
  }
  func.func @transform_1(%arg0: i32, %arg1: i32, %arg2: i32) -> (i32, i32) {
    %c0_i32 = arith.constant 0 : i32
    return %arg2, %arg1 : i32, i32
  }
  func.func @transform_2(%arg0: i32, %arg1: i32, %arg2: i32) -> (i32, i32) {
    %c0_i32 = arith.constant 0 : i32
    %c0_i32_0 = arith.constant 0 : i32
    return %c0_i32, %arg1 : i32, i32
  }
  func.func @transform_3(%arg0: i32, %arg1: i32, %arg2: i32) -> (i32, i32) {
    %c0_i32 = arith.constant 0 : i32
    return %arg0, %arg1 : i32, i32
  }
}

module attributes {stable_mosaic.version = 11 : i64} {
  func.func @_linear_kernel(%arg0: i32, %arg1: i32, %arg2: i32, %arg3: memref<16x128xbf16, #tpu.memory_space<vmem>>, %arg4: memref<128x256xbf16, #tpu.memory_space<vmem>>, %arg5: memref<1x256xf32, #tpu.memory_space<vmem>>, %arg6: memref<16x256xbf16, #tpu.memory_space<vmem>>, %arg7: memref<16x256xf32, #tpu.memory_space<vmem>>) attributes {dimension_semantics = [#tpu.dimension_semantics<parallel>, #tpu.dimension_semantics<parallel>, #tpu.dimension_semantics<arbitrary>], iteration_bounds = array<i64: 1, 1, 1>, scalar_prefetch = 0 : i64, scratch_operands = 1 : i64, tpu.core_type = #tpu.core_type<tc>, window_params = [{transform_indices = @transform_0, window_bounds = array<i64: 16, 128>}, {transform_indices = @transform_1, window_bounds = array<i64: 128, 256>}, {transform_indices = @transform_2, window_bounds = array<i64: 1, 256>}, {transform_indices = @transform_3, window_bounds = array<i64: 16, 256>}]} {
    %c0_i32 = arith.constant 0 : i32
    %0 = arith.cmpi eq, %arg2, %c0_i32 : i32
    %1 = arith.extui %0 : i1 to i32
    %c0_i32_0 = arith.constant 0 : i32
    %2 = arith.cmpi ne, %1, %c0_i32_0 : i32
    scf.if %2 {
      %cst_10 = arith.constant 0.000000e+00 : f32
      %12 = vector.broadcast %cst_10 : f32 to vector<16x256xf32>
      %c0_11 = arith.constant 0 : index
      %c0_12 = arith.constant 0 : index
      %13 = vector.load %arg7[%c0_11, %c0_12] : memref<16x256xf32, #tpu.memory_space<vmem>>, vector<16x256xf32>
      tpu.vector_store %arg7[%c0_11, %c0_12], %12 {strides = array<i32>} : memref<16x256xf32, #tpu.memory_space<vmem>>, vector<16x256xf32>,
    } else {
    }
    %c0 = arith.constant 0 : index
    %c0_1 = arith.constant 0 : index
    %3 = vector.load %arg3[%c0, %c0_1] : memref<16x128xbf16, #tpu.memory_space<vmem>>, vector<16x128xbf16>
    %c0_2 = arith.constant 0 : index
    %c0_3 = arith.constant 0 : index
    %4 = vector.load %arg7[%c0_2, %c0_3] : memref<16x256xf32, #tpu.memory_space<vmem>>, vector<16x256xf32>
    %c0_4 = arith.constant 0 : index
    %c0_5 = arith.constant 0 : index
    %5 = vector.load %arg4[%c0_4, %c0_5] : memref<128x256xbf16, #tpu.memory_space<vmem>>, vector<128x256xbf16>
    %cst = arith.constant dense<0.000000e+00> : vector<16x256xf32>
    %6 = tpu.matmul %3, %5, %cst {dimension_numbers = #tpu.dot_dimension_numbers<[1], [0], [0], [1], [0, 0, 1, 1], [], []>} : vector<16x128xbf16>, vector<128x256xbf16>, vector<16x256xf32> -> vector<16x256xf32>
    %7 = arith.addf %4, %6 : vector<16x256xf32>
    %c0_6 = arith.constant 0 : index
    %c0_7 = arith.constant 0 : index
    %8 = vector.load %arg7[%c0_6, %c0_7] : memref<16x256xf32, #tpu.memory_space<vmem>>, vector<16x256xf32>
    tpu.vector_store %arg7[%c0_6, %c0_7], %7 {strides = array<i32>} : memref<16x256xf32, #tpu.memory_space<vmem>>, vector<16x256xf32>,
    %c0_i32_8 = arith.constant 0 : i32
    %9 = arith.cmpi eq, %arg2, %c0_i32_8 : i32
    %10 = arith.extui %9 : i1 to i32
    %c0_i32_9 = arith.constant 0 : i32
    %11 = arith.cmpi ne, %10, %c0_i32_9 : i32
    scf.if %11 {
      %c0_10 = arith.constant 0 : index
      %c0_11 = arith.constant 0 : index
      %12 = vector.load %arg7[%c0_10, %c0_11] : memref<16x256xf32, #tpu.memory_space<vmem>>, vector<16x256xf32>
      %c0_12 = arith.constant 0 : index
      %c0_13 = arith.constant 0 : index
      %13 = vector.load %arg5[%c0_12, %c0_13] : memref<1x256xf32, #tpu.memory_space<vmem>>, vector<1x256xf32>
      %14 = vector.broadcast %13 : vector<1x256xf32> to vector<16x256xf32>
      %15 = arith.addf %12, %14 : vector<16x256xf32>
      %cst_14 = arith.constant 0.000000e+00 : f32
      %16 = vector.broadcast %cst_14 : f32 to vector<16x256xf32>
      %17 = arith.maximumf %15, %16 : vector<16x256xf32>
      %18 = arith.truncf %17 : vector<16x256xf32> to vector<16x256xbf16>
      %c0_15 = arith.constant 0 : index
      %c0_16 = arith.constant 0 : index
      %19 = vector.load %arg6[%c0_15, %c0_16] : memref<16x256xbf16, #tpu.memory_space<vmem>>, vector<16x256xbf16>
      tpu.vector_store %arg6[%c0_15, %c0_16], %18 {strides = array<i32>} : memref<16x256xbf16, #tpu.memory_space<vmem>>, vector<16x256xbf16>,
    } else {
    }
    return
  }
  func.func @transform_0(%arg0: i32, %arg1: i32, %arg2: i32) -> (i32, i32) {
    %c0_i32 = arith.constant 0 : i32
    return %arg0, %arg2 : i32, i32
  }
  func.func @transform_1(%arg0: i32, %arg1: i32, %arg2: i32) -> (i32, i32) {
    %c0_i32 = arith.constant 0 : i32
    return %arg2, %arg1 : i32, i32
  }
  func.func @transform_2(%arg0: i32, %arg1: i32, %arg2: i32) -> (i32, i32) {
    %c0_i32 = arith.constant 0 : i32
    %c0_i32_0 = arith.constant 0 : i32
    return %c0_i32, %arg1 : i32, i32
  }
  func.func @transform_3(%arg0: i32, %arg1: i32, %arg2: i32) -> (i32, i32) {
    %c0_i32 = arith.constant 0 : i32
    return %arg0, %arg1 : i32, i32
  }
}

module attributes {stable_mosaic.version = 11 : i64} {
  func.func @_ln_residual_kernel(%arg0: i32, %arg1: memref<16x128xf32, #tpu.memory_space<vmem>>, %arg2: memref<16x128xbf16, #tpu.memory_space<vmem>>, %arg3: memref<1x128xf32, #tpu.memory_space<vmem>>, %arg4: memref<1x128xf32, #tpu.memory_space<vmem>>, %arg5: memref<16x128xf32, #tpu.memory_space<vmem>>, %arg6: memref<16x128xbf16, #tpu.memory_space<vmem>>) attributes {dimension_semantics = [#tpu.dimension_semantics<parallel>], iteration_bounds = array<i64: 1>, scalar_prefetch = 0 : i64, scratch_operands = 0 : i64, tpu.core_type = #tpu.core_type<tc>, window_params = [{transform_indices = @transform_0, window_bounds = array<i64: 16, 128>}, {transform_indices = @transform_1, window_bounds = array<i64: 16, 128>}, {pipeline_mode = #tpu.pipeline_mode<synchronous>, transform_indices = @transform_2, window_bounds = array<i64: 1, 128>}, {pipeline_mode = #tpu.pipeline_mode<synchronous>, transform_indices = @transform_3, window_bounds = array<i64: 1, 128>}, {transform_indices = @transform_4, window_bounds = array<i64: 16, 128>}, {transform_indices = @transform_5, window_bounds = array<i64: 16, 128>}]} {
    %c0 = arith.constant 0 : index
    %c0_0 = arith.constant 0 : index
    %0 = vector.load %arg1[%c0, %c0_0] : memref<16x128xf32, #tpu.memory_space<vmem>>, vector<16x128xf32>
    %c0_1 = arith.constant 0 : index
    %c0_2 = arith.constant 0 : index
    %1 = vector.load %arg2[%c0_1, %c0_2] : memref<16x128xbf16, #tpu.memory_space<vmem>>, vector<16x128xbf16>
    %2 = arith.extf %1 : vector<16x128xbf16> to vector<16x128xf32>
    %3 = arith.addf %0, %2 : vector<16x128xf32>
    %cst = arith.constant dense<0.000000e+00> : vector<16xf32>
    %4 = vector.multi_reduction <add>, %3, %cst [1] : vector<16x128xf32> to vector<16xf32>
    %5 = vector.shape_cast %4 : vector<16xf32> to vector<16x1xf32>
    %cst_3 = arith.constant 1.280000e+02 : f32
    %6 = vector.broadcast %cst_3 : f32 to vector<16x1xf32>
    %7 = arith.divf %5, %6 : vector<16x1xf32>
    %8 = vector.broadcast %7 : vector<16x1xf32> to vector<16x128xf32>
    %9 = arith.subf %3, %8 : vector<16x128xf32>
    %10 = arith.mulf %9, %9 : vector<16x128xf32>
    %cst_4 = arith.constant dense<0.000000e+00> : vector<16xf32>
    %11 = vector.multi_reduction <add>, %10, %cst_4 [1] : vector<16x128xf32> to vector<16xf32>
    %12 = vector.shape_cast %11 : vector<16xf32> to vector<16x1xf32>
    %cst_5 = arith.constant 1.280000e+02 : f32
    %13 = vector.broadcast %cst_5 : f32 to vector<16x1xf32>
    %14 = arith.divf %12, %13 : vector<16x1xf32>
    %15 = vector.broadcast %7 : vector<16x1xf32> to vector<16x128xf32>
    %16 = arith.subf %3, %15 : vector<16x128xf32>
    %cst_6 = arith.constant 9.99999974E-6 : f32
    %17 = vector.broadcast %cst_6 : f32 to vector<16x1xf32>
    %18 = arith.addf %14, %17 : vector<16x1xf32>
    %19 = math.rsqrt %18 : vector<16x1xf32>
    %20 = vector.broadcast %19 : vector<16x1xf32> to vector<16x128xf32>
    %21 = arith.mulf %16, %20 : vector<16x128xf32>
    %c0_7 = arith.constant 0 : index
    %c0_8 = arith.constant 0 : index
    %22 = vector.load %arg3[%c0_7, %c0_8] : memref<1x128xf32, #tpu.memory_space<vmem>>, vector<1x128xf32>
    %23 = vector.broadcast %22 : vector<1x128xf32> to vector<16x128xf32>
    %24 = arith.mulf %21, %23 : vector<16x128xf32>
    %c0_9 = arith.constant 0 : index
    %c0_10 = arith.constant 0 : index
    %25 = vector.load %arg4[%c0_9, %c0_10] : memref<1x128xf32, #tpu.memory_space<vmem>>, vector<1x128xf32>
    %26 = vector.broadcast %25 : vector<1x128xf32> to vector<16x128xf32>
    %27 = arith.addf %24, %26 : vector<16x128xf32>
    %c0_11 = arith.constant 0 : index
    %c0_12 = arith.constant 0 : index
    %28 = vector.load %arg5[%c0_11, %c0_12] : memref<16x128xf32, #tpu.memory_space<vmem>>, vector<16x128xf32>
    tpu.vector_store %arg5[%c0_11, %c0_12], %27 {strides = array<i32>} : memref<16x128xf32, #tpu.memory_space<vmem>>, vector<16x128xf32>,
    %29 = arith.truncf %27 : vector<16x128xf32> to vector<16x128xbf16>
    %c0_13 = arith.constant 0 : index
    %c0_14 = arith.constant 0 : index
    %30 = vector.load %arg6[%c0_13, %c0_14] : memref<16x128xbf16, #tpu.memory_space<vmem>>, vector<16x128xbf16>
    tpu.vector_store %arg6[%c0_13, %c0_14], %29 {strides = array<i32>} : memref<16x128xbf16, #tpu.memory_space<vmem>>, vector<16x128xbf16>,
    return
  }
  func.func @transform_0(%arg0: i32) -> (i32, i32) {
    %c0_i32 = arith.constant 0 : i32
    %c0_i32_0 = arith.constant 0 : i32
    return %arg0, %c0_i32 : i32, i32
  }
  func.func @transform_1(%arg0: i32) -> (i32, i32) {
    %c0_i32 = arith.constant 0 : i32
    %c0_i32_0 = arith.constant 0 : i32
    return %arg0, %c0_i32 : i32, i32
  }
  func.func @transform_2(%arg0: i32) -> (i32, i32) {
    %c0_i32 = arith.constant 0 : i32
    %c0_i32_0 = arith.constant 0 : i32
    %c0_i32_1 = arith.constant 0 : i32
    return %c0_i32, %c0_i32_0 : i32, i32
  }
  func.func @transform_3(%arg0: i32) -> (i32, i32) {
    %c0_i32 = arith.constant 0 : i32
    %c0_i32_0 = arith.constant 0 : i32
    %c0_i32_1 = arith.constant 0 : i32
    return %c0_i32, %c0_i32_0 : i32, i32
  }
  func.func @transform_4(%arg0: i32) -> (i32, i32) {
    %c0_i32 = arith.constant 0 : i32
    %c0_i32_0 = arith.constant 0 : i32
    return %arg0, %c0_i32 : i32, i32
  }
  func.func @transform_5(%arg0: i32) -> (i32, i32) {
    %c0_i32 = arith.constant 0 : i32
    %c0_i32_0 = arith.constant 0 : i32
    return %arg0, %c0_i32 : i32, i32
  }
}

module attributes {stable_mosaic.version = 11 : i64} {
  func.func @_linear_kernel(%arg0: i32, %arg1: i32, %arg2: i32, %arg3: memref<16x128xbf16, #tpu.memory_space<vmem>>, %arg4: memref<128x256xbf16, #tpu.memory_space<vmem>>, %arg5: memref<1x256xf32, #tpu.memory_space<vmem>>, %arg6: memref<16x256xbf16, #tpu.memory_space<vmem>>, %arg7: memref<16x256xf32, #tpu.memory_space<vmem>>) attributes {dimension_semantics = [#tpu.dimension_semantics<parallel>, #tpu.dimension_semantics<parallel>, #tpu.dimension_semantics<arbitrary>], iteration_bounds = array<i64: 1, 1, 1>, scalar_prefetch = 0 : i64, scratch_operands = 1 : i64, tpu.core_type = #tpu.core_type<tc>, window_params = [{transform_indices = @transform_0, window_bounds = array<i64: 16, 128>}, {transform_indices = @transform_1, window_bounds = array<i64: 128, 256>}, {transform_indices = @transform_2, window_bounds = array<i64: 1, 256>}, {transform_indices = @transform_3, window_bounds = array<i64: 16, 256>}]} {
    %c0_i32 = arith.constant 0 : i32
    %0 = arith.cmpi eq, %arg2, %c0_i32 : i32
    %1 = arith.extui %0 : i1 to i32
    %c0_i32_0 = arith.constant 0 : i32
    %2 = arith.cmpi ne, %1, %c0_i32_0 : i32
    scf.if %2 {
      %cst_10 = arith.constant 0.000000e+00 : f32
      %12 = vector.broadcast %cst_10 : f32 to vector<16x256xf32>
      %c0_11 = arith.constant 0 : index
      %c0_12 = arith.constant 0 : index
      %13 = vector.load %arg7[%c0_11, %c0_12] : memref<16x256xf32, #tpu.memory_space<vmem>>, vector<16x256xf32>
      tpu.vector_store %arg7[%c0_11, %c0_12], %12 {strides = array<i32>} : memref<16x256xf32, #tpu.memory_space<vmem>>, vector<16x256xf32>,
    } else {
    }
    %c0 = arith.constant 0 : index
    %c0_1 = arith.constant 0 : index
    %3 = vector.load %arg3[%c0, %c0_1] : memref<16x128xbf16, #tpu.memory_space<vmem>>, vector<16x128xbf16>
    %c0_2 = arith.constant 0 : index
    %c0_3 = arith.constant 0 : index
    %4 = vector.load %arg7[%c0_2, %c0_3] : memref<16x256xf32, #tpu.memory_space<vmem>>, vector<16x256xf32>
    %c0_4 = arith.constant 0 : index
    %c0_5 = arith.constant 0 : index
    %5 = vector.load %arg4[%c0_4, %c0_5] : memref<128x256xbf16, #tpu.memory_space<vmem>>, vector<128x256xbf16>
    %cst = arith.constant dense<0.000000e+00> : vector<16x256xf32>
    %6 = tpu.matmul %3, %5, %cst {dimension_numbers = #tpu.dot_dimension_numbers<[1], [0], [0], [1], [0, 0, 1, 1], [], []>} : vector<16x128xbf16>, vector<128x256xbf16>, vector<16x256xf32> -> vector<16x256xf32>
    %7 = arith.addf %4, %6 : vector<16x256xf32>
    %c0_6 = arith.constant 0 : index
    %c0_7 = arith.constant 0 : index
    %8 = vector.load %arg7[%c0_6, %c0_7] : memref<16x256xf32, #tpu.memory_space<vmem>>, vector<16x256xf32>
    tpu.vector_store %arg7[%c0_6, %c0_7], %7 {strides = array<i32>} : memref<16x256xf32, #tpu.memory_space<vmem>>, vector<16x256xf32>,
    %c0_i32_8 = arith.constant 0 : i32
    %9 = arith.cmpi eq, %arg2, %c0_i32_8 : i32
    %10 = arith.extui %9 : i1 to i32
    %c0_i32_9 = arith.constant 0 : i32
    %11 = arith.cmpi ne, %10, %c0_i32_9 : i32
    scf.if %11 {
      %c0_10 = arith.constant 0 : index
      %c0_11 = arith.constant 0 : index
      %12 = vector.load %arg7[%c0_10, %c0_11] : memref<16x256xf32, #tpu.memory_space<vmem>>, vector<16x256xf32>
      %c0_12 = arith.constant 0 : index
      %c0_13 = arith.constant 0 : index
      %13 = vector.load %arg5[%c0_12, %c0_13] : memref<1x256xf32, #tpu.memory_space<vmem>>, vector<1x256xf32>
      %14 = vector.broadcast %13 : vector<1x256xf32> to vector<16x256xf32>
      %15 = arith.addf %12, %14 : vector<16x256xf32>
      %16 = arith.truncf %15 : vector<16x256xf32> to vector<16x256xbf16>
      %c0_14 = arith.constant 0 : index
      %c0_15 = arith.constant 0 : index
      %17 = vector.load %arg6[%c0_14, %c0_15] : memref<16x256xbf16, #tpu.memory_space<vmem>>, vector<16x256xbf16>
      tpu.vector_store %arg6[%c0_14, %c0_15], %16 {strides = array<i32>} : memref<16x256xbf16, #tpu.memory_space<vmem>>, vector<16x256xbf16>,
    } else {
    }
    return
  }
  func.func @transform_0(%arg0: i32, %arg1: i32, %arg2: i32) -> (i32, i32) {
    %c0_i32 = arith.constant 0 : i32
    return %arg0, %arg2 : i32, i32
  }
  func.func @transform_1(%arg0: i32, %arg1: i32, %arg2: i32) -> (i32, i32) {
    %c0_i32 = arith.constant 0 : i32
    return %arg2, %arg1 : i32, i32
  }
  func.func @transform_2(%arg0: i32, %arg1: i32, %arg2: i32) -> (i32, i32) {
    %c0_i32 = arith.constant 0 : i32
    %c0_i32_0 = arith.constant 0 : i32
    return %c0_i32, %arg1 : i32, i32
  }
  func.func @transform_3(%arg0: i32, %arg1: i32, %arg2: i32) -> (i32, i32) {
    %c0_i32 = arith.constant 0 : i32
    return %arg0, %arg1 : i32, i32
  }
}

module attributes {stable_mosaic.version = 11 : i64} {
  func.func @_attn_kernel(%arg0: i32, %arg1: memref<1x8x128xbf16, #tpu.memory_space<vmem>>, %arg2: memref<1x8x128xbf16, #tpu.memory_space<vmem>>, %arg3: memref<1x8x128xbf16, #tpu.memory_space<vmem>>, %arg4: memref<1x1x8xf32, #tpu.memory_space<vmem>>, %arg5: memref<1x8x128xbf16, #tpu.memory_space<vmem>>) attributes {dimension_semantics = [#tpu.dimension_semantics<parallel>], iteration_bounds = array<i64: 2>, scalar_prefetch = 0 : i64, scratch_operands = 0 : i64, tpu.core_type = #tpu.core_type<tc>, window_params = [{transform_indices = @transform_0, window_bounds = array<i64: 1, 8, 128>}, {transform_indices = @transform_1, window_bounds = array<i64: 1, 8, 128>}, {transform_indices = @transform_2, window_bounds = array<i64: 1, 8, 128>}, {transform_indices = @transform_3, window_bounds = array<i64: 1, 1, 8>}, {transform_indices = @transform_4, window_bounds = array<i64: 1, 8, 128>}]} {
    %c0 = arith.constant 0 : index
    %c0_0 = arith.constant 0 : index
    %c0_1 = arith.constant 0 : index
    %0 = vector.load %arg4[%c0, %c0_0, %c0_1] : memref<1x1x8xf32, #tpu.memory_space<vmem>>, vector<1x1x8xf32>
    %1 = vector.shape_cast %0 : vector<1x1x8xf32> to vector<1x8xf32>
    %2 = tpu.iota {dimensions = array<i32: 0>} : vector<8x8xi32>
    %3 = tpu.iota {dimensions = array<i32: 1>} : vector<8x8xi32>
    %4 = arith.cmpi sgt, %3, %2 : vector<8x8xi32>
    %cst = arith.constant -1.000000e+09 : f32
    %cst_2 = arith.constant 0.000000e+00 : f32
    %5 = vector.broadcast %cst : f32 to vector<8x8xf32>
    %6 = vector.broadcast %cst_2 : f32 to vector<8x8xf32>
    %7 = arith.select %4, %5, %6 : vector<8x8xi1>, vector<8x8xf32>
    %8 = vector.broadcast %1 : vector<1x8xf32> to vector<8x8xf32>
    %9 = arith.addf %8, %7 : vector<8x8xf32>
    %c0_3 = arith.constant 0 : index
    %c0_4 = arith.constant 0 : index
    %c0_5 = arith.constant 0 : index
    %10 = vector.load %arg1[%c0_3, %c0_4, %c0_5] : memref<1x8x128xbf16, #tpu.memory_space<vmem>>, vector<1x8x32xbf16>
    %11 = vector.shape_cast %10 : vector<1x8x32xbf16> to vector<8x32xbf16>
    %c0_6 = arith.constant 0 : index
    %c0_7 = arith.constant 0 : index
    %c0_8 = arith.constant 0 : index
    %12 = vector.load %arg2[%c0_6, %c0_7, %c0_8] : memref<1x8x128xbf16, #tpu.memory_space<vmem>>, vector<1x8x32xbf16>
    %13 = vector.shape_cast %12 : vector<1x8x32xbf16> to vector<8x32xbf16>
    %c0_9 = arith.constant 0 : index
    %c0_10 = arith.constant 0 : index
    %c0_11 = arith.constant 0 : index
    %14 = vector.load %arg3[%c0_9, %c0_10, %c0_11] : memref<1x8x128xbf16, #tpu.memory_space<vmem>>, vector<1x8x32xbf16>
    %15 = vector.shape_cast %14 : vector<1x8x32xbf16> to vector<8x32xbf16>
    %cst_12 = arith.constant dense<0.000000e+00> : vector<8x8xf32>
    %16 = tpu.matmul %11, %13, %cst_12 {dimension_numbers = #tpu.dot_dimension_numbers<[1], [1], [0], [0], [0, 0, 1, 0], [], []>} : vector<8x32xbf16>, vector<8x32xbf16>, vector<8x8xf32> -> vector<8x8xf32>
    %cst_13 = arith.constant 0.176776692 : f32
    %17 = vector.broadcast %cst_13 : f32 to vector<8x8xf32>
    %18 = arith.mulf %16, %17 : vector<8x8xf32>
    %19 = arith.addf %18, %9 : vector<8x8xf32>
    %cst_14 = arith.constant dense<0xFF800000> : vector<8xf32>
    %20 = vector.multi_reduction <maximumf>, %19, %cst_14 [1] : vector<8x8xf32> to vector<8xf32>
    %21 = vector.shape_cast %20 : vector<8xf32> to vector<8x1xf32>
    %22 = vector.broadcast %21 : vector<8x1xf32> to vector<8x8xf32>
    %23 = arith.subf %19, %22 : vector<8x8xf32>
    %24 = math.exp %23 : vector<8x8xf32>
    %cst_15 = arith.constant dense<0.000000e+00> : vector<8xf32>
    %25 = vector.multi_reduction <add>, %24, %cst_15 [1] : vector<8x8xf32> to vector<8xf32>
    %26 = vector.shape_cast %25 : vector<8xf32> to vector<8x1xf32>
    %27 = tpu.reciprocal %26 {approx = true} : vector<8x1xf32> -> vector<8x1xf32>
    %28 = vector.broadcast %27 : vector<8x1xf32> to vector<8x8xf32>
    %29 = arith.mulf %24, %28 : vector<8x8xf32>
    %30 = arith.truncf %29 : vector<8x8xf32> to vector<8x8xbf16>
    %cst_16 = arith.constant dense<0.000000e+00> : vector<8x32xf32>
    %31 = tpu.matmul %30, %15, %cst_16 {dimension_numbers = #tpu.dot_dimension_numbers<[1], [0], [0], [1], [0, 0, 1, 1], [], []>} : vector<8x8xbf16>, vector<8x32xbf16>, vector<8x32xf32> -> vector<8x32xf32>
    %32 = arith.truncf %31 : vector<8x32xf32> to vector<8x32xbf16>
    %c0_17 = arith.constant 0 : index
    %c0_18 = arith.constant 0 : index
    %c0_19 = arith.constant 0 : index
    %33 = vector.load %arg5[%c0_17, %c0_18, %c0_19] : memref<1x8x128xbf16, #tpu.memory_space<vmem>>, vector<1x8x32xbf16>
    %34 = vector.shape_cast %33 : vector<1x8x32xbf16> to vector<8x32xbf16>
    %35 = vector.shape_cast %32 : vector<8x32xbf16> to vector<1x8x32xbf16>
    tpu.vector_store %arg5[%c0_17, %c0_18, %c0_19], %35 {strides = array<i32>} : memref<1x8x128xbf16, #tpu.memory_space<vmem>>, vector<1x8x32xbf16>,
    %c0_20 = arith.constant 0 : index
    %c0_21 = arith.constant 0 : index
    %c32 = arith.constant 32 : index
    %36 = vector.load %arg1[%c0_20, %c0_21, %c32] : memref<1x8x128xbf16, #tpu.memory_space<vmem>>, vector<1x8x32xbf16>
    %37 = vector.shape_cast %36 : vector<1x8x32xbf16> to vector<8x32xbf16>
    %c0_22 = arith.constant 0 : index
    %c0_23 = arith.constant 0 : index
    %c32_24 = arith.constant 32 : index
    %38 = vector.load %arg2[%c0_22, %c0_23, %c32_24] : memref<1x8x128xbf16, #tpu.memory_space<vmem>>, vector<1x8x32xbf16>
    %39 = vector.shape_cast %38 : vector<1x8x32xbf16> to vector<8x32xbf16>
    %c0_25 = arith.constant 0 : index
    %c0_26 = arith.constant 0 : index
    %c32_27 = arith.constant 32 : index
    %40 = vector.load %arg3[%c0_25, %c0_26, %c32_27] : memref<1x8x128xbf16, #tpu.memory_space<vmem>>, vector<1x8x32xbf16>
    %41 = vector.shape_cast %40 : vector<1x8x32xbf16> to vector<8x32xbf16>
    %cst_28 = arith.constant dense<0.000000e+00> : vector<8x8xf32>
    %42 = tpu.matmul %37, %39, %cst_28 {dimension_numbers = #tpu.dot_dimension_numbers<[1], [1], [0], [0], [0, 0, 1, 0], [], []>} : vector<8x32xbf16>, vector<8x32xbf16>, vector<8x8xf32> -> vector<8x8xf32>
    %cst_29 = arith.constant 0.176776692 : f32
    %43 = vector.broadcast %cst_29 : f32 to vector<8x8xf32>
    %44 = arith.mulf %42, %43 : vector<8x8xf32>
    %45 = arith.addf %44, %9 : vector<8x8xf32>
    %cst_30 = arith.constant dense<0xFF800000> : vector<8xf32>
    %46 = vector.multi_reduction <maximumf>, %45, %cst_30 [1] : vector<8x8xf32> to vector<8xf32>
    %47 = vector.shape_cast %46 : vector<8xf32> to vector<8x1xf32>
    %48 = vector.broadcast %47 : vector<8x1xf32> to vector<8x8xf32>
    %49 = arith.subf %45, %48 : vector<8x8xf32>
    %50 = math.exp %49 : vector<8x8xf32>
    %cst_31 = arith.constant dense<0.000000e+00> : vector<8xf32>
    %51 = vector.multi_reduction <add>, %50, %cst_31 [1] : vector<8x8xf32> to vector<8xf32>
    %52 = vector.shape_cast %51 : vector<8xf32> to vector<8x1xf32>
    %53 = tpu.reciprocal %52 {approx = true} : vector<8x1xf32> -> vector<8x1xf32>
    %54 = vector.broadcast %53 : vector<8x1xf32> to vector<8x8xf32>
    %55 = arith.mulf %50, %54 : vector<8x8xf32>
    %56 = arith.truncf %55 : vector<8x8xf32> to vector<8x8xbf16>
    %cst_32 = arith.constant dense<0.000000e+00> : vector<8x32xf32>
    %57 = tpu.matmul %56, %41, %cst_32 {dimension_numbers = #tpu.dot_dimension_numbers<[1], [0], [0], [1], [0, 0, 1, 1], [], []>} : vector<8x8xbf16>, vector<8x32xbf16>, vector<8x32xf32> -> vector<8x32xf32>
    %58 = arith.truncf %57 : vector<8x32xf32> to vector<8x32xbf16>
    %c0_33 = arith.constant 0 : index
    %c0_34 = arith.constant 0 : index
    %c32_35 = arith.constant 32 : index
    %59 = vector.load %arg5[%c0_33, %c0_34, %c32_35] : memref<1x8x128xbf16, #tpu.memory_space<vmem>>, vector<1x8x32xbf16>
    %60 = vector.shape_cast %59 : vector<1x8x32xbf16> to vector<8x32xbf16>
    %61 = vector.shape_cast %58 : vector<8x32xbf16> to vector<1x8x32xbf16>
    tpu.vector_store %arg5[%c0_33, %c0_34, %c32_35], %61 {strides = array<i32>} : memref<1x8x128xbf16, #tpu.memory_space<vmem>>, vector<1x8x32xbf16>,
    %c0_36 = arith.constant 0 : index
    %c0_37 = arith.constant 0 : index
    %c64 = arith.constant 64 : index
    %62 = vector.load %arg1[%c0_36, %c0_37, %c64] : memref<1x8x128xbf16, #tpu.memory_space<vmem>>, vector<1x8x32xbf16>
    %63 = vector.shape_cast %62 : vector<1x8x32xbf16> to vector<8x32xbf16>
    %c0_38 = arith.constant 0 : index
    %c0_39 = arith.constant 0 : index
    %c64_40 = arith.constant 64 : index
    %64 = vector.load %arg2[%c0_38, %c0_39, %c64_40] : memref<1x8x128xbf16, #tpu.memory_space<vmem>>, vector<1x8x32xbf16>
    %65 = vector.shape_cast %64 : vector<1x8x32xbf16> to vector<8x32xbf16>
    %c0_41 = arith.constant 0 : index
    %c0_42 = arith.constant 0 : index
    %c64_43 = arith.constant 64 : index
    %66 = vector.load %arg3[%c0_41, %c0_42, %c64_43] : memref<1x8x128xbf16, #tpu.memory_space<vmem>>, vector<1x8x32xbf16>
    %67 = vector.shape_cast %66 : vector<1x8x32xbf16> to vector<8x32xbf16>
    %cst_44 = arith.constant dense<0.000000e+00> : vector<8x8xf32>
    %68 = tpu.matmul %63, %65, %cst_44 {dimension_numbers = #tpu.dot_dimension_numbers<[1], [1], [0], [0], [0, 0, 1, 0], [], []>} : vector<8x32xbf16>, vector<8x32xbf16>, vector<8x8xf32> -> vector<8x8xf32>
    %cst_45 = arith.constant 0.176776692 : f32
    %69 = vector.broadcast %cst_45 : f32 to vector<8x8xf32>
    %70 = arith.mulf %68, %69 : vector<8x8xf32>
    %71 = arith.addf %70, %9 : vector<8x8xf32>
    %cst_46 = arith.constant dense<0xFF800000> : vector<8xf32>
    %72 = vector.multi_reduction <maximumf>, %71, %cst_46 [1] : vector<8x8xf32> to vector<8xf32>
    %73 = vector.shape_cast %72 : vector<8xf32> to vector<8x1xf32>
    %74 = vector.broadcast %73 : vector<8x1xf32> to vector<8x8xf32>
    %75 = arith.subf %71, %74 : vector<8x8xf32>
    %76 = math.exp %75 : vector<8x8xf32>
    %cst_47 = arith.constant dense<0.000000e+00> : vector<8xf32>
    %77 = vector.multi_reduction <add>, %76, %cst_47 [1] : vector<8x8xf32> to vector<8xf32>
    %78 = vector.shape_cast %77 : vector<8xf32> to vector<8x1xf32>
    %79 = tpu.reciprocal %78 {approx = true} : vector<8x1xf32> -> vector<8x1xf32>
    %80 = vector.broadcast %79 : vector<8x1xf32> to vector<8x8xf32>
    %81 = arith.mulf %76, %80 : vector<8x8xf32>
    %82 = arith.truncf %81 : vector<8x8xf32> to vector<8x8xbf16>
    %cst_48 = arith.constant dense<0.000000e+00> : vector<8x32xf32>
    %83 = tpu.matmul %82, %67, %cst_48 {dimension_numbers = #tpu.dot_dimension_numbers<[1], [0], [0], [1], [0, 0, 1, 1], [], []>} : vector<8x8xbf16>, vector<8x32xbf16>, vector<8x32xf32> -> vector<8x32xf32>
    %84 = arith.truncf %83 : vector<8x32xf32> to vector<8x32xbf16>
    %c0_49 = arith.constant 0 : index
    %c0_50 = arith.constant 0 : index
    %c64_51 = arith.constant 64 : index
    %85 = vector.load %arg5[%c0_49, %c0_50, %c64_51] : memref<1x8x128xbf16, #tpu.memory_space<vmem>>, vector<1x8x32xbf16>
    %86 = vector.shape_cast %85 : vector<1x8x32xbf16> to vector<8x32xbf16>
    %87 = vector.shape_cast %84 : vector<8x32xbf16> to vector<1x8x32xbf16>
    tpu.vector_store %arg5[%c0_49, %c0_50, %c64_51], %87 {strides = array<i32>} : memref<1x8x128xbf16, #tpu.memory_space<vmem>>, vector<1x8x32xbf16>,
    %c0_52 = arith.constant 0 : index
    %c0_53 = arith.constant 0 : index
    %c96 = arith.constant 96 : index
    %88 = vector.load %arg1[%c0_52, %c0_53, %c96] : memref<1x8x128xbf16, #tpu.memory_space<vmem>>, vector<1x8x32xbf16>
    %89 = vector.shape_cast %88 : vector<1x8x32xbf16> to vector<8x32xbf16>
    %c0_54 = arith.constant 0 : index
    %c0_55 = arith.constant 0 : index
    %c96_56 = arith.constant 96 : index
    %90 = vector.load %arg2[%c0_54, %c0_55, %c96_56] : memref<1x8x128xbf16, #tpu.memory_space<vmem>>, vector<1x8x32xbf16>
    %91 = vector.shape_cast %90 : vector<1x8x32xbf16> to vector<8x32xbf16>
    %c0_57 = arith.constant 0 : index
    %c0_58 = arith.constant 0 : index
    %c96_59 = arith.constant 96 : index
    %92 = vector.load %arg3[%c0_57, %c0_58, %c96_59] : memref<1x8x128xbf16, #tpu.memory_space<vmem>>, vector<1x8x32xbf16>
    %93 = vector.shape_cast %92 : vector<1x8x32xbf16> to vector<8x32xbf16>
    %cst_60 = arith.constant dense<0.000000e+00> : vector<8x8xf32>
    %94 = tpu.matmul %89, %91, %cst_60 {dimension_numbers = #tpu.dot_dimension_numbers<[1], [1], [0], [0], [0, 0, 1, 0], [], []>} : vector<8x32xbf16>, vector<8x32xbf16>, vector<8x8xf32> -> vector<8x8xf32>
    %cst_61 = arith.constant 0.176776692 : f32
    %95 = vector.broadcast %cst_61 : f32 to vector<8x8xf32>
    %96 = arith.mulf %94, %95 : vector<8x8xf32>
    %97 = arith.addf %96, %9 : vector<8x8xf32>
    %cst_62 = arith.constant dense<0xFF800000> : vector<8xf32>
    %98 = vector.multi_reduction <maximumf>, %97, %cst_62 [1] : vector<8x8xf32> to vector<8xf32>
    %99 = vector.shape_cast %98 : vector<8xf32> to vector<8x1xf32>
    %100 = vector.broadcast %99 : vector<8x1xf32> to vector<8x8xf32>
    %101 = arith.subf %97, %100 : vector<8x8xf32>
    %102 = math.exp %101 : vector<8x8xf32>
    %cst_63 = arith.constant dense<0.000000e+00> : vector<8xf32>
    %103 = vector.multi_reduction <add>, %102, %cst_63 [1] : vector<8x8xf32> to vector<8xf32>
    %104 = vector.shape_cast %103 : vector<8xf32> to vector<8x1xf32>
    %105 = tpu.reciprocal %104 {approx = true} : vector<8x1xf32> -> vector<8x1xf32>
    %106 = vector.broadcast %105 : vector<8x1xf32> to vector<8x8xf32>
    %107 = arith.mulf %102, %106 : vector<8x8xf32>
    %108 = arith.truncf %107 : vector<8x8xf32> to vector<8x8xbf16>
    %cst_64 = arith.constant dense<0.000000e+00> : vector<8x32xf32>
    %109 = tpu.matmul %108, %93, %cst_64 {dimension_numbers = #tpu.dot_dimension_numbers<[1], [0], [0], [1], [0, 0, 1, 1], [], []>} : vector<8x8xbf16>, vector<8x32xbf16>, vector<8x32xf32> -> vector<8x32xf32>
    %110 = arith.truncf %109 : vector<8x32xf32> to vector<8x32xbf16>
    %c0_65 = arith.constant 0 : index
    %c0_66 = arith.constant 0 : index
    %c96_67 = arith.constant 96 : index
    %111 = vector.load %arg5[%c0_65, %c0_66, %c96_67] : memref<1x8x128xbf16, #tpu.memory_space<vmem>>, vector<1x8x32xbf16>
    %112 = vector.shape_cast %111 : vector<1x8x32xbf16> to vector<8x32xbf16>
    %113 = vector.shape_cast %110 : vector<8x32xbf16> to vector<1x8x32xbf16>
    tpu.vector_store %arg5[%c0_65, %c0_66, %c96_67], %113 {strides = array<i32>} : memref<1x8x128xbf16, #tpu.memory_space<vmem>>, vector<1x8x32xbf16>,
    return
  }
  func.func @transform_0(%arg0: i32) -> (i32, i32, i32) {
    %c0_i32 = arith.constant 0 : i32
    %c0_i32_0 = arith.constant 0 : i32
    %c0_i32_1 = arith.constant 0 : i32
    return %arg0, %c0_i32, %c0_i32_0 : i32, i32, i32
  }
  func.func @transform_1(%arg0: i32) -> (i32, i32, i32) {
    %c0_i32 = arith.constant 0 : i32
    %c1_i32 = arith.constant 1 : i32
    %c0_i32_0 = arith.constant 0 : i32
    return %arg0, %c0_i32, %c1_i32 : i32, i32, i32
  }
  func.func @transform_2(%arg0: i32) -> (i32, i32, i32) {
    %c0_i32 = arith.constant 0 : i32
    %c2_i32 = arith.constant 2 : i32
    %c0_i32_0 = arith.constant 0 : i32
    return %arg0, %c0_i32, %c2_i32 : i32, i32, i32
  }
  func.func @transform_3(%arg0: i32) -> (i32, i32, i32) {
    %c0_i32 = arith.constant 0 : i32
    %c0_i32_0 = arith.constant 0 : i32
    %c0_i32_1 = arith.constant 0 : i32
    return %arg0, %c0_i32, %c0_i32_0 : i32, i32, i32
  }
  func.func @transform_4(%arg0: i32) -> (i32, i32, i32) {
    %c0_i32 = arith.constant 0 : i32
    %c0_i32_0 = arith.constant 0 : i32
    %c0_i32_1 = arith.constant 0 : i32
    return %arg0, %c0_i32, %c0_i32_0 : i32, i32, i32
  }
}

module attributes {stable_mosaic.version = 11 : i64} {
  func.func @_attn_kernel(%arg0: i32, %arg1: memref<1x8x128xbf16, #tpu.memory_space<vmem>>, %arg2: memref<1x8x128xbf16, #tpu.memory_space<vmem>>, %arg3: memref<1x8x128xbf16, #tpu.memory_space<vmem>>, %arg4: memref<1x1x8xf32, #tpu.memory_space<vmem>>, %arg5: memref<1x8x128xbf16, #tpu.memory_space<vmem>>) attributes {dimension_semantics = [#tpu.dimension_semantics<parallel>], iteration_bounds = array<i64: 2>, scalar_prefetch = 0 : i64, scratch_operands = 0 : i64, tpu.core_type = #tpu.core_type<tc>, window_params = [{transform_indices = @transform_0, window_bounds = array<i64: 1, 8, 128>}, {transform_indices = @transform_1, window_bounds = array<i64: 1, 8, 128>}, {transform_indices = @transform_2, window_bounds = array<i64: 1, 8, 128>}, {transform_indices = @transform_3, window_bounds = array<i64: 1, 1, 8>}, {transform_indices = @transform_4, window_bounds = array<i64: 1, 8, 128>}]} {
    %c0 = arith.constant 0 : index
    %c0_0 = arith.constant 0 : index
    %c0_1 = arith.constant 0 : index
    %0 = vector.load %arg4[%c0, %c0_0, %c0_1] : memref<1x1x8xf32, #tpu.memory_space<vmem>>, vector<1x1x8xf32>
    %1 = vector.shape_cast %0 : vector<1x1x8xf32> to vector<1x8xf32>
    %c0_2 = arith.constant 0 : index
    %c0_3 = arith.constant 0 : index
    %c0_4 = arith.constant 0 : index
    %2 = vector.load %arg1[%c0_2, %c0_3, %c0_4] : memref<1x8x128xbf16, #tpu.memory_space<vmem>>, vector<1x8x32xbf16>
    %3 = vector.shape_cast %2 : vector<1x8x32xbf16> to vector<8x32xbf16>
    %c0_5 = arith.constant 0 : index
    %c0_6 = arith.constant 0 : index
    %c0_7 = arith.constant 0 : index
    %4 = vector.load %arg2[%c0_5, %c0_6, %c0_7] : memref<1x8x128xbf16, #tpu.memory_space<vmem>>, vector<1x8x32xbf16>
    %5 = vector.shape_cast %4 : vector<1x8x32xbf16> to vector<8x32xbf16>
    %c0_8 = arith.constant 0 : index
    %c0_9 = arith.constant 0 : index
    %c0_10 = arith.constant 0 : index
    %6 = vector.load %arg3[%c0_8, %c0_9, %c0_10] : memref<1x8x128xbf16, #tpu.memory_space<vmem>>, vector<1x8x32xbf16>
    %7 = vector.shape_cast %6 : vector<1x8x32xbf16> to vector<8x32xbf16>
    %cst = arith.constant dense<0.000000e+00> : vector<8x8xf32>
    %8 = tpu.matmul %3, %5, %cst {dimension_numbers = #tpu.dot_dimension_numbers<[1], [1], [0], [0], [0, 0, 1, 0], [], []>} : vector<8x32xbf16>, vector<8x32xbf16>, vector<8x8xf32> -> vector<8x8xf32>
    %cst_11 = arith.constant 0.176776692 : f32
    %9 = vector.broadcast %cst_11 : f32 to vector<8x8xf32>
    %10 = arith.mulf %8, %9 : vector<8x8xf32>
    %11 = vector.broadcast %1 : vector<1x8xf32> to vector<8x8xf32>
    %12 = arith.addf %10, %11 : vector<8x8xf32>
    %cst_12 = arith.constant dense<0xFF800000> : vector<8xf32>
    %13 = vector.multi_reduction <maximumf>, %12, %cst_12 [1] : vector<8x8xf32> to vector<8xf32>
    %14 = vector.shape_cast %13 : vector<8xf32> to vector<8x1xf32>
    %15 = vector.broadcast %14 : vector<8x1xf32> to vector<8x8xf32>
    %16 = arith.subf %12, %15 : vector<8x8xf32>
    %17 = math.exp %16 : vector<8x8xf32>
    %cst_13 = arith.constant dense<0.000000e+00> : vector<8xf32>
    %18 = vector.multi_reduction <add>, %17, %cst_13 [1] : vector<8x8xf32> to vector<8xf32>
    %19 = vector.shape_cast %18 : vector<8xf32> to vector<8x1xf32>
    %20 = tpu.reciprocal %19 {approx = true} : vector<8x1xf32> -> vector<8x1xf32>
    %21 = vector.broadcast %20 : vector<8x1xf32> to vector<8x8xf32>
    %22 = arith.mulf %17, %21 : vector<8x8xf32>
    %23 = arith.truncf %22 : vector<8x8xf32> to vector<8x8xbf16>
    %cst_14 = arith.constant dense<0.000000e+00> : vector<8x32xf32>
    %24 = tpu.matmul %23, %7, %cst_14 {dimension_numbers = #tpu.dot_dimension_numbers<[1], [0], [0], [1], [0, 0, 1, 1], [], []>} : vector<8x8xbf16>, vector<8x32xbf16>, vector<8x32xf32> -> vector<8x32xf32>
    %25 = arith.truncf %24 : vector<8x32xf32> to vector<8x32xbf16>
    %c0_15 = arith.constant 0 : index
    %c0_16 = arith.constant 0 : index
    %c0_17 = arith.constant 0 : index
    %26 = vector.load %arg5[%c0_15, %c0_16, %c0_17] : memref<1x8x128xbf16, #tpu.memory_space<vmem>>, vector<1x8x32xbf16>
    %27 = vector.shape_cast %26 : vector<1x8x32xbf16> to vector<8x32xbf16>
    %28 = vector.shape_cast %25 : vector<8x32xbf16> to vector<1x8x32xbf16>
    tpu.vector_store %arg5[%c0_15, %c0_16, %c0_17], %28 {strides = array<i32>} : memref<1x8x128xbf16, #tpu.memory_space<vmem>>, vector<1x8x32xbf16>,
    %c0_18 = arith.constant 0 : index
    %c0_19 = arith.constant 0 : index
    %c32 = arith.constant 32 : index
    %29 = vector.load %arg1[%c0_18, %c0_19, %c32] : memref<1x8x128xbf16, #tpu.memory_space<vmem>>, vector<1x8x32xbf16>
    %30 = vector.shape_cast %29 : vector<1x8x32xbf16> to vector<8x32xbf16>
    %c0_20 = arith.constant 0 : index
    %c0_21 = arith.constant 0 : index
    %c32_22 = arith.constant 32 : index
    %31 = vector.load %arg2[%c0_20, %c0_21, %c32_22] : memref<1x8x128xbf16, #tpu.memory_space<vmem>>, vector<1x8x32xbf16>
    %32 = vector.shape_cast %31 : vector<1x8x32xbf16> to vector<8x32xbf16>
    %c0_23 = arith.constant 0 : index
    %c0_24 = arith.constant 0 : index
    %c32_25 = arith.constant 32 : index
    %33 = vector.load %arg3[%c0_23, %c0_24, %c32_25] : memref<1x8x128xbf16, #tpu.memory_space<vmem>>, vector<1x8x32xbf16>
    %34 = vector.shape_cast %33 : vector<1x8x32xbf16> to vector<8x32xbf16>
    %cst_26 = arith.constant dense<0.000000e+00> : vector<8x8xf32>
    %35 = tpu.matmul %30, %32, %cst_26 {dimension_numbers = #tpu.dot_dimension_numbers<[1], [1], [0], [0], [0, 0, 1, 0], [], []>} : vector<8x32xbf16>, vector<8x32xbf16>, vector<8x8xf32> -> vector<8x8xf32>
    %cst_27 = arith.constant 0.176776692 : f32
    %36 = vector.broadcast %cst_27 : f32 to vector<8x8xf32>
    %37 = arith.mulf %35, %36 : vector<8x8xf32>
    %38 = vector.broadcast %1 : vector<1x8xf32> to vector<8x8xf32>
    %39 = arith.addf %37, %38 : vector<8x8xf32>
    %cst_28 = arith.constant dense<0xFF800000> : vector<8xf32>
    %40 = vector.multi_reduction <maximumf>, %39, %cst_28 [1] : vector<8x8xf32> to vector<8xf32>
    %41 = vector.shape_cast %40 : vector<8xf32> to vector<8x1xf32>
    %42 = vector.broadcast %41 : vector<8x1xf32> to vector<8x8xf32>
    %43 = arith.subf %39, %42 : vector<8x8xf32>
    %44 = math.exp %43 : vector<8x8xf32>
    %cst_29 = arith.constant dense<0.000000e+00> : vector<8xf32>
    %45 = vector.multi_reduction <add>, %44, %cst_29 [1] : vector<8x8xf32> to vector<8xf32>
    %46 = vector.shape_cast %45 : vector<8xf32> to vector<8x1xf32>
    %47 = tpu.reciprocal %46 {approx = true} : vector<8x1xf32> -> vector<8x1xf32>
    %48 = vector.broadcast %47 : vector<8x1xf32> to vector<8x8xf32>
    %49 = arith.mulf %44, %48 : vector<8x8xf32>
    %50 = arith.truncf %49 : vector<8x8xf32> to vector<8x8xbf16>
    %cst_30 = arith.constant dense<0.000000e+00> : vector<8x32xf32>
    %51 = tpu.matmul %50, %34, %cst_30 {dimension_numbers = #tpu.dot_dimension_numbers<[1], [0], [0], [1], [0, 0, 1, 1], [], []>} : vector<8x8xbf16>, vector<8x32xbf16>, vector<8x32xf32> -> vector<8x32xf32>
    %52 = arith.truncf %51 : vector<8x32xf32> to vector<8x32xbf16>
    %c0_31 = arith.constant 0 : index
    %c0_32 = arith.constant 0 : index
    %c32_33 = arith.constant 32 : index
    %53 = vector.load %arg5[%c0_31, %c0_32, %c32_33] : memref<1x8x128xbf16, #tpu.memory_space<vmem>>, vector<1x8x32xbf16>
    %54 = vector.shape_cast %53 : vector<1x8x32xbf16> to vector<8x32xbf16>
    %55 = vector.shape_cast %52 : vector<8x32xbf16> to vector<1x8x32xbf16>
    tpu.vector_store %arg5[%c0_31, %c0_32, %c32_33], %55 {strides = array<i32>} : memref<1x8x128xbf16, #tpu.memory_space<vmem>>, vector<1x8x32xbf16>,
    %c0_34 = arith.constant 0 : index
    %c0_35 = arith.constant 0 : index
    %c64 = arith.constant 64 : index
    %56 = vector.load %arg1[%c0_34, %c0_35, %c64] : memref<1x8x128xbf16, #tpu.memory_space<vmem>>, vector<1x8x32xbf16>
    %57 = vector.shape_cast %56 : vector<1x8x32xbf16> to vector<8x32xbf16>
    %c0_36 = arith.constant 0 : index
    %c0_37 = arith.constant 0 : index
    %c64_38 = arith.constant 64 : index
    %58 = vector.load %arg2[%c0_36, %c0_37, %c64_38] : memref<1x8x128xbf16, #tpu.memory_space<vmem>>, vector<1x8x32xbf16>
    %59 = vector.shape_cast %58 : vector<1x8x32xbf16> to vector<8x32xbf16>
    %c0_39 = arith.constant 0 : index
    %c0_40 = arith.constant 0 : index
    %c64_41 = arith.constant 64 : index
    %60 = vector.load %arg3[%c0_39, %c0_40, %c64_41] : memref<1x8x128xbf16, #tpu.memory_space<vmem>>, vector<1x8x32xbf16>
    %61 = vector.shape_cast %60 : vector<1x8x32xbf16> to vector<8x32xbf16>
    %cst_42 = arith.constant dense<0.000000e+00> : vector<8x8xf32>
    %62 = tpu.matmul %57, %59, %cst_42 {dimension_numbers = #tpu.dot_dimension_numbers<[1], [1], [0], [0], [0, 0, 1, 0], [], []>} : vector<8x32xbf16>, vector<8x32xbf16>, vector<8x8xf32> -> vector<8x8xf32>
    %cst_43 = arith.constant 0.176776692 : f32
    %63 = vector.broadcast %cst_43 : f32 to vector<8x8xf32>
    %64 = arith.mulf %62, %63 : vector<8x8xf32>
    %65 = vector.broadcast %1 : vector<1x8xf32> to vector<8x8xf32>
    %66 = arith.addf %64, %65 : vector<8x8xf32>
    %cst_44 = arith.constant dense<0xFF800000> : vector<8xf32>
    %67 = vector.multi_reduction <maximumf>, %66, %cst_44 [1] : vector<8x8xf32> to vector<8xf32>
    %68 = vector.shape_cast %67 : vector<8xf32> to vector<8x1xf32>
    %69 = vector.broadcast %68 : vector<8x1xf32> to vector<8x8xf32>
    %70 = arith.subf %66, %69 : vector<8x8xf32>
    %71 = math.exp %70 : vector<8x8xf32>
    %cst_45 = arith.constant dense<0.000000e+00> : vector<8xf32>
    %72 = vector.multi_reduction <add>, %71, %cst_45 [1] : vector<8x8xf32> to vector<8xf32>
    %73 = vector.shape_cast %72 : vector<8xf32> to vector<8x1xf32>
    %74 = tpu.reciprocal %73 {approx = true} : vector<8x1xf32> -> vector<8x1xf32>
    %75 = vector.broadcast %74 : vector<8x1xf32> to vector<8x8xf32>
    %76 = arith.mulf %71, %75 : vector<8x8xf32>
    %77 = arith.truncf %76 : vector<8x8xf32> to vector<8x8xbf16>
    %cst_46 = arith.constant dense<0.000000e+00> : vector<8x32xf32>
    %78 = tpu.matmul %77, %61, %cst_46 {dimension_numbers = #tpu.dot_dimension_numbers<[1], [0], [0], [1], [0, 0, 1, 1], [], []>} : vector<8x8xbf16>, vector<8x32xbf16>, vector<8x32xf32> -> vector<8x32xf32>
    %79 = arith.truncf %78 : vector<8x32xf32> to vector<8x32xbf16>
    %c0_47 = arith.constant 0 : index
    %c0_48 = arith.constant 0 : index
    %c64_49 = arith.constant 64 : index
    %80 = vector.load %arg5[%c0_47, %c0_48, %c64_49] : memref<1x8x128xbf16, #tpu.memory_space<vmem>>, vector<1x8x32xbf16>
    %81 = vector.shape_cast %80 : vector<1x8x32xbf16> to vector<8x32xbf16>
    %82 = vector.shape_cast %79 : vector<8x32xbf16> to vector<1x8x32xbf16>
    tpu.vector_store %arg5[%c0_47, %c0_48, %c64_49], %82 {strides = array<i32>} : memref<1x8x128xbf16, #tpu.memory_space<vmem>>, vector<1x8x32xbf16>,
    %c0_50 = arith.constant 0 : index
    %c0_51 = arith.constant 0 : index
    %c96 = arith.constant 96 : index
    %83 = vector.load %arg1[%c0_50, %c0_51, %c96] : memref<1x8x128xbf16, #tpu.memory_space<vmem>>, vector<1x8x32xbf16>
    %84 = vector.shape_cast %83 : vector<1x8x32xbf16> to vector<8x32xbf16>
    %c0_52 = arith.constant 0 : index
    %c0_53 = arith.constant 0 : index
    %c96_54 = arith.constant 96 : index
    %85 = vector.load %arg2[%c0_52, %c0_53, %c96_54] : memref<1x8x128xbf16, #tpu.memory_space<vmem>>, vector<1x8x32xbf16>
    %86 = vector.shape_cast %85 : vector<1x8x32xbf16> to vector<8x32xbf16>
    %c0_55 = arith.constant 0 : index
    %c0_56 = arith.constant 0 : index
    %c96_57 = arith.constant 96 : index
    %87 = vector.load %arg3[%c0_55, %c0_56, %c96_57] : memref<1x8x128xbf16, #tpu.memory_space<vmem>>, vector<1x8x32xbf16>
    %88 = vector.shape_cast %87 : vector<1x8x32xbf16> to vector<8x32xbf16>
    %cst_58 = arith.constant dense<0.000000e+00> : vector<8x8xf32>
    %89 = tpu.matmul %84, %86, %cst_58 {dimension_numbers = #tpu.dot_dimension_numbers<[1], [1], [0], [0], [0, 0, 1, 0], [], []>} : vector<8x32xbf16>, vector<8x32xbf16>, vector<8x8xf32> -> vector<8x8xf32>
    %cst_59 = arith.constant 0.176776692 : f32
    %90 = vector.broadcast %cst_59 : f32 to vector<8x8xf32>
    %91 = arith.mulf %89, %90 : vector<8x8xf32>
    %92 = vector.broadcast %1 : vector<1x8xf32> to vector<8x8xf32>
    %93 = arith.addf %91, %92 : vector<8x8xf32>
    %cst_60 = arith.constant dense<0xFF800000> : vector<8xf32>
    %94 = vector.multi_reduction <maximumf>, %93, %cst_60 [1] : vector<8x8xf32> to vector<8xf32>
    %95 = vector.shape_cast %94 : vector<8xf32> to vector<8x1xf32>
    %96 = vector.broadcast %95 : vector<8x1xf32> to vector<8x8xf32>
    %97 = arith.subf %93, %96 : vector<8x8xf32>
    %98 = math.exp %97 : vector<8x8xf32>
    %cst_61 = arith.constant dense<0.000000e+00> : vector<8xf32>
    %99 = vector.multi_reduction <add>, %98, %cst_61 [1] : vector<8x8xf32> to vector<8xf32>
    %100 = vector.shape_cast %99 : vector<8xf32> to vector<8x1xf32>
    %101 = tpu.reciprocal %100 {approx = true} : vector<8x1xf32> -> vector<8x1xf32>
    %102 = vector.broadcast %101 : vector<8x1xf32> to vector<8x8xf32>
    %103 = arith.mulf %98, %102 : vector<8x8xf32>
    %104 = arith.truncf %103 : vector<8x8xf32> to vector<8x8xbf16>
    %cst_62 = arith.constant dense<0.000000e+00> : vector<8x32xf32>
    %105 = tpu.matmul %104, %88, %cst_62 {dimension_numbers = #tpu.dot_dimension_numbers<[1], [0], [0], [1], [0, 0, 1, 1], [], []>} : vector<8x8xbf16>, vector<8x32xbf16>, vector<8x32xf32> -> vector<8x32xf32>
    %106 = arith.truncf %105 : vector<8x32xf32> to vector<8x32xbf16>
    %c0_63 = arith.constant 0 : index
    %c0_64 = arith.constant 0 : index
    %c96_65 = arith.constant 96 : index
    %107 = vector.load %arg5[%c0_63, %c0_64, %c96_65] : memref<1x8x128xbf16, #tpu.memory_space<vmem>>, vector<1x8x32xbf16>
    %108 = vector.shape_cast %107 : vector<1x8x32xbf16> to vector<8x32xbf16>
    %109 = vector.shape_cast %106 : vector<8x32xbf16> to vector<1x8x32xbf16>
    tpu.vector_store %arg5[%c0_63, %c0_64, %c96_65], %109 {strides = array<i32>} : memref<1x8x128xbf16, #tpu.memory_space<vmem>>, vector<1x8x32xbf16>,
    return
  }
  func.func @transform_0(%arg0: i32) -> (i32, i32, i32) {
    %c0_i32 = arith.constant 0 : i32
    %c0_i32_0 = arith.constant 0 : i32
    %c0_i32_1 = arith.constant 0 : i32
    return %arg0, %c0_i32, %c0_i32_0 : i32, i32, i32
  }
  func.func @transform_1(%arg0: i32) -> (i32, i32, i32) {
    %c0_i32 = arith.constant 0 : i32
    %c0_i32_0 = arith.constant 0 : i32
    %c0_i32_1 = arith.constant 0 : i32
    return %arg0, %c0_i32, %c0_i32_0 : i32, i32, i32
  }
  func.func @transform_2(%arg0: i32) -> (i32, i32, i32) {
    %c0_i32 = arith.constant 0 : i32
    %c1_i32 = arith.constant 1 : i32
    %c0_i32_0 = arith.constant 0 : i32
    return %arg0, %c0_i32, %c1_i32 : i32, i32, i32
  }
  func.func @transform_3(%arg0: i32) -> (i32, i32, i32) {
    %c0_i32 = arith.constant 0 : i32
    %c0_i32_0 = arith.constant 0 : i32
    %c0_i32_1 = arith.constant 0 : i32
    return %arg0, %c0_i32, %c0_i32_0 : i32, i32, i32
  }
  func.func @transform_4(%arg0: i32) -> (i32, i32, i32) {
    %c0_i32 = arith.constant 0 : i32
    %c0_i32_0 = arith.constant 0 : i32
    %c0_i32_1 = arith.constant 0 : i32
    return %arg0, %c0_i32, %c0_i32_0 : i32, i32, i32
  }
}

module attributes {stable_mosaic.version = 11 : i64} {
  func.func @_linear_kernel(%arg0: i32, %arg1: i32, %arg2: i32, %arg3: memref<16x128xbf16, #tpu.memory_space<vmem>>, %arg4: memref<128x128xbf16, #tpu.memory_space<vmem>>, %arg5: memref<1x128xf32, #tpu.memory_space<vmem>>, %arg6: memref<16x128xf32, #tpu.memory_space<vmem>>, %arg7: memref<16x128xf32, #tpu.memory_space<vmem>>) attributes {dimension_semantics = [#tpu.dimension_semantics<parallel>, #tpu.dimension_semantics<parallel>, #tpu.dimension_semantics<arbitrary>], iteration_bounds = array<i64: 1, 3, 1>, scalar_prefetch = 0 : i64, scratch_operands = 1 : i64, tpu.core_type = #tpu.core_type<tc>, window_params = [{transform_indices = @transform_0, window_bounds = array<i64: 16, 128>}, {transform_indices = @transform_1, window_bounds = array<i64: 128, 128>}, {transform_indices = @transform_2, window_bounds = array<i64: 1, 128>}, {transform_indices = @transform_3, window_bounds = array<i64: 16, 128>}]} {
    %c0_i32 = arith.constant 0 : i32
    %0 = arith.cmpi eq, %arg2, %c0_i32 : i32
    %1 = arith.extui %0 : i1 to i32
    %c0_i32_0 = arith.constant 0 : i32
    %2 = arith.cmpi ne, %1, %c0_i32_0 : i32
    scf.if %2 {
      %cst_10 = arith.constant 0.000000e+00 : f32
      %12 = vector.broadcast %cst_10 : f32 to vector<16x128xf32>
      %c0_11 = arith.constant 0 : index
      %c0_12 = arith.constant 0 : index
      %13 = vector.load %arg7[%c0_11, %c0_12] : memref<16x128xf32, #tpu.memory_space<vmem>>, vector<16x128xf32>
      tpu.vector_store %arg7[%c0_11, %c0_12], %12 {strides = array<i32>} : memref<16x128xf32, #tpu.memory_space<vmem>>, vector<16x128xf32>,
    } else {
    }
    %c0 = arith.constant 0 : index
    %c0_1 = arith.constant 0 : index
    %3 = vector.load %arg3[%c0, %c0_1] : memref<16x128xbf16, #tpu.memory_space<vmem>>, vector<16x128xbf16>
    %c0_2 = arith.constant 0 : index
    %c0_3 = arith.constant 0 : index
    %4 = vector.load %arg7[%c0_2, %c0_3] : memref<16x128xf32, #tpu.memory_space<vmem>>, vector<16x128xf32>
    %c0_4 = arith.constant 0 : index
    %c0_5 = arith.constant 0 : index
    %5 = vector.load %arg4[%c0_4, %c0_5] : memref<128x128xbf16, #tpu.memory_space<vmem>>, vector<128x128xbf16>
    %cst = arith.constant dense<0.000000e+00> : vector<16x128xf32>
    %6 = tpu.matmul %3, %5, %cst {dimension_numbers = #tpu.dot_dimension_numbers<[1], [0], [0], [1], [0, 0, 1, 1], [], []>} : vector<16x128xbf16>, vector<128x128xbf16>, vector<16x128xf32> -> vector<16x128xf32>
    %7 = arith.addf %4, %6 : vector<16x128xf32>
    %c0_6 = arith.constant 0 : index
    %c0_7 = arith.constant 0 : index
    %8 = vector.load %arg7[%c0_6, %c0_7] : memref<16x128xf32, #tpu.memory_space<vmem>>, vector<16x128xf32>
    tpu.vector_store %arg7[%c0_6, %c0_7], %7 {strides = array<i32>} : memref<16x128xf32, #tpu.memory_space<vmem>>, vector<16x128xf32>,
    %c0_i32_8 = arith.constant 0 : i32
    %9 = arith.cmpi eq, %arg2, %c0_i32_8 : i32
    %10 = arith.extui %9 : i1 to i32
    %c0_i32_9 = arith.constant 0 : i32
    %11 = arith.cmpi ne, %10, %c0_i32_9 : i32
    scf.if %11 {
      %c0_10 = arith.constant 0 : index
      %c0_11 = arith.constant 0 : index
      %12 = vector.load %arg7[%c0_10, %c0_11] : memref<16x128xf32, #tpu.memory_space<vmem>>, vector<16x128xf32>
      %c0_12 = arith.constant 0 : index
      %c0_13 = arith.constant 0 : index
      %13 = vector.load %arg5[%c0_12, %c0_13] : memref<1x128xf32, #tpu.memory_space<vmem>>, vector<1x128xf32>
      %14 = vector.broadcast %13 : vector<1x128xf32> to vector<16x128xf32>
      %15 = arith.addf %12, %14 : vector<16x128xf32>
      %c0_14 = arith.constant 0 : index
      %c0_15 = arith.constant 0 : index
      %16 = vector.load %arg6[%c0_14, %c0_15] : memref<16x128xf32, #tpu.memory_space<vmem>>, vector<16x128xf32>
      tpu.vector_store %arg6[%c0_14, %c0_15], %15 {strides = array<i32>} : memref<16x128xf32, #tpu.memory_space<vmem>>, vector<16x128xf32>,
    } else {
    }
    return
  }
  func.func @transform_0(%arg0: i32, %arg1: i32, %arg2: i32) -> (i32, i32) {
    %c0_i32 = arith.constant 0 : i32
    return %arg0, %arg2 : i32, i32
  }
  func.func @transform_1(%arg0: i32, %arg1: i32, %arg2: i32) -> (i32, i32) {
    %c0_i32 = arith.constant 0 : i32
    return %arg2, %arg1 : i32, i32
  }
  func.func @transform_2(%arg0: i32, %arg1: i32, %arg2: i32) -> (i32, i32) {
    %c0_i32 = arith.constant 0 : i32
    %c0_i32_0 = arith.constant 0 : i32
    return %c0_i32, %arg1 : i32, i32
  }
  func.func @transform_3(%arg0: i32, %arg1: i32, %arg2: i32) -> (i32, i32) {
    %c0_i32 = arith.constant 0 : i32
    return %arg0, %arg1 : i32, i32
  }
}

</mosaic_0001>

<bundles_post_ra>
// kernel: transformer_forward.41
= control target key start
LH: loop header
LB: loop body
LE: loop exit
PB: predicated region body
PF: predicated region fallthrough
CT: control target
= control target key end

     0   :  { %v227_v0 = vmov 0.0   ;;  %vm228_vm0 = vmmov 0   ;;  %s282_s1 = inlined_call_operand.vmem [shape: bf16[128,128], index: 1, kind: input, shape index: {}]   ;;  %s283_s0 = inlined_call_operand.vmem [shape: bf16[16,128], index: 0, kind: input, shape index: {}]   ;;  %s284_s2 = inlined_call_operand.vmem [shape: f32[1,128], index: 2, kind: input, shape index: {}]   ;;  %s285_s3 = inlined_call_operand.vmem [shape: bf16[16,128], index: 3, kind: output, shape index: {}]  }
   0x1   :  { %196 = vmatprep.subr.bf16.mxu0 %v227_v0  ;;  %v218_v1 = vld [vmem:[%s282_s1] sm:$0xff]   ;;  %212 = vmatprep.mubr.msk.bf16.mxu0 %vm228_vm0, %v227_v0  ;;  %v219_v2 = vld [vmem:[%s282_s1 + $0x8] sm:$0xff]   ;;  %v220_v3 = vld [vmem:[%s282_s1 + $0x10] sm:$0xff]  }
   0x2   :  { %197 = vmatpush3.bf16.msra.mxu0 %v218_v1  ;;  %v221_v4 = vld [vmem:[%s282_s1 + $0x18] sm:$0xff]   ;;  %v222_v5 = vld [vmem:[%s282_s1 + $0x20] sm:$0xff]   ;;  %v223_v6 = vld [vmem:[%s282_s1 + $0x28] sm:$0xff]  }
   0x3   :  { %198 = vmatprep.subr.bf16.mxu0 %v227_v0  ;;  %v224_v7 = vld [vmem:[%s282_s1 + $0x30] sm:$0xff]   ;;  %v225_v8 = vld [vmem:[%s282_s1 + $0x38] sm:$0xff]   ;;  %v226_v9 = vld [vmem:[%s283_s0] sm:$0xff]  }
   0x4   :  { %v177_v11 = vld [vmem:[%s284_s2] ss:$0 sm:$0xff] }
   0x6   :  { %199 = vmatpush3.bf16.msra.mxu0 %v219_v2 }
   0x7   :  { %200 = vmatprep.subr.bf16.mxu0 %v227_v0 }
   0xa   :  { %201 = vmatpush3.bf16.msra.mxu0 %v220_v3 }
   0xb   :  { %202 = vmatprep.subr.bf16.mxu0 %v227_v0 }
   0xe   :  { %203 = vmatpush3.bf16.msra.mxu0 %v221_v4 }
   0xf   :  { %204 = vmatprep.subr.bf16.mxu0 %v227_v0 }
  0x12   :  { %205 = vmatpush3.bf16.msra.mxu0 %v222_v5 }
  0x13   :  { %206 = vmatprep.subr.bf16.mxu0 %v227_v0 }
  0x16   :  { %207 = vmatpush3.bf16.msra.mxu0 %v223_v6 }
  0x17   :  { %208 = vmatprep.subr.bf16.mxu0 %v227_v0 }
  0x1a   :  { %209 = vmatpush3.bf16.msra.mxu0 %v224_v7 }
  0x1b   :  { %210 = vmatprep.subr.bf16.mxu0 %v227_v0 }
  0x1e   :  { %211 = vmatpush3.bf16.msra.mxu0 %v225_v8 }
  0x21   :  { %213 = vmatmul.mubr.bf16.vlgmr.msra.gmra.mrb[0].mxu0 %v226_v9 }
  0xf4   :  { %v129_v10 = vpop.f32.mrb[0].mxu0 }
  0xf5   :  { %v214_v12 = vpop.f32.mrb[1].mxu0  ;;  %v152_v14 = vadd.f32 %v177_v11, %v129_v10 }
  0xf6   :  { %v132_v13 = vpop.f32.mrb[2].mxu0 }
  0xf7   :  { %v153_v15 = vadd.f32 %v177_v11, %v132_v13  ;;  %v215_v16 = vpop.f32.mrb[3].mxu0 }
  0xf9   :  { %v185_v17 = vpack.c.bf16 %v153_v15, %v152_v14 }
  0xfb   :  { %186 = vst [vmem:[%s285_s3] sm:$0xff] %v185_v17  }

// kernel: transformer_forward.39
= control target key start
LH: loop header
LB: loop body
LE: loop exit
PB: predicated region body
PF: predicated region fallthrough
CT: control target
= control target key end

     0   :  { %s820_s12 = smov 0   ;;  %s822_s13 = smov 0   ;;  %s922_s0 = inlined_call_operand.vmem [shape: bf16[16,128], index: 0, kind: input, shape index: {}]   ;;  %s923_s1 = inlined_call_operand.vmem [shape: bf16[128,384], index: 1, kind: input, shape index: {}]   ;;  %s924_s2 = inlined_call_operand.vmem [shape: f32[1,384], index: 2, kind: input, shape index: {}]   ;;  %s925_s3 = inlined_call_operand.vmem [shape: bf16[16,384], index: 3, kind: output, shape index: {}]  }
   0x1   :  { %s824_s14 = smov 0   ;;  %s826_s15 = smov 0  }
   0x2   :  { %s828_s16 = smov 0  }
   0x3 LB: > { %s28_s17 = sadd.s32 1, %s792_s15  ;;  %s645_s18 = sadd.s32 4294967295, %s796_s16   ;;  %s796_s16 = sphi %s828_s16, %s13_s16   ;;  %s792_s15 = sphi %s826_s15, %s930_s15   ;;  %s788_s14 = sphi %s824_s14, %s929_s14   ;;  %s784_s13 = sphi %s822_s13, %s928_s13   ;;  %s780_s12 = sphi %s820_s12, %s927_s12  }
   0x4   : > { %p30_p0 = scmp.ge.s32.totalorder %s28_s17, 3  ;;  %p76_p1 = scmp.ne.s32.totalorder %s784_s13, %s780_s12 }
   0x5   : > { %p77_p2 = scmp.eq.s32.totalorder %s796_s16, 0  ;;  %p134_p4 = scmp.eq.s32.totalorder %s645_s18, 2 }
   0x6   : > { %s932_s17 = smov (%p30_p0, %s28_s17), 0  ;;  %s69_s20 = sadd.s32 1, %s784_s13 }
   0x7   : > { %p78_p3 = por %p77_p2, %p76_p1  ;;  %s65_s19 = ssub.s32 %s792_s15, %s932_s17 }
   0x8   : > { %p67_p5 = scmp.eq.s32.totalorder %s65_s19, 0  ;;  %p855_p6 = por %p134_p4, %p76_p1 }
   0x9   : > { %p649_p7 = scmp.ge.s32.totalorder %s796_s16, 3 }
   0xa   : > { %s860_s22 = scalar_select %p67_p5, %s784_s13, %s69_s20  }
   0xb   : > { %168 = sbr.rel (%p649_p7) target bundleno = 32 (0x20), region = 20 }
  0x12   : > { %171 = sbr.rel (!%p78_p3) target bundleno = 32 (0x20), region = 24  ;;  %s173_s23 = sand.u32 (%p78_p3), 1, %s784_s13  }
  0x13   : > { %s651_s24 = sshll.u32 (%p78_p3), %s792_s15, 2  ;;  %s650_s25 = sshll.u32 (%p78_p3), %s173_s23, 6 }
  0x14   : > { %s868_s28 = scalar_lea.vmem (%p78_p3), %s923_s1, %s651_s24  ;;  %s175_s29 = scalar_lea.vmem (%p78_p3), [#allocation3], %s650_s25 }
  0x15   : > { %v196_v0 = vld [vmem:[%s868_s28] sm:$0xf] (%p78_p3)  ;;  %v198_v1 = vld [vmem:[%s868_s28 + $0xc] sm:$0xf] (%p78_p3)  ;;  %v200_v2 = vld [vmem:[%s868_s28 + $0x18] sm:$0xf] (%p78_p3) }
  0x16   : > { %197 = vst [vmem:[%s175_s29] sm:$0xf] (%p78_p3), %v196_v0  ;;  %199 = vst [vmem:[%s175_s29 + $0x4] sm:$0xf] (%p78_p3), %v198_v1  ;;  %v202_v3 = vld [vmem:[%s868_s28 + $0x24] sm:$0xf] (%p78_p3) }
  0x17   : > { %v204_v4 = vld [vmem:[%s868_s28 + $0x30] sm:$0xf] (%p78_p3)  ;;  %201 = vst [vmem:[%s175_s29 + $0x8] sm:$0xf] (%p78_p3), %v200_v2  ;;  %203 = vst [vmem:[%s175_s29 + $0xc] sm:$0xf] (%p78_p3), %v202_v3 }
  0x18   : > { %205 = vst [vmem:[%s175_s29 + $0x10] sm:$0xf] (%p78_p3), %v204_v4  ;;  %v206_v5 = vld [vmem:[%s868_s28 + $0x3c] sm:$0xf] (%p78_p3)  ;;  %v208_v6 = vld [vmem:[%s868_s28 + $0x48] sm:$0xf] (%p78_p3) }
  0x19   : > { %v210_v7 = vld [vmem:[%s868_s28 + $0x54] sm:$0xf]  ;;  %207 = vst [vmem:[%s175_s29 + $0x14] sm:$0xf] %v206_v5  ;;  %209 = vst [vmem:[%s175_s29 + $0x18] sm:$0xf] %v208_v6 }
  0x1a   : > { %211 = vst [vmem:[%s175_s29 + $0x1c] sm:$0xf] %v210_v7  ;;  %v212_v8 = vld [vmem:[%s868_s28 + $0x60] sm:$0xf]  ;;  %v214_v9 = vld [vmem:[%s868_s28 + $0x6c] sm:$0xf] }
  0x1b   : > { %v216_v10 = vld [vmem:[%s868_s28 + $0x78] sm:$0xf]  ;;  %213 = vst [vmem:[%s175_s29 + $0x20] sm:$0xf] %v212_v8  ;;  %215 = vst [vmem:[%s175_s29 + $0x24] sm:$0xf] %v214_v9 }
  0x1c   : > { %217 = vst [vmem:[%s175_s29 + $0x28] sm:$0xf] %v216_v10  ;;  %v218_v11 = vld [vmem:[%s868_s28 + $0x84] sm:$0xf]  ;;  %v220_v12 = vld [vmem:[%s868_s28 + $0x90] sm:$0xf] }
  0x1d   : > { %v222_v13 = vld [vmem:[%s868_s28 + $0x9c] sm:$0xf]  ;;  %219 = vst [vmem:[%s175_s29 + $0x2c] sm:$0xf] %v218_v11  ;;  %221 = vst [vmem:[%s175_s29 + $0x30] sm:$0xf] %v220_v12 }
  0x1e   : > { %223 = vst [vmem:[%s175_s29 + $0x34] sm:$0xf] %v222_v13  ;;  %v224_v14 = vld [vmem:[%s868_s28 + $0xa8] sm:$0xf]  ;;  %v226_v15 = vld [vmem:[%s868_s28 + $0xb4] sm:$0xf] }
  0x1f   : > { %225 = vst [vmem:[%s175_s29 + $0x38] sm:$0xf] %v224_v14  ;;  %227 = vst [vmem:[%s175_s29 + $0x3c] sm:$0xf] %v226_v15 }
  0x20 PF: > { %p652_p8 = scmp.ge.s32.totalorder %s796_s16, 1  ;;  %p287_p9 = scmp.lt.s32.totalorder %s796_s16, 4 }
  0x22   : > { %p288_p10 = pnand %p652_p8, %p287_p9 }
  0x23   : > { %s294_s30 = sand.u32 (!%p288_p10), 1, %s780_s12   ;;  %v798_v16 = vmov (!%p288_p10), 0.0   ;;  %vm799_vm0 = vmmov (!%p288_p10), 0   ;;  %v757_v25 = vld [vmem:[%s922_s0] sm:$0xff] (!%p288_p10)   ;;  %p337_p11 = scmp.lt.s32.totalorder (!%p288_p10), %s788_s14, 2 }
  0x24   : > { %291 = sbr.rel (%p288_p10) target bundleno = 297 (0x129), region = 69  ;;  %687 = vmatprep.subr.bf16.mxu0 (!%p288_p10), %v798_v16  ;;  %s653_s4 = sshll.u32 (!%p288_p10), %s294_s30, 6  ;;  %703 = vmatprep.mubr.msk.bf16.mxu0 (!%p288_p10), %vm799_vm0, %v798_v16 }
  0x25   : > { %s296_s5 = scalar_lea.vmem (!%p288_p10), [#allocation3], %s653_s4  ;;  %s654_s18 = sshll.u32 (!%p288_p10), %s294_s30, 3 }
  0x26   : > { %v749_v17 = vld [vmem:[%s296_s5] sm:$0xff] (!%p288_p10)   ;;  %v750_v18 = vld [vmem:[%s296_s5 + $0x8] sm:$0xff] (!%p288_p10)   ;;  %v751_v19 = vld [vmem:[%s296_s5 + $0x10] sm:$0xff] (!%p288_p10)   ;;  %s326_s19 = scalar_lea.vmem (!%p288_p10), [#allocation4], %s654_s18 }
  0x27   : > { %688 = vmatpush3.bf16.msra.mxu0 (!%p288_p10), %v749_v17  ;;  %v752_v20 = vld [vmem:[%s296_s5 + $0x18] sm:$0xff] (!%p288_p10)   ;;  %v753_v21 = vld [vmem:[%s296_s5 + $0x20] sm:$0xff] (!%p288_p10)   ;;  %v754_v22 = vld [vmem:[%s296_s5 + $0x28] sm:$0xff] (!%p288_p10)  }
  0x28   : > { %689 = vmatprep.subr.bf16.mxu0 (!%p288_p10), %v798_v16  ;;  %v755_v23 = vld [vmem:[%s296_s5 + $0x30] sm:$0xff] (!%p288_p10)   ;;  %v756_v24 = vld [vmem:[%s296_s5 + $0x38] sm:$0xff] (!%p288_p10)  }
  0x2b   : > { %690 = vmatpush3.bf16.msra.mxu0 %v750_v18  ;;  %s338_s8 = scalar_select %p337_p11, %s788_s14, 2 }
  0x2c   : > { %691 = vmatprep.subr.bf16.mxu0 %v798_v16  ;;  %s668_s20 = sshll.u32 (%p855_p6), %s788_s14, 2 }
  0x2d   : > { %s339_s11 = scalar_lea.vmem %s924_s2, %s338_s8  ;;  %s502_s25 = scalar_lea.vmem (%p855_p6), %s925_s3, %s668_s20 }
  0x2e   : > { %v664_v27 = vld [vmem:[%s339_s11] ss:$0 sm:$0xff] }
  0x2f   : > { %692 = vmatpush3.bf16.msra.mxu0 %v751_v19 }
  0x30   : > { %693 = vmatprep.subr.bf16.mxu0 %v798_v16 }
  0x33   : > { %694 = vmatpush3.bf16.msra.mxu0 %v752_v20 }
  0x34   : > { %695 = vmatprep.subr.bf16.mxu0 %v798_v16 }
  0x37   : > { %696 = vmatpush3.bf16.msra.mxu0 %v753_v21 }
  0x38   : > { %697 = vmatprep.subr.bf16.mxu0 %v798_v16 }
  0x3b   : > { %698 = vmatpush3.bf16.msra.mxu0 %v754_v22 }
  0x3c   : > { %699 = vmatprep.subr.bf16.mxu0 %v798_v16 }
  0x3f   : > { %700 = vmatpush3.bf16.msra.mxu0 %v755_v23 }
  0x40   : > { %701 = vmatprep.subr.bf16.mxu0 %v798_v16 }
  0x43   : > { %702 = vmatpush3.bf16.msra.mxu0 %v756_v24 }
  0x46   : > { %704 = vmatmul.mubr.bf16.vlgmr.msra.gmra.mrb[0].mxu0 %v757_v25 }
 0x119   : > { %v456_v26 = vpop.f32.mrb[0].mxu0 }
 0x11a   : > { %v705_v28 = vpop.f32.mrb[1].mxu0  ;;  %v479_v30 = vadd.f32 %v664_v27, %v456_v26  ;;  %497 = sbr.rel (!%p855_p6) target bundleno = 297 (0x129), region = 85 }
 0x11b   : > { %v459_v29 = vpop.f32.mrb[2].mxu0 }
 0x11c   : > { %v480_v31 = vadd.f32 %v664_v27, %v459_v29  ;;  %v706_v32 = vpop.f32.mrb[3].mxu0 }
 0x11e   : > { %v676_v33 = vpack.c.bf16 %v480_v31, %v479_v30 }
 0x120   : > { %677 = vst [vmem:[%s326_s19] sm:$0xff] %v676_v33  }
 0x127   : > { %v518_v34 = vld [vmem:[%s326_s19] sm:$0xf]  ;;  %v520_v35 = vld [vmem:[%s326_s19 + $0x4] sm:$0xf] }
 0x128   : > { %519 = vst [vmem:[%s502_s25] sm:$0xf] %v518_v34  ;;  %521 = vst [vmem:[%s502_s25 + $0xc] sm:$0xf] %v520_v35 }
 0x129 PF: > { %s13_s16 = sadd.s32 1, %s796_s16   ;;  %s927_s12 = smov %s784_s13 }
 0x12a   : > { %p10_p12 = scmp.ge.s32.totalorder %s13_s16, 5   ;;  %s928_s13 = smov %s860_s22 }
 0x12b   : > { %s929_s14 = smov %s792_s15  ;;  %s930_s15 = smov %s932_s17 }
 0x12c   :  { %12 = sbr.rel (!%p10_p12) target bundleno = 3 (0x3), region = 163 }

// kernel: transformer_forward.42
= control target key start
LH: loop header
LB: loop body
LE: loop exit
PB: predicated region body
PF: predicated region fallthrough
CT: control target
= control target key end

     0   :  { %s161_s0 = inlined_call_operand.vmem [shape: f32[16,128], index: 0, kind: input, shape index: {}]   ;;  %s162_s1 = inlined_call_operand.vmem [shape: bf16[16,128], index: 1, kind: input, shape index: {}]   ;;  %s163_s2 = inlined_call_operand.vmem [shape: f32[1,128], index: 2, kind: input, shape index: {}]   ;;  %s164_s3 = inlined_call_operand.vmem [shape: f32[1,128], index: 3, kind: input, shape index: {}]   ;;  %s165_s4 = inlined_call_operand.vmem [shape: f32[16,128], index: 4, kind: output, shape index: {0}]   ;;  %s166_s5 = inlined_call_operand.vmem [shape: bf16[16,128], index: 5, kind: output, shape index: {1}]  }
   0x1   :  { %v19_v0 = vld [vmem:[%s161_s0] sm:$0xff]  ;;  %v20_v4 = vld [vmem:[%s161_s0 + $0x8] sm:$0xff] }
   0x2   :  { %v95_v1 = vld [vmem:[%s162_s1] sm:$0xff]  }
   0x3   :  { %v96_v2 = vunpack.c.l.bf16 %v95_v1  ;;  %v97_v3 = vunpack.c.h.bf16 %v95_v1  ;;  %v88_v22 = vld [vmem:[%s163_s2] ss:$0 sm:$0xff] }
   0x4   :  { %v89_v24 = vld [vmem:[%s164_s3] ss:$0 sm:$0xff] }
   0x5   :  { %v25_v5 = vadd.f32 %v96_v2, %v19_v0  ;;  %v26_v6 = vadd.f32 %v97_v3, %v20_v4 }
   0x7   :  { %27 = vadd.xlane.f32.xlu0 %v25_v5 }
   0xb   :  { %29 = vadd.xlane.f32.xlu0 %v26_v6 }
  0x94   :  { %v28_v7 = vpop.xlane.xlu0 %27 }
  0x95   :  { %v32_v8 = vmul.f32 0.0078125, %v28_v7 }
  0x97   :  { %v34_v9 = vsub.f32 %v25_v5, %v32_v8 }
  0x98   :  { %v30_v10 = vpop.xlane.xlu0 %29 }
  0x99   :  { %v33_v11 = vmul.f32 0.0078125, %v30_v10  ;;  %v36_v12 = vmul.f32 %v34_v9, %v34_v9 }
  0x9b   :  { %v35_v13 = vsub.f32 %v26_v6, %v33_v11  ;;  %38 = vadd.xlane.f32.xlu1 %v36_v12 }
  0x9d   :  { %v37_v14 = vmul.f32 %v35_v13, %v35_v13 }
  0x9f   :  { %40 = vadd.xlane.f32.xlu1 %v37_v14 }
 0x128   :  { %v39_v15 = vpop.xlane.xlu1 %38 }
 0x129   :  { %v42_v16 = vmul.f32 0.0078125, %v39_v15 }
 0x12b   :  { %v44_v17 = vadd.f32 1e-05, %v42_v16 }
 0x12c   :  { %v41_v18 = vpop.xlane.xlu1 %40 }
 0x12d   :  { %103 = vrsqrt.f32 %v44_v17  ;;  %v43_v19 = vmul.f32 0.0078125, %v41_v18 }
 0x12f   :  { %v45_v20 = vadd.f32 1e-05, %v43_v19 }
 0x131   :  { %105 = vrsqrt.f32 %v45_v20 }
 0x137   :  { %v104_v21 = vpop.eup %103 }
 0x138   :  { %v48_v23 = vmul.f32 %v104_v21, %v34_v9 }
 0x13a   :  { %v57_v25 = vmul.f32 %v88_v22, %v48_v23 }
 0x13b   :  { %v106_v26 = vpop.eup %105 }
 0x13c   :  { %v66_v27 = vadd.f32 %v89_v24, %v57_v25  ;;  %v49_v28 = vmul.f32 %v106_v26, %v35_v13 }
 0x13e   :  { %68 = vst [vmem:[%s165_s4] sm:$0xff] %v66_v27  ;;  %v58_v29 = vmul.f32 %v88_v22, %v49_v28 }
 0x140   :  { %v67_v30 = vadd.f32 %v89_v24, %v58_v29 }
 0x142   :  { %69 = vst [vmem:[%s165_s4 + $0x8] sm:$0xff] %v67_v30  ;;  %v101_v31 = vpack.c.bf16 %v67_v30, %v66_v27 }
 0x144   :  { %102 = vst [vmem:[%s166_s5] sm:$0xff] %v101_v31  }

// kernel: transformer_forward.40
= control target key start
LH: loop header
LB: loop body
LE: loop exit
PB: predicated region body
PF: predicated region fallthrough
CT: control target
= control target key end

     0   :  { %s1060_s15 = smov 0   ;;  %s1180_s0 = inlined_call_operand.vmem [shape: bf16[2,8,384], index: 0, kind: input, shape index: {}, may-alias: {0,1,2}]   ;;  %s1181_s1 = inlined_call_operand.vmem [shape: bf16[2,8,384], index: 1, kind: input, shape index: {}, may-alias: {0,1,2}]   ;;  %s1182_s2 = inlined_call_operand.vmem [shape: bf16[2,8,384], index: 2, kind: input, shape index: {}, may-alias: {0,1,2}]   ;;  %s1183_s3 = inlined_call_operand.vmem [shape: f32[2,1,8], index: 3, kind: input, shape index: {}]   ;;  %s1184_s4 = inlined_call_operand.vmem [shape: bf16[2,8,128], index: 4, kind: output, shape index: {}]  }
   0x1 LB: > { %s876_s16 = sadd.s32 4294967295, %s1028_s15   ;;  %p880_p0 = scmp.ge.s32.totalorder %s1028_s15, 1  ;;  %s1028_s15 = sphi %s1060_s15, %s14_s15  }
   0x2   : > { %p192_p1 = scmp.lt.s32.totalorder %s1028_s15, 3 }
   0x4   : > { %p193_p2 = pnand %p880_p0, %p192_p1 }
   0x5   : > { %p232_p3 = scmp.lt.s32.totalorder (!%p193_p2), %s876_s16, 1  ;;  %v1030_v0 = vmov (!%p193_p2), 0.0   ;;  %vm1031_vm0 = vmmov (!%p193_p2), 0   ;;  %vm261_vm1 = vcmask (!%p193_p2), 261120   ;;  %vm316_vm2 = vcmask (!%p193_p2), 64512   ;;  %s1032_s27 = smov (!%p193_p2), 96  }
   0x6   : > { %196 = sbr.rel (%p193_p2) target bundleno = 1481 (0x5c9), region = 36  ;;  %935 = vmatprep.subr.bf16.mxu0 (!%p193_p2), %v1030_v0  ;;  %937 = vmatprep.mubr.msk.bf16.mxu0 (!%p193_p2), %vm1031_vm0, %v1030_v0  ;;  %s1033_s28 = smov (!%p193_p2), 64   ;;  %vm332_vm3 = vcmask (!%p193_p2), 1043456   ;;  %vm377_vm4 = vcmask (!%p193_p2), 257024   ;;  %vm510_vm5 = vcmask (!%p193_p2), 519424   ;;  %vm643_vm6 = vcmask (!%p193_p2), 781824  }
   0x7   : > { %941 = vmatprep.subr.bf16.mxu1 (!%p193_p2), %v1030_v0  ;;  %943 = vmatprep.mubr.msk.bf16.mxu1 (!%p193_p2), %vm1031_vm0, %v1030_v0  ;;  %s1034_s29 = smov (!%p193_p2), 32   ;;  %vm776_vm7 = vcmask (!%p193_p2), 1044224  }
   0xd   : > { %s1186_s16 = smov (!%p232_p3, %s876_s16), 1 }
   0xe   : > { %s1077_s17 = smul.u32 12, %s1186_s16  ;;  %s251_s26 = scalar_lea.vmem %s1183_s3, %s1186_s16 }
   0xf   : > { %v1099_v5 = vld [vmem:[%s251_s26] ss:$0 sm:$0xff]  ;;  %s884_s7 = sshll.u32 %s1186_s16, 2 }
  0x10   : > { %s1083_s20 = scalar_lea.vmem %s1181_s1, %s1077_s17  ;;  %s236_s23 = scalar_lea.vmem %s1180_s0, %s1077_s17 }
  0x11   : > { %v885_v1 = vld [vmem:[%s1083_s20 + $0x4] sm:$0xf]  ;;  %v258_v3 = vld [vmem:[%s236_s23] sm:$0xf]  ;;  %s1115_s6 = scalar_lea.vmem %s1182_s2, %s1077_s17  ;;  %s1141_s10 = scalar_lea.vmem %s1184_s4, %s884_s7 }
  0x12   : > { %v266_v2 = vsel %vm261_vm1, %v885_v1, 0  ;;  %v997_v12 = vld [vmem:[%s1083_s20 + $0x4] ss:$0 sps:$4 sm:$0xff]   ;;  %v998_v13 = vld [vmem:[%s236_s23] ss:$0 sps:$4 sm:$0xff]  }
  0x13   : > { %936 = vmatpush3.bf16.xpose.msra.mxu0 %v266_v2  ;;  %390 = vrot.lane.b32.xlu1 %v997_v12, %s1032_s27  ;;  %v1000_v14 = vld [vmem:[%s236_s23] ss:$0 sps:$4 sm:$0xff]   ;;  %v1001_v15 = vld [vmem:[%s1083_s20 + $0x4] ss:$0 sps:$4 sm:$0xff]   ;;  %v886_v22 = vld [vmem:[%s1115_s6 + $0x8] sm:$0xf] }
  0x14   : > { %953 = vmatprep.subr.bf16.mxu0 %v1030_v0  ;;  %v1002_v16 = vld [vmem:[%s236_s23] ss:$0 sps:$4 sm:$0xff]   ;;  %v334_v23 = vsel %vm332_vm3, %v886_v22, 0  ;;  %v999_v24 = vld [vmem:[%s1083_s20 + $0x4] ss:$0 sps:$4 sm:$0xff]  }
  0x15   : > { %942 = vmatpush3.bf16.msra.mxu1 %v334_v23  ;;  %v1004_v12 = vld [vmem:[%s1115_s6 + $0x8] ss:$0 sps:$4 sm:$0xff]  }
  0x16   : > { %947 = vmatprep.subr.bf16.mxu1 %v1030_v0 }
  0x17   : > { %385 = vrot.lane.b32.xlu1 %v998_v13, %s1032_s27 }
  0x1a   : > { %938 = vmatmul.mubr.msk.bf16.vlgmr.msra.gmra.mrb[0].mxu0 %vm261_vm1, %v258_v3 }
  0x1b   : > { %955 = vmatprep.mubr.msk.bf16.mxu0 %vm1031_vm0, %v1030_v0  ;;  %518 = vrot.lane.b32.xlu1 %v1000_v14, %s1033_s28 }
  0x1f   : > { %656 = vrot.lane.b32.xlu1 %v1001_v15, %s1034_s29 }
  0x23   : > { %651 = vrot.lane.b32.xlu1 %v1002_v16, %s1034_s29 }
  0x85   : > { %v391_v27 = vpop.permute.xlu1 %390 }
  0x86   : > { %v396_v29 = vsel %vm261_vm1, %v391_v27, 0 }
  0x89   : > { %v386_v31 = vpop.permute.xlu1 %385 }
  0x8d   : > { %v519_v33 = vpop.permute.xlu1 %518 }
  0x91   : > { %v657_v35 = vpop.permute.xlu1 %656 }
  0x92   : > { %v662_v36 = vsel %vm261_vm1, %v657_v35, 0 }
  0x95   : > { %v652_v37 = vpop.permute.xlu1 %651 }
  0xed   : > { %v302_v4 = vpop.f32.mrb[0].mxu0 }
  0xee   : > { %v308_v6 = vmul.f32 0.17677669, %v302_v4  ;;  %v939_v7 = vpop.f32.mrb[1].mxu0 }
  0xef   : > { %v305_v8 = vpop.f32.mrb[2].mxu0 }
  0xf0   : > { %v940_v9 = vpop.f32.mrb[3].mxu0  ;;  %v315_v10 = vadd.f32 %v1099_v5, %v308_v6 }
  0xf2   : > { %v317_v11 = vsel %vm316_vm2, %v315_v10, -inf }
  0xf3   : > { %318 = vmax.xlane.f32.xlu0 %v317_v11  ;;  %v1003_v11 = vld [vmem:[%s1115_s6 + $0x8] ss:$0 sps:$4 sm:$0xff]  }
 0x180   : > { %v319_v17 = vpop.xlane.xlu0 %318 }
 0x181   : > { %v320_v18 = vsub.f32 %v315_v10, %v319_v17 }
 0x183   : > { %v321_v19 = vmul.f32 1.442695, %v320_v18  ;;  %v1005_v18 = vld [vmem:[%s1115_s6 + $0x8] ss:$0 sps:$4 sm:$0xff]  }
 0x185   : > { %1006 = vpow2.f32 %v321_v19 }
 0x18f   : > { %v1007_v20 = vpop.eup %1006 }
 0x190   : > { %v323_v21 = vsel %vm316_vm2, %v1007_v20, 0.0 }
 0x191   : > { %324 = vadd.xlane.f32.xlu0 %v323_v21 }
 0x1a7   : > { %523 = vrot.lane.b32.xlu0 %v999_v24, %s1033_s28 }
 0x21e   : > { %v325_v25 = vpop.xlane.xlu0 %324 }
 0x21f   : > { %1008 = vrcp.f32 %v325_v25 }
 0x222   : > { %v524_v32 = vpop.permute.xlu0 %523 }
 0x223   : > { %v529_v34 = vsel %vm261_vm1, %v524_v32, 0 }
 0x229   : > { %v1009_v26 = vpop.eup %1008 }
 0x22a   : > { %v327_v28 = vmul.f32 %v1009_v26, %v1007_v20 }
 0x22c   : > { %v328_v30 = vpack.c.bf16 %v327_v28, %v327_v28 }
 0x22e   : > { %944 = vmatmul.mubr.msk.bf16.vlgmr.msra.gmra.mrb[0].mxu1 %vm316_vm2, %v328_v30 }
 0x22f   : > { %948 = vmatpush3.bf16.xpose.msra.mxu1 %v396_v29  ;;  %949 = vmatprep.mubr.msk.bf16.mxu1 %vm1031_vm0, %v1030_v0 }
 0x230   : > { %959 = vmatprep.subr.bf16.mxu1 %v1030_v0 }
 0x236   : > { %950 = vmatmul.mubr.msk.bf16.vlgmr.msra.gmra.mrb[4].mxu1 %vm261_vm1, %v386_v31 }
 0x237   : > { %960 = vmatpush3.bf16.xpose.msra.mxu1 %v529_v34  ;;  %961 = vmatprep.mubr.msk.bf16.mxu1 %vm1031_vm0, %v1030_v0 }
 0x238   : > { %971 = vmatprep.subr.bf16.mxu1 %v1030_v0 }
 0x23e   : > { %962 = vmatmul.mubr.msk.bf16.vlgmr.msra.gmra.mrb[8].mxu1 %vm261_vm1, %v519_v33 }
 0x23f   : > { %972 = vmatpush3.bf16.xpose.msra.mxu1 %v662_v36  ;;  %973 = vmatprep.mubr.msk.bf16.mxu1 %vm1031_vm0, %v1030_v0 }
 0x246   : > { %974 = vmatmul.mubr.msk.bf16.vlgmr.msra.gmra.mrb[12].mxu1 %vm261_vm1, %v652_v37 }
 0x301   : > { %v370_v38 = vpop.f32.mrb[0].mxu1 }
 0x302   : > { %v376_v39 = vpack.c.bf16 %v370_v38, %v370_v38  ;;  %v945_v40 = vpop.f32.mrb[1].mxu1 }
 0x303   : > { %v373_v41 = vpop.f32.mrb[2].mxu1 }
 0x304   : > { %378 = vst.msk [vmem:[%s1141_s10] sm:$0xf] %vm377_vm4, %v376_v39  ;;  %v946_v42 = vpop.f32.mrb[3].mxu1 }
 0x309   : > { %v432_v43 = vpop.f32.mrb[4].mxu1 }
 0x30a   : > { %v438_v44 = vmul.f32 0.17677669, %v432_v43  ;;  %v951_v45 = vpop.f32.mrb[5].mxu1 }
 0x30b   : > { %v435_v46 = vpop.f32.mrb[6].mxu1 }
 0x30c   : > { %v952_v47 = vpop.f32.mrb[7].mxu1  ;;  %v439_v48 = vadd.f32 %v1099_v5, %v438_v44 }
 0x30e   : > { %v440_v49 = vsel %vm316_vm2, %v439_v48, -inf }
 0x30f   : > { %441 = vmax.xlane.f32.xlu1 %v440_v49 }
 0x311   : > { %v565_v50 = vpop.f32.mrb[8].mxu1 }
 0x312   : > { %v571_v51 = vmul.f32 0.17677669, %v565_v50  ;;  %v963_v52 = vpop.f32.mrb[9].mxu1 }
 0x313   : > { %v568_v53 = vpop.f32.mrb[10].mxu1 }
 0x314   : > { %v572_v54 = vadd.f32 %v1099_v5, %v571_v51  ;;  %v964_v55 = vpop.f32.mrb[11].mxu1 }
 0x316   : > { %v573_v56 = vsel %vm316_vm2, %v572_v54, -inf }
 0x317   : > { %574 = vmax.xlane.f32.xlu0 %v573_v56 }
 0x319   : > { %v698_v57 = vpop.f32.mrb[12].mxu1 }
 0x31a   : > { %v704_v58 = vmul.f32 0.17677669, %v698_v57  ;;  %v975_v59 = vpop.f32.mrb[13].mxu1 }
 0x31b   : > { %v701_v60 = vpop.f32.mrb[14].mxu1 }
 0x31c   : > { %v705_v61 = vadd.f32 %v1099_v5, %v704_v58  ;;  %v976_v62 = vpop.f32.mrb[15].mxu1 }
 0x31e   : > { %v706_v63 = vsel %vm316_vm2, %v705_v61, -inf }
 0x31f   : > { %707 = vmax.xlane.f32.xlu1 %v706_v63 }
 0x39c   : > { %v442_v1 = vpop.xlane.xlu1 %441 }
 0x39d   : > { %v443_v2 = vsub.f32 %v439_v48, %v442_v1 }
 0x39f   : > { %v444_v3 = vmul.f32 1.442695, %v443_v2 }
 0x3a1   : > { %1010 = vpow2.f32 %v444_v3 }
 0x3a4   : > { %v575_v4 = vpop.xlane.xlu0 %574 }
 0x3a5   : > { %v576_v6 = vsub.f32 %v572_v54, %v575_v4 }
 0x3a7   : > { %v577_v7 = vmul.f32 1.442695, %v576_v6 }
 0x3a9   : > { %1012 = vpow2.f32 %v577_v7 }
 0x3ab   : > { %v1011_v8 = vpop.eup %1010 }
 0x3ac   : > { %v446_v9 = vsel %vm316_vm2, %v1011_v8, 0.0  ;;  %v708_v13 = vpop.xlane.xlu1 %707 }
 0x3ad   : > { %447 = vadd.xlane.f32.xlu1 %v446_v9  ;;  %v709_v14 = vsub.f32 %v705_v61, %v708_v13 }
 0x3af   : > { %v710_v15 = vmul.f32 1.442695, %v709_v14 }
 0x3b1   : > { %1014 = vpow2.f32 %v710_v15 }
 0x3b3   : > { %v1013_v5 = vpop.eup %1012 }
 0x3b4   : > { %v579_v10 = vsel %vm316_vm2, %v1013_v5, 0.0 }
 0x3b5   : > { %580 = vadd.xlane.f32.xlu0 %v579_v10 }
 0x3bb   : > { %v1015_v16 = vpop.eup %1014 }
 0x3bc   : > { %v712_v17 = vsel %vm316_vm2, %v1015_v16, 0.0 }
 0x3be   : > { %588 = vrot.lane.b32.xlu1 %v1003_v11, %s1033_s28 }
 0x3cb   : > { %455 = vrot.lane.b32.xlu0 %v1004_v12, %s1032_s27 }
 0x3e2   : > { %713 = vadd.xlane.f32.xlu1 %v712_v17 }
 0x3f3   : > { %721 = vrot.lane.b32.xlu1 %v1005_v18, %s1034_s29 }
 0x43a   : > { %v448_v19 = vpop.xlane.xlu1 %447 }
 0x43b   : > { %1016 = vrcp.f32 %v448_v19 }
 0x43e   : > { %v589_v25 = vpop.permute.xlu1 %588 }
 0x43f   : > { %v594_v27 = vsel %vm332_vm3, %v589_v25, 0 }
 0x442   : > { %v581_v20 = vpop.xlane.xlu0 %580 }
 0x443   : > { %1018 = vrcp.f32 %v581_v20 }
 0x445   : > { %v1017_v21 = vpop.eup %1016 }
 0x446   : > { %v450_v22 = vmul.f32 %v1017_v21, %v1011_v8  ;;  %v456_v23 = vpop.permute.xlu0 %455 }
 0x447   : > { %v461_v24 = vsel %vm332_vm3, %v456_v23, 0 }
 0x448   : > { %954 = vmatpush3.bf16.msra.mxu0 %v461_v24  ;;  %v451_v26 = vpack.c.bf16 %v450_v22, %v450_v22 }
 0x449   : > { %965 = vmatprep.subr.bf16.mxu0 %v1030_v0 }
 0x44b   : > { %956 = vmatmul.mubr.msk.bf16.vlgmr.msra.gmra.mrb[4].mxu0 %vm316_vm2, %v451_v26 }
 0x44c   : > { %966 = vmatpush3.bf16.msra.mxu0 %v594_v27  ;;  %967 = vmatprep.mubr.msk.bf16.mxu0 %vm1031_vm0, %v1030_v0 }
 0x44d   : > { %v1019_v28 = vpop.eup %1018  ;;  %977 = vmatprep.subr.bf16.mxu0 %v1030_v0 }
 0x44e   : > { %v583_v29 = vmul.f32 %v1019_v28, %v1013_v5 }
 0x450   : > { %v584_v30 = vpack.c.bf16 %v583_v29, %v583_v29 }
 0x453   : > { %968 = vmatmul.mubr.msk.bf16.vlgmr.msra.gmra.mrb[8].mxu0 %vm316_vm2, %v584_v30 }
 0x454   : > { %979 = vmatprep.mubr.msk.bf16.mxu0 %vm1031_vm0, %v1030_v0 }
 0x46f   : > { %v714_v31 = vpop.xlane.xlu1 %713 }
 0x470   : > { %1020 = vrcp.f32 %v714_v31 }
 0x473   : > { %v722_v32 = vpop.permute.xlu1 %721 }
 0x474   : > { %v727_v33 = vsel %vm332_vm3, %v722_v32, 0 }
 0x475   : > { %978 = vmatpush3.bf16.msra.mxu0 %v727_v33 }
 0x47a   : > { %v1021_v34 = vpop.eup %1020 }
 0x47b   : > { %v716_v35 = vmul.f32 %v1021_v34, %v1015_v16 }
 0x47d   : > { %v717_v36 = vpack.c.bf16 %v716_v35, %v716_v35 }
 0x47f   : > { %980 = vmatmul.mubr.msk.bf16.vlgmr.msra.gmra.mrb[12].mxu0 %vm316_vm2, %v717_v36 }
 0x51e   : > { %v497_v37 = vpop.f32.mrb[4].mxu0 }
 0x51f   : > { %v916_v38 = vpack.c.bf16 %v497_v37, %v497_v37  ;;  %v957_v39 = vpop.f32.mrb[5].mxu0 }
 0x520   : > { %v500_v40 = vpop.f32.mrb[6].mxu0 }
 0x521   : > { %507 = vrot.lane.b32.xlu0 %v916_v38, %s1034_s29  ;;  %v958_v41 = vpop.f32.mrb[7].mxu0 }
 0x526   : > { %v630_v0 = vpop.f32.mrb[8].mxu0 }
 0x527   : > { %v917_v42 = vpack.c.bf16 %v630_v0, %v630_v0  ;;  %v969_v43 = vpop.f32.mrb[9].mxu0 }
 0x528   : > { %v633_v44 = vpop.f32.mrb[10].mxu0 }
 0x529   : > { %640 = vrot.lane.b32.xlu1 %v917_v42, %s1033_s28  ;;  %v970_v45 = vpop.f32.mrb[11].mxu0 }
 0x552   : > { %v763_v46 = vpop.f32.mrb[12].mxu0 }
 0x553   : > { %v918_v47 = vpack.c.bf16 %v763_v46, %v763_v46  ;;  %v981_v48 = vpop.f32.mrb[13].mxu0 }
 0x554   : > { %v766_v49 = vpop.f32.mrb[14].mxu0 }
 0x555   : > { %773 = vrot.lane.b32.xlu0 %v918_v47, %s1032_s27  ;;  %v982_v50 = vpop.f32.mrb[15].mxu0 }
 0x593   : > { %v508_v51 = vpop.permute.xlu0 %507 }
 0x594   : > { %511 = vst.msk [vmem:[%s1141_s10] sm:$0xf] %vm510_vm5, %v508_v51 }
 0x59b   : > { %v641_v52 = vpop.permute.xlu1 %640 }
 0x59c   : > { %644 = vst.msk [vmem:[%s1141_s10] sm:$0xf] %vm643_vm6, %v641_v52 }
 0x5c7   : > { %v774_v53 = vpop.permute.xlu0 %773 }
 0x5c8   : > { %777 = vst.msk [vmem:[%s1141_s10] sm:$0xf] %vm776_vm7, %v774_v53 }
 0x5c9 PF: > { %s14_s15 = sadd.s32 1, %s1028_s15  }
 0x5ca   : > { %p11_p4 = scmp.ge.s32.totalorder %s14_s15, 4  }
 0x5cc   :  { %13 = sbr.rel (!%p11_p4) target bundleno = 1 (0x1), region = 75 }

// kernel: transformer_forward.44
= control target key start
LH: loop header
LB: loop body
LE: loop exit
PB: predicated region body
PF: predicated region fallthrough
CT: control target
= control target key end

     0   :  { %s385_s1 = inlined_call_operand.vmem [shape: bf16[256,128], index: 1, kind: input, shape index: {}]   ;;  %s386_s0 = inlined_call_operand.vmem [shape: bf16[16,256], index: 0, kind: input, shape index: {}]   ;;  %s387_s2 = inlined_call_operand.vmem [shape: f32[1,128], index: 2, kind: input, shape index: {}]   ;;  %s388_s3 = inlined_call_operand.vmem [shape: bf16[16,128], index: 3, kind: output, shape index: {}]  }
   0x1   :  { %v286_v0 = vld [vmem:[%s385_s1 + $0x40] sm:$0xff]   ;;  %v288_v2 = vld [vmem:[%s385_s1 + $0x48] sm:$0xff]   ;;  %v290_v4 = vld [vmem:[%s385_s1 + $0x50] sm:$0xff]  }
   0x2   :  { %v287_v1 = vld [vmem:[%s385_s1] sm:$0xff]   ;;  %264 = vmatprep.subr.bf16.mxu0 %v286_v0  ;;  %v289_v3 = vld [vmem:[%s385_s1 + $0x8] sm:$0xff]   ;;  %v291_v5 = vld [vmem:[%s385_s1 + $0x10] sm:$0xff]  }
   0x3   :  { %265 = vmatpush3.bf16.msra.mxu0 %v287_v1  ;;  %v292_v6 = vld [vmem:[%s385_s1 + $0x58] sm:$0xff]   ;;  %v294_v8 = vld [vmem:[%s385_s1 + $0x60] sm:$0xff]   ;;  %v296_v10 = vld [vmem:[%s385_s1 + $0x68] sm:$0xff]  }
   0x4   :  { %266 = vmatprep.subr.bf16.mxu0 %v288_v2  ;;  %v293_v7 = vld [vmem:[%s385_s1 + $0x18] sm:$0xff]   ;;  %v295_v9 = vld [vmem:[%s385_s1 + $0x20] sm:$0xff]   ;;  %v297_v12 = vld [vmem:[%s385_s1 + $0x28] sm:$0xff]  }
   0x5   :  { %v304_v11 = vld [vmem:[%s386_s0 + $0x4] ss:$8 sps:$4 sm:$0xff]   ;;  %v298_v13 = vld [vmem:[%s385_s1 + $0x70] sm:$0xff]   ;;  %v300_v15 = vld [vmem:[%s385_s1 + $0x78] sm:$0xff]  }
   0x6   :  { %195 = vmatprep.mubr.bf16.mxu0 %v304_v11  ;;  %v299_v14 = vld [vmem:[%s385_s1 + $0x30] sm:$0xff]   ;;  %v301_v16 = vld [vmem:[%s385_s1 + $0x38] sm:$0xff]   ;;  %v302_v17 = vld [vmem:[%s386_s0] ss:$8 sps:$4 sm:$0xff]  }
   0x7   :  { %267 = vmatpush3.bf16.msra.mxu0 %v289_v3  ;;  %v254_v22 = vld [vmem:[%s387_s2] ss:$0 sm:$0xff] }
   0x8   :  { %268 = vmatprep.subr.bf16.mxu0 %v290_v4 }
   0xb   :  { %269 = vmatpush3.bf16.msra.mxu0 %v291_v5 }
   0xc   :  { %270 = vmatprep.subr.bf16.mxu0 %v292_v6 }
   0xf   :  { %271 = vmatpush3.bf16.msra.mxu0 %v293_v7 }
  0x10   :  { %272 = vmatprep.subr.bf16.mxu0 %v294_v8 }
  0x13   :  { %273 = vmatpush3.bf16.msra.mxu0 %v295_v9 }
  0x14   :  { %274 = vmatprep.subr.bf16.mxu0 %v296_v10 }
  0x17   :  { %275 = vmatpush3.bf16.msra.mxu0 %v297_v12 }
  0x18   :  { %276 = vmatprep.subr.bf16.mxu0 %v298_v13 }
  0x1b   :  { %277 = vmatpush3.bf16.msra.mxu0 %v299_v14 }
  0x1c   :  { %278 = vmatprep.subr.bf16.mxu0 %v300_v15 }
  0x1f   :  { %279 = vmatpush3.bf16.msra.mxu0 %v301_v16 }
  0x22   :  { %196 = vmatmul.mubr.bf16.vlgmr.msra.gmra.mrb[0].mxu0 %v302_v17 }
  0xf5   :  { %v280_v18 = vpop.f32.mrb[0].mxu0 }
  0xf6   :  { %v281_v19 = vpop.f32.mrb[1].mxu0 }
  0xf7   :  { %v282_v20 = vadd.f32 %v281_v19, %v280_v18  ;;  %v283_v21 = vpop.f32.mrb[2].mxu0 }
  0xf8   :  { %v284_v23 = vpop.f32.mrb[3].mxu0 }
  0xf9   :  { %v285_v24 = vadd.f32 %v284_v23, %v283_v21  ;;  %v220_v25 = vadd.f32 %v282_v20, %v254_v22 }
  0xfb   :  { %v221_v26 = vadd.f32 %v285_v24, %v254_v22 }
  0xfd   :  { %v262_v27 = vpack.c.bf16 %v221_v26, %v220_v25 }
  0xff   :  { %263 = vst [vmem:[%s388_s3] sm:$0xff] %v262_v27  }

// kernel: transformer_forward.52
= control target key start
LH: loop header
LB: loop body
LE: loop exit
PB: predicated region body
PF: predicated region fallthrough
CT: control target
= control target key end

     0   :  { %s210_s0 = inlined_call_operand.vmem [shape: f32[16,128], index: 0, kind: input, shape index: {}]   ;;  %s211_s1 = inlined_call_operand.vmem [shape: bf16[16,128], index: 1, kind: input, shape index: {}]   ;;  %s212_s2 = inlined_call_operand.vmem [shape: f32[1,128], index: 2, kind: input, shape index: {}]   ;;  %s213_s3 = inlined_call_operand.vmem [shape: f32[1,128], index: 3, kind: input, shape index: {}]   ;;  %s214_s4 = inlined_call_operand.hbm [shape: f32[16,128], index: 4, kind: output, shape index: {0}]   ;;  %s215_s5 = inlined_call_operand.vmem [shape: bf16[16,128], index: 5, kind: output, shape index: {1}]  }
   0x1   :  { %v20_v0 = vld [vmem:[%s210_s0] sm:$0xff] }
   0x2   :  { %v108_v1 = vld [vmem:[%s211_s1] sm:$0xff]  }
   0x3   :  { %v109_v2 = vunpack.c.l.bf16 %v108_v1  ;;  %v110_v3 = vunpack.c.h.bf16 %v108_v1 }
   0x4   :  { %11 = vsyncpa [#allocation3], 0  ;;  %v21_v4 = vld [vmem:[%s210_s0 + $0x8] sm:$0xff]  ;;  %v101_v22 = vld [vmem:[%s212_s2] ss:$0 sm:$0xff]  ;;  %s147_s26 = smov [#allocation2]  }
   0x5   :  { %v26_v5 = vadd.f32 %v109_v2, %v20_v0  ;;  %v27_v6 = vadd.f32 %v110_v3, %v21_v4  ;;  %v102_v24 = vld [vmem:[%s213_s3] ss:$0 sm:$0xff]  ;;  %s86_s27 = sshll.u32 %s147_s26, 4  ;;  %s87_s27 = int_to_ptr.vmem [resolvable:$true] %s86_s27 }
   0x6   :  { %s123_s28 = scalar_lea.vmem %s87_s27, 256  ;;  %p128_p1 = scmp.lt.s32.totalorder %s87_s27, %s87_s27 }
   0x7   :  { %28 = vadd.xlane.f32.xlu0 %v26_v5  ;;  %p124_p0 = scmp.ne.s32.totalorder %s87_s27, %s123_s28  ;;  %p129_p2 = scmp.lt.s32.totalorder %s123_s28, %s123_s28 }
   0x9   :  { %p130_p3 = por %p129_p2, %p128_p1 }
   0xb   :  { %30 = vadd.xlane.f32.xlu0 %v27_v6  ;;  %p131_p4 = pnand %p130_p3, %p124_p0 }
  0x94   :  { %v29_v7 = vpop.xlane.xlu0 %28 }
  0x95   :  { %v33_v8 = vmul.f32 0.0078125, %v29_v7 }
  0x97   :  { %v35_v9 = vsub.f32 %v26_v5, %v33_v8 }
  0x98   :  { %v31_v10 = vpop.xlane.xlu0 %30 }
  0x99   :  { %v34_v11 = vmul.f32 0.0078125, %v31_v10  ;;  %v37_v12 = vmul.f32 %v35_v9, %v35_v9 }
  0x9b   :  { %v36_v13 = vsub.f32 %v27_v6, %v34_v11  ;;  %39 = vadd.xlane.f32.xlu1 %v37_v12 }
  0x9d   :  { %v38_v14 = vmul.f32 %v36_v13, %v36_v13 }
  0x9f   :  { %41 = vadd.xlane.f32.xlu1 %v38_v14 }
 0x128   :  { %v40_v15 = vpop.xlane.xlu1 %39 }
 0x129   :  { %v43_v16 = vmul.f32 0.0078125, %v40_v15 }
 0x12b   :  { %v45_v17 = vadd.f32 1e-05, %v43_v16 }
 0x12c   :  { %v42_v18 = vpop.xlane.xlu1 %41 }
 0x12d   :  { %119 = vrsqrt.f32 %v45_v17  ;;  %v44_v19 = vmul.f32 0.0078125, %v42_v18 }
 0x12f   :  { %v46_v20 = vadd.f32 1e-05, %v44_v19 }
 0x131   :  { %121 = vrsqrt.f32 %v46_v20 }
 0x137   :  { %v120_v21 = vpop.eup %119 }
 0x138   :  { %v49_v23 = vmul.f32 %v120_v21, %v35_v9 }
 0x13a   :  { %v58_v25 = vmul.f32 %v101_v22, %v49_v23 }
 0x13b   :  { %v122_v26 = vpop.eup %121 }
 0x13c   :  { %v50_v27 = vmul.f32 %v122_v26, %v36_v13  ;;  %v67_v28 = vadd.f32 %v102_v24, %v58_v25 }
 0x13e   :  { %v59_v29 = vmul.f32 %v101_v22, %v50_v27  ;;  %69 = vst [vmem:[#allocation2] sm:$0xff] %v67_v28 }
 0x140   :  { %v68_v30 = vadd.f32 %v102_v24, %v59_v29 }
 0x142   :  { %70 = vst [vmem:[#allocation2 + $0x8] sm:$0xff] %v68_v30  ;;  %v114_v31 = vpack.c.bf16 %v68_v30, %v67_v28 }
 0x143   :  { %134 = shalt.err (!%p131_p4)
}
 0x144   :  { %s135_s29 = scalar_lea.hbm %s214_s4, 256 }
 0x145   :  { %p136_p5 = scmp.ne.s32.totalorder %s214_s4, %s135_s29  ;;  %p139_p6 = scmp.lt.u32.totalorder %s135_s29, %s214_s4 }
 0x147   :  { %p141_p7 = pnand %p139_p6, %p136_p5 }
 0x149   :  { %144 = shalt.err (!%p141_p7)
}
 0x14a   :  { %s148_s9 = smov 128   ;;  %s149_s10 = smov 8   ;;  %115 = vst [vmem:[%s215_s5] sm:$0xff] %v114_v31  }
 0x14b   :  { %92 = dma.vmem_to_hbm [thread:$0]  %s87_s27, 256, %s214_s4, [#allocation3], %s148_s9, %s148_s9, %s149_s10  }
 0x14c   :  { %145 = dma.done.wait [#allocation3], 256  }
 0x14d   :  { %146 = vsyncadd [#allocation3], 4294967040 }
 0x14e   :  { %100 = vsyncpa [#allocation3], 1 }

// kernel: transformer_forward.43
= control target key start
LH: loop header
LB: loop body
LE: loop exit
PB: predicated region body
PF: predicated region fallthrough
CT: control target
= control target key end

     0   :  { %v274_v1 = vmov 0   ;;  %v191_v18 = vlaneseq  ;;  %s355_s1 = inlined_call_operand.vmem [shape: bf16[128,256], index: 1, kind: input, shape index: {}]   ;;  %s356_s0 = inlined_call_operand.vmem [shape: bf16[16,128], index: 0, kind: input, shape index: {}]   ;;  %s357_s2 = inlined_call_operand.vmem [shape: f32[1,256], index: 2, kind: input, shape index: {}]   ;;  %s358_s3 = inlined_call_operand.vmem [shape: bf16[16,256], index: 3, kind: output, shape index: {}]  }
   0x1   :  { %v249_v0 = vld [vmem:[%s355_s1 + $0x4] ss:$8 sps:$4 sm:$0xff]   ;;  %163 = vmatprep.mubr.bf16.mxu0 %v274_v1  ;;  %v251_v2 = vld [vmem:[%s355_s1] ss:$8 sps:$4 sm:$0xff]   ;;  %v252_v3 = vld [vmem:[%s355_s1 + $0x14] ss:$8 sps:$4 sm:$0xff]  }
   0x2   :  { %131 = vmatprep.subr.bf16.mxu0 %v249_v0  ;;  %v254_v4 = vld [vmem:[%s355_s1 + $0x10] ss:$8 sps:$4 sm:$0xff]   ;;  %v255_v5 = vld [vmem:[%s355_s1 + $0x24] ss:$8 sps:$4 sm:$0xff]   ;;  %v257_v6 = vld [vmem:[%s355_s1 + $0x20] ss:$8 sps:$4 sm:$0xff]  }
   0x3   :  { %132 = vmatpush1.bf16.msra.mxu0 %v251_v2  ;;  %v258_v7 = vld [vmem:[%s355_s1 + $0x34] ss:$8 sps:$4 sm:$0xff]   ;;  %v260_v8 = vld [vmem:[%s355_s1 + $0x30] ss:$8 sps:$4 sm:$0xff]   ;;  %v261_v9 = vld [vmem:[%s355_s1 + $0x44] ss:$8 sps:$4 sm:$0xff]  }
   0x4   :  { %133 = vmatprep.subr.bf16.mxu0 %v252_v3  ;;  %v263_v10 = vld [vmem:[%s355_s1 + $0x40] ss:$8 sps:$4 sm:$0xff]   ;;  %v264_v11 = vld [vmem:[%s355_s1 + $0x54] ss:$8 sps:$4 sm:$0xff]   ;;  %v266_v12 = vld [vmem:[%s355_s1 + $0x50] ss:$8 sps:$4 sm:$0xff]  }
   0x5   :  { %v267_v13 = vld [vmem:[%s355_s1 + $0x64] ss:$8 sps:$4 sm:$0xff]   ;;  %v269_v14 = vld [vmem:[%s355_s1 + $0x60] ss:$8 sps:$4 sm:$0xff]   ;;  %v270_v15 = vld [vmem:[%s355_s1 + $0x74] ss:$8 sps:$4 sm:$0xff]  }
   0x6   :  { %v272_v16 = vld [vmem:[%s355_s1 + $0x70] ss:$8 sps:$4 sm:$0xff]   ;;  %v273_v17 = vld [vmem:[%s356_s0] sm:$0xff]   ;;  %v192_v19 = vshrl.u32 %v191_v18, 7 }
   0x7   :  { %134 = vmatpush1.bf16.msra.mxu0 %v254_v4  ;;  %v189_v21 = vld [vmem:[%s357_s2] sm:$0x3] }
   0x8   :  { %135 = vmatprep.subr.bf16.mxu0 %v255_v5  ;;  %v193_v20 = vsub.s32 0, %v192_v19  ;;  %v197_v22 = vsub.s32 1, %v192_v19 }
   0xa   :  { %v194_v23 = vrot.slane %v189_v21, %v193_v20  ;;  %v198_v24 = vrot.slane %v189_v21, %v197_v22 }
   0xb   :  { %136 = vmatpush1.bf16.msra.mxu0 %v257_v6 }
   0xc   :  { %137 = vmatprep.subr.bf16.mxu0 %v258_v7 }
   0xf   :  { %138 = vmatpush1.bf16.msra.mxu0 %v260_v8 }
  0x10   :  { %139 = vmatprep.subr.bf16.mxu0 %v261_v9 }
  0x13   :  { %140 = vmatpush1.bf16.msra.mxu0 %v263_v10 }
  0x14   :  { %141 = vmatprep.subr.bf16.mxu0 %v264_v11 }
  0x17   :  { %142 = vmatpush1.bf16.msra.mxu0 %v266_v12 }
  0x18   :  { %143 = vmatprep.subr.bf16.mxu0 %v267_v13 }
  0x1b   :  { %144 = vmatpush1.bf16.msra.mxu0 %v269_v14 }
  0x1c   :  { %145 = vmatprep.subr.bf16.mxu0 %v270_v15 }
  0x1f   :  { %146 = vmatpush1.bf16.msra.mxu0 %v272_v16 }
  0x22   :  { %164 = vmatmul.mubr.bf16.vlgmr.msra.gmra.mrb[0].mxu0 %v273_v17 }
  0xf5   :  { %v165_v25 = vpop.f32.mrb[0].mxu0 }
  0xf6   :  { %v201_v26 = vadd.f32 %v194_v23, %v165_v25  ;;  %v167_v27 = vpop.f32.mrb[1].mxu0 }
  0xf7   :  { %v202_v28 = vadd.f32 %v198_v24, %v167_v27  ;;  %v169_v29 = vpop.f32.mrb[2].mxu0 }
  0xf8   :  { %v205_v30 = vmax.f32 %v201_v26, 0.0  ;;  %v203_v31 = vadd.f32 %v194_v23, %v169_v29  ;;  %v171_v32 = vpop.f32.mrb[3].mxu0 }
  0xf9   :  { %v206_v33 = vmax.f32 %v202_v28, 0.0  ;;  %v204_v34 = vadd.f32 %v198_v24, %v171_v32 }
  0xfa   :  { %v207_v35 = vmax.f32 %v203_v31, 0.0 }
  0xfb   :  { %v246_v36 = vpack.c.bf16 %v206_v33, %v205_v30  ;;  %v208_v37 = vmax.f32 %v204_v34, 0.0 }
  0xfd   :  { %221 = vst [vmem:[%s358_s3] sm:$0xff] %v246_v36  ;;  %v247_v38 = vpack.c.bf16 %v208_v37, %v207_v35 }
  0xff   :  { %222 = vst [vmem:[%s358_s3 + $0x8] sm:$0xff] %v247_v38 }

// kernel: transformer_forward.58
= control target key start
LH: loop header
LB: loop body
LE: loop exit
PB: predicated region body
PF: predicated region fallthrough
CT: control target
= control target key end

     0   :  { %v270_v1 = vmov 0   ;;  %v191_v18 = vlaneseq  ;;  %s351_s1 = inlined_call_operand.vmem [shape: bf16[128,256], index: 1, kind: input, shape index: {}]   ;;  %s352_s0 = inlined_call_operand.vmem [shape: bf16[16,128], index: 0, kind: input, shape index: {}]   ;;  %s353_s2 = inlined_call_operand.vmem [shape: f32[1,256], index: 2, kind: input, shape index: {}]   ;;  %s354_s3 = inlined_call_operand.vmem [shape: bf16[16,256], index: 3, kind: output, shape index: {}]  }
   0x1   :  { %v245_v0 = vld [vmem:[%s351_s1 + $0x4] ss:$8 sps:$4 sm:$0xff]   ;;  %163 = vmatprep.mubr.bf16.mxu0 %v270_v1  ;;  %v247_v2 = vld [vmem:[%s351_s1] ss:$8 sps:$4 sm:$0xff]   ;;  %v248_v3 = vld [vmem:[%s351_s1 + $0x14] ss:$8 sps:$4 sm:$0xff]  }
   0x2   :  { %131 = vmatprep.subr.bf16.mxu0 %v245_v0  ;;  %v250_v4 = vld [vmem:[%s351_s1 + $0x10] ss:$8 sps:$4 sm:$0xff]   ;;  %v251_v5 = vld [vmem:[%s351_s1 + $0x24] ss:$8 sps:$4 sm:$0xff]   ;;  %v253_v6 = vld [vmem:[%s351_s1 + $0x20] ss:$8 sps:$4 sm:$0xff]  }
   0x3   :  { %132 = vmatpush1.bf16.msra.mxu0 %v247_v2  ;;  %v254_v7 = vld [vmem:[%s351_s1 + $0x34] ss:$8 sps:$4 sm:$0xff]   ;;  %v256_v8 = vld [vmem:[%s351_s1 + $0x30] ss:$8 sps:$4 sm:$0xff]   ;;  %v257_v9 = vld [vmem:[%s351_s1 + $0x44] ss:$8 sps:$4 sm:$0xff]  }
   0x4   :  { %133 = vmatprep.subr.bf16.mxu0 %v248_v3  ;;  %v259_v10 = vld [vmem:[%s351_s1 + $0x40] ss:$8 sps:$4 sm:$0xff]   ;;  %v260_v11 = vld [vmem:[%s351_s1 + $0x54] ss:$8 sps:$4 sm:$0xff]   ;;  %v262_v12 = vld [vmem:[%s351_s1 + $0x50] ss:$8 sps:$4 sm:$0xff]  }
   0x5   :  { %v263_v13 = vld [vmem:[%s351_s1 + $0x64] ss:$8 sps:$4 sm:$0xff]   ;;  %v265_v14 = vld [vmem:[%s351_s1 + $0x60] ss:$8 sps:$4 sm:$0xff]   ;;  %v266_v15 = vld [vmem:[%s351_s1 + $0x74] ss:$8 sps:$4 sm:$0xff]  }
   0x6   :  { %v268_v16 = vld [vmem:[%s351_s1 + $0x70] ss:$8 sps:$4 sm:$0xff]   ;;  %v269_v17 = vld [vmem:[%s352_s0] sm:$0xff]   ;;  %v192_v19 = vshrl.u32 %v191_v18, 7 }
   0x7   :  { %134 = vmatpush1.bf16.msra.mxu0 %v250_v4  ;;  %v189_v21 = vld [vmem:[%s353_s2] sm:$0x3] }
   0x8   :  { %135 = vmatprep.subr.bf16.mxu0 %v251_v5  ;;  %v193_v20 = vsub.s32 0, %v192_v19  ;;  %v197_v22 = vsub.s32 1, %v192_v19 }
   0xa   :  { %v194_v23 = vrot.slane %v189_v21, %v193_v20  ;;  %v198_v24 = vrot.slane %v189_v21, %v197_v22 }
   0xb   :  { %136 = vmatpush1.bf16.msra.mxu0 %v253_v6 }
   0xc   :  { %137 = vmatprep.subr.bf16.mxu0 %v254_v7 }
   0xf   :  { %138 = vmatpush1.bf16.msra.mxu0 %v256_v8 }
  0x10   :  { %139 = vmatprep.subr.bf16.mxu0 %v257_v9 }
  0x13   :  { %140 = vmatpush1.bf16.msra.mxu0 %v259_v10 }
  0x14   :  { %141 = vmatprep.subr.bf16.mxu0 %v260_v11 }
  0x17   :  { %142 = vmatpush1.bf16.msra.mxu0 %v262_v12 }
  0x18   :  { %143 = vmatprep.subr.bf16.mxu0 %v263_v13 }
  0x1b   :  { %144 = vmatpush1.bf16.msra.mxu0 %v265_v14 }
  0x1c   :  { %145 = vmatprep.subr.bf16.mxu0 %v266_v15 }
  0x1f   :  { %146 = vmatpush1.bf16.msra.mxu0 %v268_v16 }
  0x22   :  { %164 = vmatmul.mubr.bf16.vlgmr.msra.gmra.mrb[0].mxu0 %v269_v17 }
  0xf5   :  { %v165_v25 = vpop.f32.mrb[0].mxu0 }
  0xf6   :  { %v201_v26 = vadd.f32 %v194_v23, %v165_v25  ;;  %v167_v27 = vpop.f32.mrb[1].mxu0 }
  0xf7   :  { %v202_v28 = vadd.f32 %v198_v24, %v167_v27  ;;  %v169_v29 = vpop.f32.mrb[2].mxu0 }
  0xf8   :  { %v203_v30 = vadd.f32 %v194_v23, %v169_v29  ;;  %v171_v31 = vpop.f32.mrb[3].mxu0 }
  0xf9   :  { %v242_v32 = vpack.c.bf16 %v202_v28, %v201_v26  ;;  %v204_v33 = vadd.f32 %v198_v24, %v171_v31 }
  0xfb   :  { %217 = vst [vmem:[%s354_s3] sm:$0xff] %v242_v32  ;;  %v243_v34 = vpack.c.bf16 %v204_v33, %v203_v30 }
  0xfd   :  { %218 = vst [vmem:[%s354_s3 + $0x8] sm:$0xff] %v243_v34 }

// kernel: transformer_forward.59
= control target key start
LH: loop header
LB: loop body
LE: loop exit
PB: predicated region body
PF: predicated region fallthrough
CT: control target
= control target key end

     0   :  { %s1047_s15 = smov 0   ;;  %s1170_s0 = inlined_call_operand.vmem [shape: bf16[2,8,128], index: 0, kind: input, shape index: {}]   ;;  %s1171_s1 = inlined_call_operand.vmem [shape: bf16[2,8,256], index: 1, kind: input, shape index: {}, may-alias: {1,2}]   ;;  %s1172_s2 = inlined_call_operand.vmem [shape: bf16[2,8,256], index: 2, kind: input, shape index: {}, may-alias: {1,2}]   ;;  %s1173_s3 = inlined_call_operand.vmem [shape: f32[2,1,8], index: 3, kind: input, shape index: {}]   ;;  %s1174_s4 = inlined_call_operand.vmem [shape: bf16[2,8,128], index: 4, kind: output, shape index: {}]  }
   0x1 LB: > { %s864_s16 = sadd.s32 4294967295, %s1015_s15   ;;  %p868_p0 = scmp.ge.s32.totalorder %s1015_s15, 1  ;;  %s1015_s15 = sphi %s1047_s15, %s14_s15  }
   0x2   : > { %p190_p1 = scmp.lt.s32.totalorder %s1015_s15, 3 }
   0x4   : > { %p191_p2 = pnand %p868_p0, %p190_p1 }
   0x5   : > { %p228_p3 = scmp.lt.s32.totalorder (!%p191_p2), %s864_s16, 1  ;;  %v1017_v0 = vmov (!%p191_p2), 0.0   ;;  %vm1018_vm0 = vmmov (!%p191_p2), 0   ;;  %vm255_vm1 = vcmask (!%p191_p2), 261120   ;;  %vm310_vm2 = vcmask (!%p191_p2), 64512   ;;  %s1019_s28 = smov (!%p191_p2), 96  }
   0x6   : > { %194 = sbr.rel (%p191_p2) target bundleno = 1480 (0x5c8), region = 36  ;;  %923 = vmatprep.subr.bf16.mxu0 (!%p191_p2), %v1017_v0  ;;  %925 = vmatprep.mubr.msk.bf16.mxu0 (!%p191_p2), %vm1018_vm0, %v1017_v0  ;;  %s1020_s29 = smov (!%p191_p2), 64   ;;  %vm326_vm3 = vcmask (!%p191_p2), 1043456   ;;  %vm371_vm4 = vcmask (!%p191_p2), 257024   ;;  %vm504_vm5 = vcmask (!%p191_p2), 519424   ;;  %vm637_vm6 = vcmask (!%p191_p2), 781824  }
   0x7   : > { %929 = vmatprep.subr.bf16.mxu1 (!%p191_p2), %v1017_v0  ;;  %931 = vmatprep.mubr.msk.bf16.mxu1 (!%p191_p2), %vm1018_vm0, %v1017_v0  ;;  %s1021_s30 = smov (!%p191_p2), 32   ;;  %vm770_vm7 = vcmask (!%p191_p2), 1044224  }
   0xd   : > { %s1176_s16 = smov (!%p228_p3, %s864_s16), 1 }
   0xe   : > { %s902_s17 = sshll.u32 %s1176_s16, 3  ;;  %s869_s18 = sshll.u32 %s1176_s16, 2 }
   0xf   : > { %s1070_s21 = scalar_lea.vmem %s1171_s1, %s902_s17  ;;  %s231_s24 = scalar_lea.vmem %s1170_s0, %s869_s18 }
  0x10   : > { %v253_v1 = vld [vmem:[%s1070_s21] sm:$0xf]  ;;  %s245_s27 = scalar_lea.vmem %s1173_s3, %s1176_s16  ;;  %s1104_s7 = scalar_lea.vmem %s1172_s2, %s902_s17 }
  0x11   : > { %v260_v2 = vsel %vm255_vm1, %v253_v1, 0  ;;  %v252_v3 = vld [vmem:[%s231_s24] sm:$0xf]  ;;  %v875_v22 = vld [vmem:[%s1104_s7 + $0x4] sm:$0xf]  ;;  %s1131_s10 = scalar_lea.vmem %s1174_s4, %s869_s18 }
  0x12   : > { %924 = vmatpush3.bf16.xpose.msra.mxu0 %v260_v2  ;;  %v1087_v5 = vld [vmem:[%s245_s27] ss:$0 sm:$0xff]  ;;  %v328_v23 = vsel %vm326_vm3, %v875_v22, 0 }
  0x13   : > { %941 = vmatprep.subr.bf16.mxu0 %v1017_v0  ;;  %v984_v12 = vld [vmem:[%s1070_s21] ss:$0 sps:$4 sm:$0xff]   ;;  %930 = vmatpush3.bf16.msra.mxu1 %v328_v23 }
  0x14   : > { %384 = vrot.lane.b32.xlu1 %v984_v12, %s1019_s28  ;;  %v985_v13 = vld [vmem:[%s231_s24] ss:$0 sps:$4 sm:$0xff]   ;;  %935 = vmatprep.subr.bf16.mxu1 %v1017_v0  ;;  %v991_v12 = vld [vmem:[%s1104_s7 + $0x4] ss:$0 sps:$4 sm:$0xff]  }
  0x15   : > { %v987_v14 = vld [vmem:[%s231_s24] ss:$0 sps:$4 sm:$0xff]  }
  0x16   : > { %v988_v15 = vld [vmem:[%s1070_s21] ss:$0 sps:$4 sm:$0xff]  }
  0x17   : > { %v989_v16 = vld [vmem:[%s231_s24] ss:$0 sps:$4 sm:$0xff]  }
  0x18   : > { %379 = vrot.lane.b32.xlu1 %v985_v13, %s1019_s28  ;;  %v986_v24 = vld [vmem:[%s1070_s21] ss:$0 sps:$4 sm:$0xff]  }
  0x19   : > { %926 = vmatmul.mubr.msk.bf16.vlgmr.msra.gmra.mrb[0].mxu0 %vm255_vm1, %v252_v3 }
  0x1a   : > { %943 = vmatprep.mubr.msk.bf16.mxu0 %vm1018_vm0, %v1017_v0 }
  0x1c   : > { %512 = vrot.lane.b32.xlu1 %v987_v14, %s1020_s29 }
  0x20   : > { %650 = vrot.lane.b32.xlu1 %v988_v15, %s1021_s30 }
  0x24   : > { %645 = vrot.lane.b32.xlu1 %v989_v16, %s1021_s30 }
  0x86   : > { %v385_v27 = vpop.permute.xlu1 %384 }
  0x87   : > { %v390_v29 = vsel %vm255_vm1, %v385_v27, 0 }
  0x8a   : > { %v380_v31 = vpop.permute.xlu1 %379 }
  0x8e   : > { %v513_v33 = vpop.permute.xlu1 %512 }
  0x92   : > { %v651_v35 = vpop.permute.xlu1 %650 }
  0x93   : > { %v656_v36 = vsel %vm255_vm1, %v651_v35, 0 }
  0x96   : > { %v646_v37 = vpop.permute.xlu1 %645 }
  0xec   : > { %v296_v4 = vpop.f32.mrb[0].mxu0 }
  0xed   : > { %v302_v6 = vmul.f32 0.17677669, %v296_v4  ;;  %v927_v7 = vpop.f32.mrb[1].mxu0 }
  0xee   : > { %v299_v8 = vpop.f32.mrb[2].mxu0 }
  0xef   : > { %v928_v9 = vpop.f32.mrb[3].mxu0  ;;  %v309_v10 = vadd.f32 %v1087_v5, %v302_v6 }
  0xf1   : > { %v311_v11 = vsel %vm310_vm2, %v309_v10, -inf }
  0xf2   : > { %312 = vmax.xlane.f32.xlu0 %v311_v11  ;;  %v990_v11 = vld [vmem:[%s1104_s7 + $0x4] ss:$0 sps:$4 sm:$0xff]  }
 0x17f   : > { %v313_v17 = vpop.xlane.xlu0 %312 }
 0x180   : > { %v314_v18 = vsub.f32 %v309_v10, %v313_v17 }
 0x182   : > { %v315_v19 = vmul.f32 1.442695, %v314_v18  ;;  %v992_v18 = vld [vmem:[%s1104_s7 + $0x4] ss:$0 sps:$4 sm:$0xff]  }
 0x184   : > { %993 = vpow2.f32 %v315_v19 }
 0x18e   : > { %v994_v20 = vpop.eup %993 }
 0x18f   : > { %v317_v21 = vsel %vm310_vm2, %v994_v20, 0.0 }
 0x190   : > { %318 = vadd.xlane.f32.xlu0 %v317_v21 }
 0x1a6   : > { %517 = vrot.lane.b32.xlu0 %v986_v24, %s1020_s29 }
 0x21d   : > { %v319_v25 = vpop.xlane.xlu0 %318 }
 0x21e   : > { %995 = vrcp.f32 %v319_v25 }
 0x221   : > { %v518_v32 = vpop.permute.xlu0 %517 }
 0x222   : > { %v523_v34 = vsel %vm255_vm1, %v518_v32, 0 }
 0x228   : > { %v996_v26 = vpop.eup %995 }
 0x229   : > { %v321_v28 = vmul.f32 %v996_v26, %v994_v20 }
 0x22b   : > { %v322_v30 = vpack.c.bf16 %v321_v28, %v321_v28 }
 0x22d   : > { %932 = vmatmul.mubr.msk.bf16.vlgmr.msra.gmra.mrb[0].mxu1 %vm310_vm2, %v322_v30 }
 0x22e   : > { %936 = vmatpush3.bf16.xpose.msra.mxu1 %v390_v29  ;;  %937 = vmatprep.mubr.msk.bf16.mxu1 %vm1018_vm0, %v1017_v0 }
 0x22f   : > { %947 = vmatprep.subr.bf16.mxu1 %v1017_v0 }
 0x235   : > { %938 = vmatmul.mubr.msk.bf16.vlgmr.msra.gmra.mrb[4].mxu1 %vm255_vm1, %v380_v31 }
 0x236   : > { %948 = vmatpush3.bf16.xpose.msra.mxu1 %v523_v34  ;;  %949 = vmatprep.mubr.msk.bf16.mxu1 %vm1018_vm0, %v1017_v0 }
 0x237   : > { %959 = vmatprep.subr.bf16.mxu1 %v1017_v0 }
 0x23d   : > { %950 = vmatmul.mubr.msk.bf16.vlgmr.msra.gmra.mrb[8].mxu1 %vm255_vm1, %v513_v33 }
 0x23e   : > { %960 = vmatpush3.bf16.xpose.msra.mxu1 %v656_v36  ;;  %961 = vmatprep.mubr.msk.bf16.mxu1 %vm1018_vm0, %v1017_v0 }
 0x245   : > { %962 = vmatmul.mubr.msk.bf16.vlgmr.msra.gmra.mrb[12].mxu1 %vm255_vm1, %v646_v37 }
 0x300   : > { %v364_v38 = vpop.f32.mrb[0].mxu1 }
 0x301   : > { %v370_v39 = vpack.c.bf16 %v364_v38, %v364_v38  ;;  %v933_v40 = vpop.f32.mrb[1].mxu1 }
 0x302   : > { %v367_v41 = vpop.f32.mrb[2].mxu1 }
 0x303   : > { %372 = vst.msk [vmem:[%s1131_s10] sm:$0xf] %vm371_vm4, %v370_v39  ;;  %v934_v42 = vpop.f32.mrb[3].mxu1 }
 0x308   : > { %v426_v43 = vpop.f32.mrb[4].mxu1 }
 0x309   : > { %v432_v44 = vmul.f32 0.17677669, %v426_v43  ;;  %v939_v45 = vpop.f32.mrb[5].mxu1 }
 0x30a   : > { %v429_v46 = vpop.f32.mrb[6].mxu1 }
 0x30b   : > { %v940_v47 = vpop.f32.mrb[7].mxu1  ;;  %v433_v48 = vadd.f32 %v1087_v5, %v432_v44 }
 0x30d   : > { %v434_v49 = vsel %vm310_vm2, %v433_v48, -inf }
 0x30e   : > { %435 = vmax.xlane.f32.xlu1 %v434_v49 }
 0x310   : > { %v559_v50 = vpop.f32.mrb[8].mxu1 }
 0x311   : > { %v565_v51 = vmul.f32 0.17677669, %v559_v50  ;;  %v951_v52 = vpop.f32.mrb[9].mxu1 }
 0x312   : > { %v562_v53 = vpop.f32.mrb[10].mxu1 }
 0x313   : > { %v566_v54 = vadd.f32 %v1087_v5, %v565_v51  ;;  %v952_v55 = vpop.f32.mrb[11].mxu1 }
 0x315   : > { %v567_v56 = vsel %vm310_vm2, %v566_v54, -inf }
 0x316   : > { %568 = vmax.xlane.f32.xlu0 %v567_v56 }
 0x318   : > { %v692_v57 = vpop.f32.mrb[12].mxu1 }
 0x319   : > { %v698_v58 = vmul.f32 0.17677669, %v692_v57  ;;  %v963_v59 = vpop.f32.mrb[13].mxu1 }
 0x31a   : > { %v695_v60 = vpop.f32.mrb[14].mxu1 }
 0x31b   : > { %v699_v61 = vadd.f32 %v1087_v5, %v698_v58  ;;  %v964_v62 = vpop.f32.mrb[15].mxu1 }
 0x31d   : > { %v700_v63 = vsel %vm310_vm2, %v699_v61, -inf }
 0x31e   : > { %701 = vmax.xlane.f32.xlu1 %v700_v63 }
 0x39b   : > { %v436_v1 = vpop.xlane.xlu1 %435 }
 0x39c   : > { %v437_v2 = vsub.f32 %v433_v48, %v436_v1 }
 0x39e   : > { %v438_v3 = vmul.f32 1.442695, %v437_v2 }
 0x3a0   : > { %997 = vpow2.f32 %v438_v3 }
 0x3a3   : > { %v569_v4 = vpop.xlane.xlu0 %568 }
 0x3a4   : > { %v570_v6 = vsub.f32 %v566_v54, %v569_v4 }
 0x3a6   : > { %v571_v7 = vmul.f32 1.442695, %v570_v6 }
 0x3a8   : > { %999 = vpow2.f32 %v571_v7 }
 0x3aa   : > { %v998_v8 = vpop.eup %997 }
 0x3ab   : > { %v440_v9 = vsel %vm310_vm2, %v998_v8, 0.0  ;;  %v702_v13 = vpop.xlane.xlu1 %701 }
 0x3ac   : > { %441 = vadd.xlane.f32.xlu1 %v440_v9  ;;  %v703_v14 = vsub.f32 %v699_v61, %v702_v13 }
 0x3ae   : > { %v704_v15 = vmul.f32 1.442695, %v703_v14 }
 0x3b0   : > { %1001 = vpow2.f32 %v704_v15 }
 0x3b2   : > { %v1000_v5 = vpop.eup %999 }
 0x3b3   : > { %v573_v10 = vsel %vm310_vm2, %v1000_v5, 0.0 }
 0x3b4   : > { %574 = vadd.xlane.f32.xlu0 %v573_v10 }
 0x3ba   : > { %v1002_v16 = vpop.eup %1001 }
 0x3bb   : > { %v706_v17 = vsel %vm310_vm2, %v1002_v16, 0.0 }
 0x3bd   : > { %582 = vrot.lane.b32.xlu1 %v990_v11, %s1020_s29 }
 0x3ca   : > { %449 = vrot.lane.b32.xlu0 %v991_v12, %s1019_s28 }
 0x3e1   : > { %707 = vadd.xlane.f32.xlu1 %v706_v17 }
 0x3f2   : > { %715 = vrot.lane.b32.xlu1 %v992_v18, %s1021_s30 }
 0x439   : > { %v442_v19 = vpop.xlane.xlu1 %441 }
 0x43a   : > { %1003 = vrcp.f32 %v442_v19 }
 0x43d   : > { %v583_v25 = vpop.permute.xlu1 %582 }
 0x43e   : > { %v588_v27 = vsel %vm326_vm3, %v583_v25, 0 }
 0x441   : > { %v575_v20 = vpop.xlane.xlu0 %574 }
 0x442   : > { %1005 = vrcp.f32 %v575_v20 }
 0x444   : > { %v1004_v21 = vpop.eup %1003 }
 0x445   : > { %v444_v22 = vmul.f32 %v1004_v21, %v998_v8  ;;  %v450_v23 = vpop.permute.xlu0 %449 }
 0x446   : > { %v455_v24 = vsel %vm326_vm3, %v450_v23, 0 }
 0x447   : > { %942 = vmatpush3.bf16.msra.mxu0 %v455_v24  ;;  %v445_v26 = vpack.c.bf16 %v444_v22, %v444_v22 }
 0x448   : > { %953 = vmatprep.subr.bf16.mxu0 %v1017_v0 }
 0x44a   : > { %944 = vmatmul.mubr.msk.bf16.vlgmr.msra.gmra.mrb[4].mxu0 %vm310_vm2, %v445_v26 }
 0x44b   : > { %954 = vmatpush3.bf16.msra.mxu0 %v588_v27  ;;  %955 = vmatprep.mubr.msk.bf16.mxu0 %vm1018_vm0, %v1017_v0 }
 0x44c   : > { %v1006_v28 = vpop.eup %1005  ;;  %965 = vmatprep.subr.bf16.mxu0 %v1017_v0 }
 0x44d   : > { %v577_v29 = vmul.f32 %v1006_v28, %v1000_v5 }
 0x44f   : > { %v578_v30 = vpack.c.bf16 %v577_v29, %v577_v29 }
 0x452   : > { %956 = vmatmul.mubr.msk.bf16.vlgmr.msra.gmra.mrb[8].mxu0 %vm310_vm2, %v578_v30 }
 0x453   : > { %967 = vmatprep.mubr.msk.bf16.mxu0 %vm1018_vm0, %v1017_v0 }
 0x46e   : > { %v708_v31 = vpop.xlane.xlu1 %707 }
 0x46f   : > { %1007 = vrcp.f32 %v708_v31 }
 0x472   : > { %v716_v32 = vpop.permute.xlu1 %715 }
 0x473   : > { %v721_v33 = vsel %vm326_vm3, %v716_v32, 0 }
 0x474   : > { %966 = vmatpush3.bf16.msra.mxu0 %v721_v33 }
 0x479   : > { %v1008_v34 = vpop.eup %1007 }
 0x47a   : > { %v710_v35 = vmul.f32 %v1008_v34, %v1002_v16 }
 0x47c   : > { %v711_v36 = vpack.c.bf16 %v710_v35, %v710_v35 }
 0x47e   : > { %968 = vmatmul.mubr.msk.bf16.vlgmr.msra.gmra.mrb[12].mxu0 %vm310_vm2, %v711_v36 }
 0x51d   : > { %v491_v37 = vpop.f32.mrb[4].mxu0 }
 0x51e   : > { %v904_v38 = vpack.c.bf16 %v491_v37, %v491_v37  ;;  %v945_v39 = vpop.f32.mrb[5].mxu0 }
 0x51f   : > { %v494_v40 = vpop.f32.mrb[6].mxu0 }
 0x520   : > { %501 = vrot.lane.b32.xlu0 %v904_v38, %s1021_s30  ;;  %v946_v41 = vpop.f32.mrb[7].mxu0 }
 0x525   : > { %v624_v0 = vpop.f32.mrb[8].mxu0 }
 0x526   : > { %v905_v42 = vpack.c.bf16 %v624_v0, %v624_v0  ;;  %v957_v43 = vpop.f32.mrb[9].mxu0 }
 0x527   : > { %v627_v44 = vpop.f32.mrb[10].mxu0 }
 0x528   : > { %634 = vrot.lane.b32.xlu1 %v905_v42, %s1020_s29  ;;  %v958_v45 = vpop.f32.mrb[11].mxu0 }
 0x551   : > { %v757_v46 = vpop.f32.mrb[12].mxu0 }
 0x552   : > { %v906_v47 = vpack.c.bf16 %v757_v46, %v757_v46  ;;  %v969_v48 = vpop.f32.mrb[13].mxu0 }
 0x553   : > { %v760_v49 = vpop.f32.mrb[14].mxu0 }
 0x554   : > { %767 = vrot.lane.b32.xlu0 %v906_v47, %s1019_s28  ;;  %v970_v50 = vpop.f32.mrb[15].mxu0 }
 0x592   : > { %v502_v51 = vpop.permute.xlu0 %501 }
 0x593   : > { %505 = vst.msk [vmem:[%s1131_s10] sm:$0xf] %vm504_vm5, %v502_v51 }
 0x59a   : > { %v635_v52 = vpop.permute.xlu1 %634 }
 0x59b   : > { %638 = vst.msk [vmem:[%s1131_s10] sm:$0xf] %vm637_vm6, %v635_v52 }
 0x5c6   : > { %v768_v53 = vpop.permute.xlu0 %767 }
 0x5c7   : > { %771 = vst.msk [vmem:[%s1131_s10] sm:$0xf] %vm770_vm7, %v768_v53 }
 0x5c8 PF: > { %s14_s15 = sadd.s32 1, %s1015_s15  }
 0x5c9   : > { %p11_p4 = scmp.ge.s32.totalorder %s14_s15, 4  }
 0x5cb   :  { %13 = sbr.rel (!%p11_p4) target bundleno = 1 (0x1), region = 75 }

// kernel: transformer_forward.77
= control target key start
LH: loop header
LB: loop body
LE: loop exit
PB: predicated region body
PF: predicated region fallthrough
CT: control target
= control target key end

     0   :  { %8 = vsyncpa [#allocation5], 0  ;;  %s988_s0 = inlined_call_operand.vmem [shape: bf16[16,128], index: 0, kind: input, shape index: {}]   ;;  %s989_s1 = inlined_call_operand.vmem [shape: bf16[128,384], index: 1, kind: input, shape index: {}]   ;;  %s990_s2 = inlined_call_operand.vmem [shape: f32[1,384], index: 2, kind: input, shape index: {}]   ;;  %s991_s3 = inlined_call_operand.hbm [shape: f32[16,384], index: 3, kind: output, shape index: {}]  }
   0x1   :  { %10 = vsyncpa [#allocation5 + $0x1], 0  ;;  %s841_s12 = smov 0   ;;  %s843_s13 = smov 0  }
   0x2   :  { %s845_s14 = smov 0   ;;  %s847_s15 = smov 0  }
   0x3   :  { %s849_s16 = smov 0   ;;  %s851_s17 = smov 0  }
   0x4 LB: > { %s613_s18 = sadd.s32 4294967295, %s813_s17   ;;  %s614_s19 = sadd.s32 4294967294, %s813_s17   ;;  %s813_s17 = sphi %s851_s17, %s16_s17   ;;  %s809_s16 = sphi %s849_s16, %s998_s16   ;;  %s805_s15 = sphi %s847_s15, %s997_s15   ;;  %s801_s14 = sphi %s845_s14, %s996_s14   ;;  %s797_s13 = sphi %s843_s13, %s995_s13   ;;  %s793_s12 = sphi %s841_s12, %s994_s12  }
   0x5   : > { %s31_s20 = sadd.s32 1, %s809_s16  ;;  %s72_s21 = sadd.s32 1, %s801_s14 }
   0x6   : > { %p33_p0 = scmp.ge.s32.totalorder %s31_s20, 3  ;;  %p79_p1 = scmp.ne.s32.totalorder %s801_s14, %s797_s13 }
   0x7   : > { %p80_p2 = scmp.eq.s32.totalorder %s813_s17, 0  ;;  %p137_p3 = scmp.eq.s32.totalorder %s613_s18, 2 }
   0x8   : > { %s1000_s20 = smov (%p33_p0, %s31_s20), 0  ;;  %p142_p6 = scmp.ne.s32.totalorder %s797_s13, %s793_s12 }
   0x9   : > { %p81_p4 = por %p80_p2, %p79_p1  ;;  %p880_p5 = por %p137_p3, %p79_p1 }
   0xa   : > { %s68_s23 = ssub.s32 %s809_s16, %s1000_s20  ;;  %p143_p8 = scmp.eq.s32.totalorder %s614_s19, 2 }
   0xb   : > { %p70_p7 = scmp.eq.s32.totalorder %s68_s23, 0  ;;  %p617_p10 = scmp.ge.s32.totalorder %s813_s17, 3 }
   0xc   : > { %p891_p9 = por %p143_p8, %p142_p6 }
   0xd   : > { %s889_s24 = scalar_select %p70_p7, %s801_s14, %s72_s21  }
   0xe   : > { %171 = sbr.rel (%p617_p10) target bundleno = 35 (0x23), region = 20 }
  0x15   : > { %174 = sbr.rel (!%p81_p4) target bundleno = 35 (0x23), region = 24  ;;  %s176_s26 = sand.u32 (%p81_p4), 1, %s801_s14  }
  0x16   : > { %s619_s27 = sshll.u32 (%p81_p4), %s809_s16, 2  ;;  %s618_s28 = sshll.u32 (%p81_p4), %s176_s26, 6 }
  0x17   : > { %s901_s4 = scalar_lea.vmem (%p81_p4), %s989_s1, %s619_s27  ;;  %s178_s5 = scalar_lea.vmem (%p81_p4), [#allocation3], %s618_s28 }
  0x18   : > { %v199_v0 = vld [vmem:[%s901_s4] sm:$0xf] (%p81_p4)  ;;  %v201_v1 = vld [vmem:[%s901_s4 + $0xc] sm:$0xf] (%p81_p4)  ;;  %v203_v2 = vld [vmem:[%s901_s4 + $0x18] sm:$0xf] (%p81_p4) }
  0x19   : > { %200 = vst [vmem:[%s178_s5] sm:$0xf] (%p81_p4), %v199_v0  ;;  %202 = vst [vmem:[%s178_s5 + $0x4] sm:$0xf] (%p81_p4), %v201_v1  ;;  %v205_v3 = vld [vmem:[%s901_s4 + $0x24] sm:$0xf] (%p81_p4) }
  0x1a   : > { %v207_v4 = vld [vmem:[%s901_s4 + $0x30] sm:$0xf] (%p81_p4)  ;;  %204 = vst [vmem:[%s178_s5 + $0x8] sm:$0xf] (%p81_p4), %v203_v2  ;;  %206 = vst [vmem:[%s178_s5 + $0xc] sm:$0xf] (%p81_p4), %v205_v3 }
  0x1b   : > { %208 = vst [vmem:[%s178_s5 + $0x10] sm:$0xf] (%p81_p4), %v207_v4  ;;  %v209_v5 = vld [vmem:[%s901_s4 + $0x3c] sm:$0xf] (%p81_p4)  ;;  %v211_v6 = vld [vmem:[%s901_s4 + $0x48] sm:$0xf] (%p81_p4) }
  0x1c   : > { %v213_v7 = vld [vmem:[%s901_s4 + $0x54] sm:$0xf]  ;;  %210 = vst [vmem:[%s178_s5 + $0x14] sm:$0xf] %v209_v5  ;;  %212 = vst [vmem:[%s178_s5 + $0x18] sm:$0xf] %v211_v6 }
  0x1d   : > { %214 = vst [vmem:[%s178_s5 + $0x1c] sm:$0xf] %v213_v7  ;;  %v215_v8 = vld [vmem:[%s901_s4 + $0x60] sm:$0xf]  ;;  %v217_v9 = vld [vmem:[%s901_s4 + $0x6c] sm:$0xf] }
  0x1e   : > { %v219_v10 = vld [vmem:[%s901_s4 + $0x78] sm:$0xf]  ;;  %216 = vst [vmem:[%s178_s5 + $0x20] sm:$0xf] %v215_v8  ;;  %218 = vst [vmem:[%s178_s5 + $0x24] sm:$0xf] %v217_v9 }
  0x1f   : > { %220 = vst [vmem:[%s178_s5 + $0x28] sm:$0xf] %v219_v10  ;;  %v221_v11 = vld [vmem:[%s901_s4 + $0x84] sm:$0xf]  ;;  %v223_v12 = vld [vmem:[%s901_s4 + $0x90] sm:$0xf] }
  0x20   : > { %v225_v13 = vld [vmem:[%s901_s4 + $0x9c] sm:$0xf]  ;;  %222 = vst [vmem:[%s178_s5 + $0x2c] sm:$0xf] %v221_v11  ;;  %224 = vst [vmem:[%s178_s5 + $0x30] sm:$0xf] %v223_v12 }
  0x21   : > { %226 = vst [vmem:[%s178_s5 + $0x34] sm:$0xf] %v225_v13  ;;  %v227_v14 = vld [vmem:[%s901_s4 + $0xa8] sm:$0xf]  ;;  %v229_v15 = vld [vmem:[%s901_s4 + $0xb4] sm:$0xf] }
  0x22   : > { %228 = vst [vmem:[%s178_s5 + $0x38] sm:$0xf] %v227_v14  ;;  %230 = vst [vmem:[%s178_s5 + $0x3c] sm:$0xf] %v229_v15 }
  0x23 PF: > { %p620_p11 = scmp.ge.s32.totalorder %s813_s17, 1  ;;  %p290_p12 = scmp.lt.s32.totalorder %s813_s17, 4 }
  0x25   : > { %p291_p13 = pnand %p620_p11, %p290_p12 }
  0x26   : > { %s922_s6 = sand.u32 (!%p291_p13), 1, %s797_s13   ;;  %v815_v16 = vmov (!%p291_p13), 0.0   ;;  %vm816_vm0 = vmmov (!%p291_p13), 0   ;;  %v734_v25 = vld [vmem:[%s988_s0] sm:$0xff] (!%p291_p13)   ;;  %p341_p0 = scmp.lt.s32.totalorder (!%p291_p13), %s805_s15, 2 }
  0x27   : > { %294 = sbr.rel (%p291_p13) target bundleno = 305 (0x131), region = 69  ;;  %646 = vmatprep.subr.bf16.mxu0 (!%p291_p13), %v815_v16  ;;  %s621_s7 = sshll.u32 (!%p291_p13), %s922_s6, 6  ;;  %662 = vmatprep.mubr.msk.bf16.mxu0 (!%p291_p13), %vm816_vm0, %v815_v16 }
  0x28   : > { %s299_s8 = scalar_lea.vmem (!%p291_p13), [#allocation3], %s621_s7  ;;  %s622_s18 = sshll.u32 (!%p291_p13), %s922_s6, 4 }
  0x29   : > { %v726_v17 = vld [vmem:[%s299_s8] sm:$0xff] (!%p291_p13)   ;;  %v727_v18 = vld [vmem:[%s299_s8 + $0x8] sm:$0xff] (!%p291_p13)   ;;  %v728_v19 = vld [vmem:[%s299_s8 + $0x10] sm:$0xff] (!%p291_p13)   ;;  %s330_s26 = scalar_lea.vmem (!%p291_p13), [#allocation4], %s622_s18  ;;  %s634_s28 = sshll.u32 (!%p291_p13), %s805_s15, 7 }
  0x2a   : > { %647 = vmatpush3.bf16.msra.mxu0 (!%p291_p13), %v726_v17  ;;  %v729_v20 = vld [vmem:[%s299_s8 + $0x18] sm:$0xff] (!%p291_p13)   ;;  %v730_v21 = vld [vmem:[%s299_s8 + $0x20] sm:$0xff] (!%p291_p13)   ;;  %v731_v22 = vld [vmem:[%s299_s8 + $0x28] sm:$0xff] (!%p291_p13)   ;;  %s503_s27 = sshll.u32 (!%p291_p13), %s330_s26, 4  ;;  %s940_s4 = scalar_lea.hbm (!%p291_p13), %s991_s3, %s634_s28  ;;  %s935_s27 = int_to_ptr.vmem [resolvable:$true] %s503_s27 }
  0x2b   : > { %648 = vmatprep.subr.bf16.mxu0 (!%p291_p13), %v815_v16  ;;  %v732_v23 = vld [vmem:[%s299_s8 + $0x30] sm:$0xff] (!%p291_p13)   ;;  %v733_v24 = vld [vmem:[%s299_s8 + $0x38] sm:$0xff] (!%p291_p13)   ;;  %s488_s5 = scalar_lea.sflag (!%p291_p13), [#allocation5], %s922_s6  ;;  %s817_s7 = smov (!%p291_p13), [#allocation4]  }
  0x2c   : > { %s739_s8 = sshll.u32 (!%p291_p13), %s817_s7, 4  ;;  %s740_s8 = int_to_ptr.vmem [resolvable:$false] %s739_s8 }
  0x2d   : > { %s741_s9 = scalar_lea.vmem (!%p291_p13), %s740_s8, 512  ;;  %p742_p4 = scmp.lt.s32.totalorder (!%p291_p13), %s935_s27, %s740_s8 }
  0x2e   : > { %649 = vmatpush3.bf16.msra.mxu0 %v727_v18  ;;  %s342_s11 = scalar_select %p341_p0, %s805_s15, 2 }
  0x2f   : > { %650 = vmatprep.subr.bf16.mxu0 %v815_v16  ;;  %s735_s15 = scalar_lea.vmem %s935_s27, 256 }
  0x30   : > { %s343_s23 = scalar_lea.vmem %s990_s2, %s342_s11  ;;  %p736_p1 = scmp.ne.s32.totalorder %s935_s27, %s735_s15 }
  0x31   : > { %v632_v26 = vld [vmem:[%s343_s23] ss:$0 sm:$0xff]  ;;  %p743_p6 = scmp.lt.s32.totalorder %s741_s9, %s735_s15 }
  0x32   : > { %651 = vmatpush3.bf16.msra.mxu0 %v728_v19  ;;  %p737_p2 = pnand %p736_p1, %p880_p5 }
  0x33   : > { %652 = vmatprep.subr.bf16.mxu0 %v815_v16  ;;  %p744_p7 = por %p743_p6, %p742_p4 }
  0x34   : > { %p738_p3 = pneg %p737_p2 }
  0x36   : > { %653 = vmatpush3.bf16.msra.mxu0 %v729_v20  ;;  %p745_p8 = pnand %p744_p7, %p738_p3 }
  0x37   : > { %654 = vmatprep.subr.bf16.mxu0 %v815_v16 }
  0x3a   : > { %655 = vmatpush3.bf16.msra.mxu0 %v730_v21 }
  0x3b   : > { %656 = vmatprep.subr.bf16.mxu0 %v815_v16 }
  0x3e   : > { %657 = vmatpush3.bf16.msra.mxu0 %v731_v22 }
  0x3f   : > { %658 = vmatprep.subr.bf16.mxu0 %v815_v16 }
  0x42   : > { %659 = vmatpush3.bf16.msra.mxu0 %v732_v23 }
  0x43   : > { %660 = vmatprep.subr.bf16.mxu0 %v815_v16 }
  0x46   : > { %661 = vmatpush3.bf16.msra.mxu0 %v733_v24 }
  0x49   : > { %663 = vmatmul.mubr.bf16.vlgmr.msra.gmra.mrb[0].mxu0 %v734_v25 }
 0x11c   : > { %v460_v27 = vpop.f32.mrb[0].mxu0 }
 0x11d   : > { %v483_v28 = vadd.f32 %v632_v26, %v460_v27  ;;  %v664_v29 = vpop.f32.mrb[1].mxu0 }
 0x11e   : > { %v463_v30 = vpop.f32.mrb[2].mxu0 }
 0x11f   : > { %485 = vst [vmem:[%s330_s26] sm:$0xff] %v483_v28  ;;  %v484_v31 = vadd.f32 %v632_v26, %v463_v30  ;;  %v665_v32 = vpop.f32.mrb[3].mxu0 }
 0x121   : > { %486 = vst [vmem:[%s330_s26 + $0x8] sm:$0xff] %v484_v31 }
 0x122   : > { %748 = shalt.err (!%p745_p8)
}
 0x123   : > { %s749_s10 = scalar_lea.hbm %s940_s4, 256  ;;  %s753_s19 = scalar_lea.hbm %s991_s3, 768 }
 0x124   : > { %p750_p10 = scmp.ne.s32.totalorder %s940_s4, %s749_s10  ;;  %p754_p13 = scmp.lt.u32.totalorder %s940_s4, %s991_s3 }
 0x125   : > { %p755_p0 = scmp.lt.u32.totalorder %s753_s19, %s749_s10  ;;  %p757_p2 = scmp.lt.u32.totalorder %s749_s10, %s940_s4 }
 0x126   : > { %p751_p11 = pnand %p750_p10, %p880_p5 }
 0x127   : > { %p756_p1 = por %p755_p0, %p754_p13 }
 0x128   : > { %p752_p12 = pneg %p751_p11 }
 0x129   : > { %p758_p3 = por %p757_p2, %p756_p1 }
 0x12b   : > { %p759_p4 = pnand %p758_p3, %p752_p12 }
 0x12d   : > { %762 = shalt.err (!%p759_p4)
}
 0x12e   : > { %s818_s26 = smov 128   ;;  %s819_s28 = smov 384  }
 0x12f   : > { %s820_s29 = smov 8  }
 0x130   : > { %666 = dma.vmem_to_hbm [thread:$0]  (%p880_p5), %s935_s27, 256, %s940_s4, %s488_s5, %s818_s26, %s819_s28, %s820_s29  }
 0x131 PF: > { %p672_p6 = scmp.ge.s32.totalorder %s813_s17, 2  ;;  %s518_s30 = sand.u32 1, %s793_s12  }
 0x132   : > { %s519_s15 = scalar_lea.sflag [#allocation5], %s518_s30 }
 0x133   : > { %p669_p7 = pnand %p672_p6, %p891_p9 }
 0x135   : > { %788 = dma.done.wait (!%p669_p7), %s519_s15, 256  }
 0x136   : > { %790 = vsyncadd (!%p669_p7), %s519_s15, 4294967040  ;;  %s16_s17 = sadd.s32 1, %s813_s17   ;;  %s994_s12 = smov %s797_s13 }
 0x137   : > { %p13_p8 = scmp.ge.s32.totalorder %s16_s17, 5   ;;  %s995_s13 = smov %s801_s14 }
 0x138   : > { %s996_s14 = smov %s889_s24  ;;  %s997_s15 = smov %s809_s16 }
 0x139   : > { %s998_s16 = smov %s1000_s20  ;;  %15 = sbr.rel (!%p13_p8) target bundleno = 4 (0x4), region = 127 }
 0x140   :  { %524 = vsyncpa [#allocation5], 1 }
 0x141   :  { %526 = vsyncpa [#allocation5 + $0x1], 1 }

// kernel: transformer_forward.54
= control target key start
LH: loop header
LB: loop body
LE: loop exit
PB: predicated region body
PF: predicated region fallthrough
CT: control target
= control target key end

     0   :  { %s1067_s15 = smov 0   ;;  %s1194_s0 = inlined_call_operand.vmem [shape: bf16[2,8,384], index: 0, kind: input, shape index: {}, may-alias: {0,1,2}]   ;;  %s1195_s1 = inlined_call_operand.vmem [shape: bf16[2,8,384], index: 1, kind: input, shape index: {}, may-alias: {0,1,2}]   ;;  %s1196_s2 = inlined_call_operand.vmem [shape: bf16[2,8,384], index: 2, kind: input, shape index: {}, may-alias: {0,1,2}]   ;;  %s1197_s3 = inlined_call_operand.vmem [shape: f32[2,1,8], index: 3, kind: input, shape index: {}]   ;;  %s1198_s4 = inlined_call_operand.vmem [shape: bf16[2,8,128], index: 4, kind: output, shape index: {}]  }
   0x1 LB: > { %s883_s16 = sadd.s32 4294967295, %s1035_s15   ;;  %p887_p0 = scmp.ge.s32.totalorder %s1035_s15, 1  ;;  %s1035_s15 = sphi %s1067_s15, %s14_s15  }
   0x2   : > { %p192_p1 = scmp.lt.s32.totalorder %s1035_s15, 3 }
   0x4   : > { %p193_p2 = pnand %p887_p0, %p192_p1 }
   0x5   : > { %p232_p3 = scmp.lt.s32.totalorder (!%p193_p2), %s883_s16, 1  ;;  %v1037_v0 = vmov (!%p193_p2), 0.0   ;;  %vm1038_vm0 = vmmov (!%p193_p2), 0   ;;  %vm274_vm1 = vcmask (!%p193_p2), 261120   ;;  %v258_v4 = vlaneseq (!%p193_p2)  ;;  %s1039_s27 = smov (!%p193_p2), 96  }
   0x6   : > { %196 = sbr.rel (%p193_p2) target bundleno = 1481 (0x5c9), region = 36  ;;  %942 = vmatprep.subr.bf16.mxu0 (!%p193_p2), %v1037_v0  ;;  %944 = vmatprep.mubr.msk.bf16.mxu0 (!%p193_p2), %vm1038_vm0, %v1037_v0  ;;  %vm323_vm3 = vcmask (!%p193_p2), 64512   ;;  %s1040_s28 = smov (!%p193_p2), 64   ;;  %vm339_vm4 = vcmask (!%p193_p2), 1043456   ;;  %vm384_vm5 = vcmask (!%p193_p2), 257024   ;;  %vm517_vm6 = vcmask (!%p193_p2), 519424  }
   0x7   : > { %948 = vmatprep.subr.bf16.mxu1 (!%p193_p2), %v1037_v0  ;;  %950 = vmatprep.mubr.msk.bf16.mxu1 (!%p193_p2), %vm1038_vm0, %v1037_v0  ;;  %v259_v5 = vshrl.u32 (!%p193_p2), %v258_v4, 7  ;;  %v261_v6 = vand.u32 (!%p193_p2), 127, %v258_v4  ;;  %s1041_s29 = smov (!%p193_p2), 32   ;;  %vm650_vm7 = vcmask (!%p193_p2), 781824   ;;  %vm783_vm8 = vcmask (!%p193_p2), 1044224  }
   0x9   : > { %vm262_vm2 = vcmp.gt.s32.totalorder (!%p193_p2), %v261_v6, %v259_v5 }
   0xa   : > { %v263_v8 = vsel (!%p193_p2), %vm262_vm2, -1e+09, %v1037_v0 }
   0xd   : > { %s1200_s16 = smov (!%p232_p3, %s883_s16), 1 }
   0xe   : > { %s1084_s17 = smul.u32 12, %s1200_s16  ;;  %s251_s26 = scalar_lea.vmem %s1197_s3, %s1200_s16 }
   0xf   : > { %v892_v7 = vld [vmem:[%s251_s26] ss:$0 sm:$0xff]  ;;  %s891_s7 = sshll.u32 %s1200_s16, 2 }
  0x10   : > { %s1090_s20 = scalar_lea.vmem %s1195_s1, %s1084_s17  ;;  %s1097_s23 = scalar_lea.vmem %s1194_s0, %s1084_s17  ;;  %v1110_v9 = vadd.f32 %v892_v7, %v263_v8 }
  0x11   : > { %v893_v1 = vld [vmem:[%s1090_s20 + $0x4] sm:$0xf]  ;;  %v271_v3 = vld [vmem:[%s1097_s23] sm:$0xf]  ;;  %s1129_s6 = scalar_lea.vmem %s1196_s2, %s1084_s17  ;;  %s1155_s10 = scalar_lea.vmem %s1198_s4, %s891_s7 }
  0x12   : > { %v279_v2 = vsel %vm274_vm1, %v893_v1, 0  ;;  %v1004_v17 = vld [vmem:[%s1090_s20 + $0x4] ss:$0 sps:$4 sm:$0xff]   ;;  %v1005_v18 = vld [vmem:[%s1097_s23] ss:$0 sps:$4 sm:$0xff]  }
  0x13   : > { %943 = vmatpush3.bf16.xpose.msra.mxu0 %v279_v2  ;;  %397 = vrot.lane.b32.xlu1 %v1004_v17, %s1039_s27  ;;  %v1007_v19 = vld [vmem:[%s1097_s23] ss:$0 sps:$4 sm:$0xff]   ;;  %v1008_v20 = vld [vmem:[%s1090_s20 + $0x4] ss:$0 sps:$4 sm:$0xff]   ;;  %v894_v27 = vld [vmem:[%s1129_s6 + $0x8] sm:$0xf] }
  0x14   : > { %960 = vmatprep.subr.bf16.mxu0 %v1037_v0  ;;  %v1009_v21 = vld [vmem:[%s1097_s23] ss:$0 sps:$4 sm:$0xff]   ;;  %v341_v28 = vsel %vm339_vm4, %v894_v27, 0  ;;  %v1006_v29 = vld [vmem:[%s1090_s20 + $0x4] ss:$0 sps:$4 sm:$0xff]  }
  0x15   : > { %949 = vmatpush3.bf16.msra.mxu1 %v341_v28  ;;  %v1011_v17 = vld [vmem:[%s1129_s6 + $0x8] ss:$0 sps:$4 sm:$0xff]  }
  0x16   : > { %954 = vmatprep.subr.bf16.mxu1 %v1037_v0 }
  0x17   : > { %392 = vrot.lane.b32.xlu1 %v1005_v18, %s1039_s27 }
  0x1a   : > { %945 = vmatmul.mubr.msk.bf16.vlgmr.msra.gmra.mrb[0].mxu0 %vm274_vm1, %v271_v3 }
  0x1b   : > { %962 = vmatprep.mubr.msk.bf16.mxu0 %vm1038_vm0, %v1037_v0  ;;  %525 = vrot.lane.b32.xlu1 %v1007_v19, %s1040_s28 }
  0x1f   : > { %663 = vrot.lane.b32.xlu1 %v1008_v20, %s1041_s29 }
  0x23   : > { %658 = vrot.lane.b32.xlu1 %v1009_v21, %s1041_s29 }
  0x85   : > { %v398_v32 = vpop.permute.xlu1 %397 }
  0x86   : > { %v403_v34 = vsel %vm274_vm1, %v398_v32, 0 }
  0x89   : > { %v393_v36 = vpop.permute.xlu1 %392 }
  0x8d   : > { %v526_v38 = vpop.permute.xlu1 %525 }
  0x91   : > { %v664_v40 = vpop.permute.xlu1 %663 }
  0x92   : > { %v669_v41 = vsel %vm274_vm1, %v664_v40, 0 }
  0x95   : > { %v659_v42 = vpop.permute.xlu1 %658 }
  0xed   : > { %v315_v10 = vpop.f32.mrb[0].mxu0 }
  0xee   : > { %v321_v11 = vmul.f32 0.17677669, %v315_v10  ;;  %v946_v12 = vpop.f32.mrb[1].mxu0 }
  0xef   : > { %v318_v13 = vpop.f32.mrb[2].mxu0 }
  0xf0   : > { %v947_v14 = vpop.f32.mrb[3].mxu0  ;;  %v322_v15 = vadd.f32 %v321_v11, %v1110_v9 }
  0xf2   : > { %v324_v16 = vsel %vm323_vm3, %v322_v15, -inf }
  0xf3   : > { %325 = vmax.xlane.f32.xlu0 %v324_v16  ;;  %v1010_v16 = vld [vmem:[%s1129_s6 + $0x8] ss:$0 sps:$4 sm:$0xff]  }
 0x180   : > { %v326_v22 = vpop.xlane.xlu0 %325 }
 0x181   : > { %v327_v23 = vsub.f32 %v322_v15, %v326_v22 }
 0x183   : > { %v328_v24 = vmul.f32 1.442695, %v327_v23  ;;  %v1012_v23 = vld [vmem:[%s1129_s6 + $0x8] ss:$0 sps:$4 sm:$0xff]  }
 0x185   : > { %1013 = vpow2.f32 %v328_v24 }
 0x18f   : > { %v1014_v25 = vpop.eup %1013 }
 0x190   : > { %v330_v26 = vsel %vm323_vm3, %v1014_v25, 0.0 }
 0x191   : > { %331 = vadd.xlane.f32.xlu0 %v330_v26 }
 0x1a7   : > { %530 = vrot.lane.b32.xlu0 %v1006_v29, %s1040_s28 }
 0x21e   : > { %v332_v30 = vpop.xlane.xlu0 %331 }
 0x21f   : > { %1015 = vrcp.f32 %v332_v30 }
 0x222   : > { %v531_v37 = vpop.permute.xlu0 %530 }
 0x223   : > { %v536_v39 = vsel %vm274_vm1, %v531_v37, 0 }
 0x229   : > { %v1016_v31 = vpop.eup %1015 }
 0x22a   : > { %v334_v33 = vmul.f32 %v1016_v31, %v1014_v25 }
 0x22c   : > { %v335_v35 = vpack.c.bf16 %v334_v33, %v334_v33 }
 0x22e   : > { %951 = vmatmul.mubr.msk.bf16.vlgmr.msra.gmra.mrb[0].mxu1 %vm323_vm3, %v335_v35 }
 0x22f   : > { %955 = vmatpush3.bf16.xpose.msra.mxu1 %v403_v34  ;;  %956 = vmatprep.mubr.msk.bf16.mxu1 %vm1038_vm0, %v1037_v0 }
 0x230   : > { %966 = vmatprep.subr.bf16.mxu1 %v1037_v0 }
 0x236   : > { %957 = vmatmul.mubr.msk.bf16.vlgmr.msra.gmra.mrb[4].mxu1 %vm274_vm1, %v393_v36 }
 0x237   : > { %967 = vmatpush3.bf16.xpose.msra.mxu1 %v536_v39  ;;  %968 = vmatprep.mubr.msk.bf16.mxu1 %vm1038_vm0, %v1037_v0 }
 0x238   : > { %978 = vmatprep.subr.bf16.mxu1 %v1037_v0 }
 0x23e   : > { %969 = vmatmul.mubr.msk.bf16.vlgmr.msra.gmra.mrb[8].mxu1 %vm274_vm1, %v526_v38 }
 0x23f   : > { %979 = vmatpush3.bf16.xpose.msra.mxu1 %v669_v41  ;;  %980 = vmatprep.mubr.msk.bf16.mxu1 %vm1038_vm0, %v1037_v0 }
 0x246   : > { %981 = vmatmul.mubr.msk.bf16.vlgmr.msra.gmra.mrb[12].mxu1 %vm274_vm1, %v659_v42 }
 0x301   : > { %v377_v43 = vpop.f32.mrb[0].mxu1 }
 0x302   : > { %v383_v44 = vpack.c.bf16 %v377_v43, %v377_v43  ;;  %v952_v45 = vpop.f32.mrb[1].mxu1 }
 0x303   : > { %v380_v46 = vpop.f32.mrb[2].mxu1 }
 0x304   : > { %385 = vst.msk [vmem:[%s1155_s10] sm:$0xf] %vm384_vm5, %v383_v44  ;;  %v953_v47 = vpop.f32.mrb[3].mxu1 }
 0x309   : > { %v439_v48 = vpop.f32.mrb[4].mxu1 }
 0x30a   : > { %v445_v49 = vmul.f32 0.17677669, %v439_v48  ;;  %v958_v50 = vpop.f32.mrb[5].mxu1 }
 0x30b   : > { %v442_v51 = vpop.f32.mrb[6].mxu1 }
 0x30c   : > { %v959_v52 = vpop.f32.mrb[7].mxu1  ;;  %v446_v53 = vadd.f32 %v445_v49, %v1110_v9 }
 0x30e   : > { %v447_v54 = vsel %vm323_vm3, %v446_v53, -inf }
 0x30f   : > { %448 = vmax.xlane.f32.xlu1 %v447_v54 }
 0x311   : > { %v572_v55 = vpop.f32.mrb[8].mxu1 }
 0x312   : > { %v578_v56 = vmul.f32 0.17677669, %v572_v55  ;;  %v970_v57 = vpop.f32.mrb[9].mxu1 }
 0x313   : > { %v575_v58 = vpop.f32.mrb[10].mxu1 }
 0x314   : > { %v579_v59 = vadd.f32 %v578_v56, %v1110_v9  ;;  %v971_v60 = vpop.f32.mrb[11].mxu1 }
 0x316   : > { %v580_v61 = vsel %vm323_vm3, %v579_v59, -inf }
 0x317   : > { %581 = vmax.xlane.f32.xlu0 %v580_v61 }
 0x319   : > { %v705_v62 = vpop.f32.mrb[12].mxu1 }
 0x31a   : > { %v711_v63 = vmul.f32 0.17677669, %v705_v62  ;;  %v982_v1 = vpop.f32.mrb[13].mxu1 }
 0x31b   : > { %v708_v2 = vpop.f32.mrb[14].mxu1 }
 0x31c   : > { %v712_v3 = vadd.f32 %v711_v63, %v1110_v9  ;;  %v983_v4 = vpop.f32.mrb[15].mxu1 }
 0x31e   : > { %v713_v5 = vsel %vm323_vm3, %v712_v3, -inf }
 0x31f   : > { %714 = vmax.xlane.f32.xlu1 %v713_v5 }
 0x39c   : > { %v449_v6 = vpop.xlane.xlu1 %448 }
 0x39d   : > { %v450_v7 = vsub.f32 %v446_v53, %v449_v6 }
 0x39f   : > { %v451_v8 = vmul.f32 1.442695, %v450_v7 }
 0x3a1   : > { %1017 = vpow2.f32 %v451_v8 }
 0x3a4   : > { %v582_v10 = vpop.xlane.xlu0 %581 }
 0x3a5   : > { %v583_v11 = vsub.f32 %v579_v59, %v582_v10 }
 0x3a7   : > { %v584_v12 = vmul.f32 1.442695, %v583_v11 }
 0x3a9   : > { %1019 = vpow2.f32 %v584_v12 }
 0x3ab   : > { %v1018_v13 = vpop.eup %1017 }
 0x3ac   : > { %v453_v14 = vsel %vm323_vm3, %v1018_v13, 0.0  ;;  %v715_v18 = vpop.xlane.xlu1 %714 }
 0x3ad   : > { %454 = vadd.xlane.f32.xlu1 %v453_v14  ;;  %v716_v19 = vsub.f32 %v712_v3, %v715_v18 }
 0x3af   : > { %v717_v20 = vmul.f32 1.442695, %v716_v19 }
 0x3b1   : > { %1021 = vpow2.f32 %v717_v20 }
 0x3b3   : > { %v1020_v9 = vpop.eup %1019 }
 0x3b4   : > { %v586_v15 = vsel %vm323_vm3, %v1020_v9, 0.0 }
 0x3b5   : > { %587 = vadd.xlane.f32.xlu0 %v586_v15 }
 0x3bb   : > { %v1022_v21 = vpop.eup %1021 }
 0x3bc   : > { %v719_v22 = vsel %vm323_vm3, %v1022_v21, 0.0 }
 0x3be   : > { %595 = vrot.lane.b32.xlu1 %v1010_v16, %s1040_s28 }
 0x3cb   : > { %462 = vrot.lane.b32.xlu0 %v1011_v17, %s1039_s27 }
 0x3e2   : > { %720 = vadd.xlane.f32.xlu1 %v719_v22 }
 0x3f3   : > { %728 = vrot.lane.b32.xlu1 %v1012_v23, %s1041_s29 }
 0x43a   : > { %v455_v24 = vpop.xlane.xlu1 %454 }
 0x43b   : > { %1023 = vrcp.f32 %v455_v24 }
 0x43e   : > { %v596_v30 = vpop.permute.xlu1 %595 }
 0x43f   : > { %v601_v32 = vsel %vm339_vm4, %v596_v30, 0 }
 0x442   : > { %v588_v25 = vpop.xlane.xlu0 %587 }
 0x443   : > { %1025 = vrcp.f32 %v588_v25 }
 0x445   : > { %v1024_v26 = vpop.eup %1023 }
 0x446   : > { %v457_v27 = vmul.f32 %v1024_v26, %v1018_v13  ;;  %v463_v28 = vpop.permute.xlu0 %462 }
 0x447   : > { %v468_v29 = vsel %vm339_vm4, %v463_v28, 0 }
 0x448   : > { %961 = vmatpush3.bf16.msra.mxu0 %v468_v29  ;;  %v458_v31 = vpack.c.bf16 %v457_v27, %v457_v27 }
 0x449   : > { %972 = vmatprep.subr.bf16.mxu0 %v1037_v0 }
 0x44b   : > { %963 = vmatmul.mubr.msk.bf16.vlgmr.msra.gmra.mrb[4].mxu0 %vm323_vm3, %v458_v31 }
 0x44c   : > { %973 = vmatpush3.bf16.msra.mxu0 %v601_v32  ;;  %974 = vmatprep.mubr.msk.bf16.mxu0 %vm1038_vm0, %v1037_v0 }
 0x44d   : > { %v1026_v33 = vpop.eup %1025  ;;  %984 = vmatprep.subr.bf16.mxu0 %v1037_v0 }
 0x44e   : > { %v590_v34 = vmul.f32 %v1026_v33, %v1020_v9 }
 0x450   : > { %v591_v35 = vpack.c.bf16 %v590_v34, %v590_v34 }
 0x453   : > { %975 = vmatmul.mubr.msk.bf16.vlgmr.msra.gmra.mrb[8].mxu0 %vm323_vm3, %v591_v35 }
 0x454   : > { %986 = vmatprep.mubr.msk.bf16.mxu0 %vm1038_vm0, %v1037_v0 }
 0x46f   : > { %v721_v36 = vpop.xlane.xlu1 %720 }
 0x470   : > { %1027 = vrcp.f32 %v721_v36 }
 0x473   : > { %v729_v37 = vpop.permute.xlu1 %728 }
 0x474   : > { %v734_v38 = vsel %vm339_vm4, %v729_v37, 0 }
 0x475   : > { %985 = vmatpush3.bf16.msra.mxu0 %v734_v38 }
 0x47a   : > { %v1028_v39 = vpop.eup %1027 }
 0x47b   : > { %v723_v40 = vmul.f32 %v1028_v39, %v1022_v21 }
 0x47d   : > { %v724_v41 = vpack.c.bf16 %v723_v40, %v723_v40 }
 0x47f   : > { %987 = vmatmul.mubr.msk.bf16.vlgmr.msra.gmra.mrb[12].mxu0 %vm323_vm3, %v724_v41 }
 0x51e   : > { %v504_v42 = vpop.f32.mrb[4].mxu0 }
 0x51f   : > { %v923_v43 = vpack.c.bf16 %v504_v42, %v504_v42  ;;  %v964_v44 = vpop.f32.mrb[5].mxu0 }
 0x520   : > { %v507_v45 = vpop.f32.mrb[6].mxu0 }
 0x521   : > { %514 = vrot.lane.b32.xlu0 %v923_v43, %s1041_s29  ;;  %v965_v46 = vpop.f32.mrb[7].mxu0 }
 0x526   : > { %v637_v0 = vpop.f32.mrb[8].mxu0 }
 0x527   : > { %v924_v47 = vpack.c.bf16 %v637_v0, %v637_v0  ;;  %v976_v48 = vpop.f32.mrb[9].mxu0 }
 0x528   : > { %v640_v49 = vpop.f32.mrb[10].mxu0 }
 0x529   : > { %647 = vrot.lane.b32.xlu1 %v924_v47, %s1040_s28  ;;  %v977_v50 = vpop.f32.mrb[11].mxu0 }
 0x552   : > { %v770_v51 = vpop.f32.mrb[12].mxu0 }
 0x553   : > { %v925_v52 = vpack.c.bf16 %v770_v51, %v770_v51  ;;  %v988_v53 = vpop.f32.mrb[13].mxu0 }
 0x554   : > { %v773_v54 = vpop.f32.mrb[14].mxu0 }
 0x555   : > { %780 = vrot.lane.b32.xlu0 %v925_v52, %s1039_s27  ;;  %v989_v55 = vpop.f32.mrb[15].mxu0 }
 0x593   : > { %v515_v56 = vpop.permute.xlu0 %514 }
 0x594   : > { %518 = vst.msk [vmem:[%s1155_s10] sm:$0xf] %vm517_vm6, %v515_v56 }
 0x59b   : > { %v648_v57 = vpop.permute.xlu1 %647 }
 0x59c   : > { %651 = vst.msk [vmem:[%s1155_s10] sm:$0xf] %vm650_vm7, %v648_v57 }
 0x5c7   : > { %v781_v58 = vpop.permute.xlu0 %780 }
 0x5c8   : > { %784 = vst.msk [vmem:[%s1155_s10] sm:$0xf] %vm783_vm8, %v781_v58 }
 0x5c9 PF: > { %s14_s15 = sadd.s32 1, %s1035_s15  }
 0x5ca   : > { %p11_p4 = scmp.ge.s32.totalorder %s14_s15, 4  }
 0x5cc   :  { %13 = sbr.rel (!%p11_p4) target bundleno = 1 (0x1), region = 75 }

</bundles_post_ra>
